<compile_context>
chip_gen: v7x
topology: tpu7x:2x2x1
jax: 0.10.0
libtpu: 0.0.40
codegen_flags: <defaults>
</compile_context>

<pallas_src>
import jax
import jax.numpy as jnp
from jax.experimental import pallas as pl
from jax.experimental.pallas import tpu as pltpu


# ---------------------------------------------------------------------------
# Wrapper-side weight packing: one [rows, lanes] f32 slab per encoder.
#   w1 : [3*Cin, C0]  im2col rows ordered (tap, cin)
#   b1 : [1, C0]
#   wg : [C0, S*C1]   support-concatenated output columns
#   bg : [1, C1]
#   w2 : [3*C1, C2]   im2col rows ordered (tap, c1)
#   b2 : [1, C2]
# Every entry starts at an 8-aligned row so in-kernel slices stay tile aligned.
# ---------------------------------------------------------------------------
def _pack_encoder(blocks):
    staged = []
    for blk in blocks:
        w1, b1, wg, bg, w2, b2 = (blk["w1"], blk["b1"], blk["wg"],
                                  blk["bg"], blk["w2"], blk["b2"])
        k1, cin, c0 = w1.shape
        S, _, c1 = wg.shape
        _, _, c2 = w2.shape
        dims = dict(Cin=int(cin), C0=int(c0), C1=int(c1), C2=int(c2), S=int(S))
        packed = dict(
            w1=w1.reshape(k1 * cin, c0),
            b1=jnp.reshape(b1, (1, c0)),
            wg=jnp.transpose(wg, (1, 0, 2)).reshape(c0, S * c1),
            bg=jnp.reshape(bg, (1, c1)),
            w2=w2.reshape(3 * c1, c2),
            b2=jnp.reshape(b2, (1, c2)),
        )
        staged.append((dims, packed))

    lanes = max(m.shape[1] for _, p in staged for m in p.values())
    lanes = max(128, -(-lanes // 128) * 128)

    rows, layout, r = [], [], 0
    for dims, packed in staged:
        entry = dict(dims)
        for name, m in packed.items():
            nrow, ncol = m.shape
            pad_r = (-nrow) % 8
            rows.append(jnp.pad(m.astype(jnp.float32),
                                ((0, pad_r), (0, lanes - ncol))))
            entry[name] = r
            r += nrow + pad_r
        layout.append(entry)
    return jnp.concatenate(rows, axis=0), layout


# ---------------------------------------------------------------------------
# Kernel builder: closes over static slab layouts (row offsets, channel dims).
# ---------------------------------------------------------------------------
def _build_kernel(N, layout_inv, layout_var):

    def st_block(h, adj_ref, slab_ref, L):
        Tin, n, cin = h.shape
        assert cin == L["Cin"] and n == N
        T1, T2 = Tin - 2, Tin - 4
        S, C0, C1, C2 = L["S"], L["C0"], L["C1"], L["C2"]

        # ---- temporal conv 1: im2col (k=3) -> ONE MXU dot -------------------
        w1 = slab_ref[L["w1"]:L["w1"] + 3 * cin, 0:C0]
        b1 = slab_ref[L["b1"]:L["b1"] + 1, 0:C0]
        hc = jnp.concatenate([h[0:T1], h[1:T1 + 1], h[2:T1 + 2]], axis=-1)
        h1 = jnp.dot(hc.reshape(T1 * n, 3 * cin), w1,
                     preferred_element_type=jnp.float32).reshape(T1, n, C0)
        h1 = jnp.maximum(h1 + b1, 0.0)                        # [T1, N, C0]

        # ---- graph conv: one channel-mix dot, then per-support node dots ----
        # (adj_ref[s] holds A_s^T so nodes contract on the minor dim; no
        #  adjacency broadcasts, no batched tiny matmuls)
        wg = slab_ref[L["wg"]:L["wg"] + C0, 0:S * C1]
        bg = slab_ref[L["bg"]:L["bg"] + 1, 0:C1]
        hw = jnp.dot(h1.reshape(T1 * n, C0), wg,
                     preferred_element_type=jnp.float32).reshape(T1, n, S * C1)
        hw = jnp.swapaxes(hw, -1, -2)                         # [T1, S*C1, N]
        acc = None
        for s in range(S):                                    # S <= 3 dots
            piece = hw[:, s * C1:(s + 1) * C1, :].reshape(T1 * C1, n)
            part = jnp.dot(piece, adj_ref[s],
                           preferred_element_type=jnp.float32)
            acc = part if acc is None else acc + part
        h2 = jnp.swapaxes(acc.reshape(T1, C1, n), -1, -2)     # [T1, N, C1]
        h2 = jnp.maximum(h2 + bg, 0.0)

        # ---- temporal conv 2: im2col (k=3) -> ONE MXU dot -------------------
        w2 = slab_ref[L["w2"]:L["w2"] + 3 * C1, 0:C2]
        b2 = slab_ref[L["b2"]:L["b2"] + 1, 0:C2]
        h2c = jnp.concatenate([h2[0:T2], h2[1:T2 + 1], h2[2:T2 + 2]], axis=-1)
        h3 = jnp.dot(h2c.reshape(T2 * n, 3 * C1), w2,
                     preferred_element_type=jnp.float32).reshape(T2, n, C2)
        return jnp.maximum(h3 + b2, 0.0)                      # [T2, N, C2]

    def kernel(x_ref, adj_i_ref, adj_v_ref, slab_i_ref, slab_v_ref,
               h_out_ref, z_out_ref):
        x = x_ref[0]                                          # [T, N, d_input]

        h = x
        for L in layout_inv:                                  # invariant (S=1)
            h = st_block(h, adj_i_ref, slab_i_ref, L)
        h_out_ref[0] = h                                      # [T_out, N, d_model]

        z = x
        for L in layout_var:                                  # variant (S=3)
            z = st_block(z, adj_v_ref, slab_v_ref, L)
        z_out_ref[0] = z

    return kernel


# ---------------------------------------------------------------------------
# Wrapper: hoist adaptive adjacency, pack weights, launch ONE pallas_call.
# ---------------------------------------------------------------------------
@jax.jit
def stable_st_forward(x, params):
    B, T, N, d_input = x.shape
    d_model = params["invariant"][-1]["w2"].shape[2]
    T_out = T - 4 * (3 - 1)

    # Adaptive adjacency is batch independent -> computed once here, not per grid step.
    scores = jax.nn.relu(
        jnp.einsum("sne,sem->snm", params["ne1"], params["ne2"],
                   precision=jax.lax.Precision.HIGHEST))
    adaptive = jax.nn.softmax(scores, axis=1)                 # [3, N, N], dim=1 softmax

    # Kernel consumes A^T per support (node contraction on the minor dim).
    adj_var_t = jnp.swapaxes(adaptive, 1, 2)                  # [3, N, N]
    adj_inv_t = jnp.swapaxes(params["adj"], 0, 1)[None]       # [1, N, N]

    slab_inv, layout_inv = _pack_encoder(params["invariant"])
    slab_var, layout_var = _pack_encoder(params["variant"])

    kernel = _build_kernel(N, layout_inv, layout_var)

    def whole(a):
        if a.ndim == 2:
            return pl.BlockSpec(a.shape, lambda b: (0, 0))
        return pl.BlockSpec(a.shape, lambda b: (0, 0, 0))

    out_sds = jax.ShapeDtypeStruct((B, T_out, N, d_model), jnp.float32)
    out_spec = pl.BlockSpec((1, T_out, N, d_model), lambda b: (b, 0, 0, 0))

    H, Z = pl.pallas_call(
        kernel,
        out_shape=(out_sds, out_sds),
        grid=(B,),
        in_specs=[pl.BlockSpec((1, T, N, d_input), lambda b: (b, 0, 0, 0)),
                  whole(adj_inv_t), whole(adj_var_t),
                  whole(slab_inv), whole(slab_var)],
        out_specs=(out_spec, out_spec),
        compiler_params=pltpu.CompilerParams(
            dimension_semantics=("parallel",),
            vmem_limit_bytes=32 * 1024 * 1024),
    )(x, adj_inv_t, adj_var_t, slab_inv, slab_var)
    return H, Z


# ---------------------------------------------------------------------------
# Pure-JAX reference of the same forward (used as an in-script numeric check).
# ---------------------------------------------------------------------------
def _st_block_ref(h, adjs, blk, prec):
    W1, b1, Wg, bg, W2, b2 = (blk["w1"], blk["b1"], blk["wg"],
                              blk["bg"], blk["w2"], blk["b2"])
    T1 = h.shape[0] - 2
    h1 = sum(jnp.einsum("tnc,cd->tnd", h[k:T1 + k], W1[k], precision=prec)
             for k in range(3))
    h1 = jax.nn.relu(h1 + b1)
    h2 = sum(jnp.einsum("nm,tmc,cd->tnd", adjs[s], h1, Wg[s], precision=prec)
             for s in range(len(adjs)))
    h2 = jax.nn.relu(h2 + bg)
    T2 = T1 - 2
    h3 = sum(jnp.einsum("tnc,cd->tnd", h2[k:T2 + k], W2[k], precision=prec)
             for k in range(3))
    return jax.nn.relu(h3 + b2)


def stable_st_reference(x, params):
    prec = jax.lax.Precision.HIGHEST
    scores = jax.nn.relu(jnp.einsum("sne,sem->snm", params["ne1"], params["ne2"],
                                    precision=prec))
    adaptive = jax.nn.softmax(scores, axis=1)

    def encode(xb, adjs, blocks):
        h = xb
        for blk in blocks:
            h = _st_block_ref(h, adjs, blk, prec)
        return h

    H = jax.vmap(lambda xb: encode(xb, [params["adj"]], params["invariant"]))(x)
    Z = jax.vmap(lambda xb: encode(xb, [adaptive[0], adaptive[1], adaptive[2]],
                                   params["variant"]))(x)
    return H, Z


# ---------------------------------------------------------------------------
# Deterministic parameter construction (shapes implied by __init__).
# ---------------------------------------------------------------------------
def _glorot(key, shape):
    fan_in, fan_out = shape[-2], shape[-1]
    lim = (6.0 / (fan_in + fan_out)) ** 0.5
    return jax.random.uniform(key, shape, jnp.float32, -lim, lim)


def init_encoder_params(key, d_input, d_model, num_supports):
    chans = [[d_model, d_model // 2, d_model], [d_model, d_model // 2, d_model]]
    blocks = []
    cin = d_input
    for blk in chans:
        c0, c1, c2 = blk
        key, k1, k2, k3, k4, k5, k6 = jax.random.split(key, 7)
        blocks.append(dict(
            w1=_glorot(k1, (3, cin, c0)),
            b1=jax.random.uniform(k2, (1, c0), jnp.float32, 0.0, 0.1),
            wg=_glorot(k3, (num_supports, c0, c1)),
            bg=jax.random.uniform(k4, (1, c1), jnp.float32, 0.0, 0.1),
            w2=_glorot(k5, (3, c1, c2)),
            b2=jax.random.uniform(k6, (1, c2), jnp.float32, 0.0, 0.1),
        ))
        cin = c2
    return blocks


def init_params(key, num_nodes, d_input, d_model, embed_size):
    k_adj, k_ne1, k_ne2, k_inv, k_var = jax.random.split(key, 5)
    adj = jax.nn.softmax(jax.random.normal(k_adj, (num_nodes, num_nodes)), axis=1)
    return dict(
        adj=adj.astype(jnp.float32),                                 # [N, N]
        ne1=_glorot(k_ne1, (3, num_nodes, embed_size)),              # node_embeddings_1
        ne2=_glorot(k_ne2, (3, embed_size, num_nodes)),              # node_embeddings_2
        invariant=init_encoder_params(k_inv, d_input, d_model, num_supports=1),
        variant=init_encoder_params(k_var, d_input, d_model, num_supports=3),
    )


if __name__ == "__main__":
    # small-shape config consistent with the module:
    #   batch=2, input_length=16, num_nodes=8, d_input=2, d_model=32, embed_size=16
    B, T, N, C_IN = 2, 16, 8, 2
    D_MODEL, EMBED = 32, 16
    T_OUT = T - 4 * (3 - 1)          # = 8, as in __init__

    key = jax.random.PRNGKey(0)
    kx, kp = jax.random.split(key)
    x = jax.random.normal(kx, (B, T, N, C_IN), jnp.float32)
    params = init_params(kp, N, C_IN, D_MODEL, EMBED)

    H, Z = stable_st_forward(x, params)
    jax.block_until_ready((H, Z))

    assert H.shape == (B, T_OUT, N, D_MODEL), H.shape
    assert Z.shape == (B, T_OUT, N, D_MODEL), Z.shape
    assert bool(jnp.all(jnp.isfinite(H))) and bool(jnp.all(jnp.isfinite(Z)))

    # numeric check against the pure-JAX reference (generous tol: MXU f32 passes)
    H_ref, Z_ref = stable_st_reference(x, params)
    assert bool(jnp.allclose(H, H_ref, rtol=2e-2, atol=2e-2)), \
        float(jnp.max(jnp.abs(H - H_ref)))
    assert bool(jnp.allclose(Z, Z_ref, rtol=2e-2, atol=2e-2)), \
        float(jnp.max(jnp.abs(Z - Z_ref)))

    print("KERNEL_OK")
</pallas_src>

<mosaic_0001>
module attributes {stable_mosaic.version = 11 : i64} {
  func.func @kernel(%arg0: i32, %arg1: memref<1x16x8x2xf32, #tpu.memory_space<vmem>>, %arg2: memref<1x8x8xf32, #tpu.memory_space<vmem>>, %arg3: memref<3x8x8xf32, #tpu.memory_space<vmem>>, %arg4: memref<312x128xf32, #tpu.memory_space<vmem>>, %arg5: memref<312x128xf32, #tpu.memory_space<vmem>>, %arg6: memref<1x8x8x32xf32, #tpu.memory_space<vmem>>, %arg7: memref<1x8x8x32xf32, #tpu.memory_space<vmem>>) attributes {dimension_semantics = [#tpu.dimension_semantics<parallel>], iteration_bounds = array<i64: 2>, scalar_prefetch = 0 : i64, scratch_operands = 0 : i64, tpu.core_type = #tpu.core_type<tc>, window_params = [{transform_indices = @transform_0, window_bounds = array<i64: 1, 16, 8, 2>}, {pipeline_mode = #tpu.pipeline_mode<synchronous>, transform_indices = @transform_1, window_bounds = array<i64: 1, 8, 8>}, {pipeline_mode = #tpu.pipeline_mode<synchronous>, transform_indices = @transform_2, window_bounds = array<i64: 3, 8, 8>}, {pipeline_mode = #tpu.pipeline_mode<synchronous>, transform_indices = @transform_3, window_bounds = array<i64: 312, 128>}, {pipeline_mode = #tpu.pipeline_mode<synchronous>, transform_indices = @transform_4, window_bounds = array<i64: 312, 128>}, {transform_indices = @transform_5, window_bounds = array<i64: 1, 8, 8, 32>}, {transform_indices = @transform_6, window_bounds = array<i64: 1, 8, 8, 32>}]} {
    %c0 = arith.constant 0 : index
    %c0_0 = arith.constant 0 : index
    %c0_1 = arith.constant 0 : index
    %c0_2 = arith.constant 0 : index
    %0 = vector.load %arg1[%c0, %c0_0, %c0_1, %c0_2] : memref<1x16x8x2xf32, #tpu.memory_space<vmem>>, vector<1x16x8x2xf32>
    %1 = vector.shape_cast %0 : vector<1x16x8x2xf32> to vector<16x8x2xf32>
    %c0_3 = arith.constant 0 : index
    %c0_4 = arith.constant 0 : index
    %2 = vector.load %arg4[%c0_3, %c0_4] : memref<312x128xf32, #tpu.memory_space<vmem>>, vector<6x32xf32>
    %c8 = arith.constant 8 : index
    %c0_5 = arith.constant 0 : index
    %3 = vector.load %arg4[%c8, %c0_5] : memref<312x128xf32, #tpu.memory_space<vmem>>, vector<1x32xf32>
    %4 = vector.extract_strided_slice %1 {offsets = [0, 0, 0], sizes = [14, 8, 2], strides = [1, 1, 1]} : vector<16x8x2xf32> to vector<14x8x2xf32>
    %5 = vector.extract_strided_slice %1 {offsets = [1, 0, 0], sizes = [14, 8, 2], strides = [1, 1, 1]} : vector<16x8x2xf32> to vector<14x8x2xf32>
    %6 = vector.extract_strided_slice %1 {offsets = [2, 0, 0], sizes = [14, 8, 2], strides = [1, 1, 1]} : vector<16x8x2xf32> to vector<14x8x2xf32>
    %7 = tpu.concatenate %4, %5, %6 in 2 : vector<14x8x2xf32>, vector<14x8x2xf32>, vector<14x8x2xf32> -> vector<14x8x6xf32>
    %8 = vector.shape_cast %7 : vector<14x8x6xf32> to vector<112x6xf32>
    %cst = arith.constant dense<0.000000e+00> : vector<112x32xf32>
    %9 = tpu.matmul %8, %2, %cst {dimension_numbers = #tpu.dot_dimension_numbers<[1], [0], [0], [1], [0, 0, 1, 1], [], []>} : vector<112x6xf32>, vector<6x32xf32>, vector<112x32xf32> -> vector<112x32xf32>
    %10 = vector.shape_cast %9 : vector<112x32xf32> to vector<14x8x32xf32>
    %11 = vector.shape_cast %3 : vector<1x32xf32> to vector<1x1x32xf32>
    %12 = vector.broadcast %11 : vector<1x1x32xf32> to vector<14x8x32xf32>
    %13 = arith.addf %10, %12 : vector<14x8x32xf32>
    %cst_6 = arith.constant 0.000000e+00 : f32
    %14 = vector.broadcast %cst_6 : f32 to vector<14x8x32xf32>
    %15 = arith.maximumf %13, %14 : vector<14x8x32xf32>
    %c16 = arith.constant 16 : index
    %c0_7 = arith.constant 0 : index
    %16 = vector.load %arg4[%c16, %c0_7] : memref<312x128xf32, #tpu.memory_space<vmem>>, vector<32x16xf32>
    %c48 = arith.constant 48 : index
    %c0_8 = arith.constant 0 : index
    %17 = vector.load %arg4[%c48, %c0_8] : memref<312x128xf32, #tpu.memory_space<vmem>>, vector<1x16xf32>
    %18 = vector.shape_cast %15 : vector<14x8x32xf32> to vector<112x32xf32>
    %cst_9 = arith.constant dense<0.000000e+00> : vector<112x16xf32>
    %19 = tpu.matmul %18, %16, %cst_9 {dimension_numbers = #tpu.dot_dimension_numbers<[1], [0], [0], [1], [0, 0, 1, 1], [], []>} : vector<112x32xf32>, vector<32x16xf32>, vector<112x16xf32> -> vector<112x16xf32>
    %20 = vector.shape_cast %19 : vector<112x16xf32> to vector<14x8x16xf32>
    %21 = tpu.transpose %20, [0, 2, 1] : vector<14x8x16xf32> -> vector<14x16x8xf32>
    %22 = vector.shape_cast %21 : vector<14x16x8xf32> to vector<224x8xf32>
    %c0_10 = arith.constant 0 : index
    %c0_11 = arith.constant 0 : index
    %c0_12 = arith.constant 0 : index
    %23 = vector.load %arg2[%c0_10, %c0_11, %c0_12] : memref<1x8x8xf32, #tpu.memory_space<vmem>>, vector<1x8x8xf32>
    %24 = vector.shape_cast %23 : vector<1x8x8xf32> to vector<8x8xf32>
    %cst_13 = arith.constant dense<0.000000e+00> : vector<224x8xf32>
    %25 = tpu.matmul %22, %24, %cst_13 {dimension_numbers = #tpu.dot_dimension_numbers<[1], [0], [0], [1], [0, 0, 1, 1], [], []>} : vector<224x8xf32>, vector<8x8xf32>, vector<224x8xf32> -> vector<224x8xf32>
    %26 = vector.shape_cast %25 : vector<224x8xf32> to vector<14x16x8xf32>
    %27 = tpu.transpose %26, [0, 2, 1] : vector<14x16x8xf32> -> vector<14x8x16xf32>
    %28 = vector.shape_cast %17 : vector<1x16xf32> to vector<1x1x16xf32>
    %29 = vector.broadcast %28 : vector<1x1x16xf32> to vector<14x8x16xf32>
    %30 = arith.addf %27, %29 : vector<14x8x16xf32>
    %cst_14 = arith.constant 0.000000e+00 : f32
    %31 = vector.broadcast %cst_14 : f32 to vector<14x8x16xf32>
    %32 = arith.maximumf %30, %31 : vector<14x8x16xf32>
    %c56 = arith.constant 56 : index
    %c0_15 = arith.constant 0 : index
    %33 = vector.load %arg4[%c56, %c0_15] : memref<312x128xf32, #tpu.memory_space<vmem>>, vector<48x32xf32>
    %c104 = arith.constant 104 : index
    %c0_16 = arith.constant 0 : index
    %34 = vector.load %arg4[%c104, %c0_16] : memref<312x128xf32, #tpu.memory_space<vmem>>, vector<1x32xf32>
    %35 = vector.extract_strided_slice %32 {offsets = [0, 0, 0], sizes = [12, 8, 16], strides = [1, 1, 1]} : vector<14x8x16xf32> to vector<12x8x16xf32>
    %36 = vector.extract_strided_slice %32 {offsets = [1, 0, 0], sizes = [12, 8, 16], strides = [1, 1, 1]} : vector<14x8x16xf32> to vector<12x8x16xf32>
    %37 = vector.extract_strided_slice %32 {offsets = [2, 0, 0], sizes = [12, 8, 16], strides = [1, 1, 1]} : vector<14x8x16xf32> to vector<12x8x16xf32>
    %38 = tpu.concatenate %35, %36, %37 in 2 : vector<12x8x16xf32>, vector<12x8x16xf32>, vector<12x8x16xf32> -> vector<12x8x48xf32>
    %39 = vector.shape_cast %38 : vector<12x8x48xf32> to vector<96x48xf32>
    %cst_17 = arith.constant dense<0.000000e+00> : vector<96x32xf32>
    %40 = tpu.matmul %39, %33, %cst_17 {dimension_numbers = #tpu.dot_dimension_numbers<[1], [0], [0], [1], [0, 0, 1, 1], [], []>} : vector<96x48xf32>, vector<48x32xf32>, vector<96x32xf32> -> vector<96x32xf32>
    %41 = vector.shape_cast %40 : vector<96x32xf32> to vector<12x8x32xf32>
    %42 = vector.shape_cast %34 : vector<1x32xf32> to vector<1x1x32xf32>
    %43 = vector.broadcast %42 : vector<1x1x32xf32> to vector<12x8x32xf32>
    %44 = arith.addf %41, %43 : vector<12x8x32xf32>
    %cst_18 = arith.constant 0.000000e+00 : f32
    %45 = vector.broadcast %cst_18 : f32 to vector<12x8x32xf32>
    %46 = arith.maximumf %44, %45 : vector<12x8x32xf32>
    %c112 = arith.constant 112 : index
    %c0_19 = arith.constant 0 : index
    %47 = vector.load %arg4[%c112, %c0_19] : memref<312x128xf32, #tpu.memory_space<vmem>>, vector<96x32xf32>
    %c208 = arith.constant 208 : index
    %c0_20 = arith.constant 0 : index
    %48 = vector.load %arg4[%c208, %c0_20] : memref<312x128xf32, #tpu.memory_space<vmem>>, vector<1x32xf32>
    %49 = vector.extract_strided_slice %46 {offsets = [0, 0, 0], sizes = [10, 8, 32], strides = [1, 1, 1]} : vector<12x8x32xf32> to vector<10x8x32xf32>
    %50 = vector.extract_strided_slice %46 {offsets = [1, 0, 0], sizes = [10, 8, 32], strides = [1, 1, 1]} : vector<12x8x32xf32> to vector<10x8x32xf32>
    %51 = vector.extract_strided_slice %46 {offsets = [2, 0, 0], sizes = [10, 8, 32], strides = [1, 1, 1]} : vector<12x8x32xf32> to vector<10x8x32xf32>
    %52 = tpu.concatenate %49, %50, %51 in 2 : vector<10x8x32xf32>, vector<10x8x32xf32>, vector<10x8x32xf32> -> vector<10x8x96xf32>
    %53 = vector.shape_cast %52 : vector<10x8x96xf32> to vector<80x96xf32>
    %cst_21 = arith.constant dense<0.000000e+00> : vector<80x32xf32>
    %54 = tpu.matmul %53, %47, %cst_21 {dimension_numbers = #tpu.dot_dimension_numbers<[1], [0], [0], [1], [0, 0, 1, 1], [], []>} : vector<80x96xf32>, vector<96x32xf32>, vector<80x32xf32> -> vector<80x32xf32>
    %55 = vector.shape_cast %54 : vector<80x32xf32> to vector<10x8x32xf32>
    %56 = vector.shape_cast %48 : vector<1x32xf32> to vector<1x1x32xf32>
    %57 = vector.broadcast %56 : vector<1x1x32xf32> to vector<10x8x32xf32>
    %58 = arith.addf %55, %57 : vector<10x8x32xf32>
    %cst_22 = arith.constant 0.000000e+00 : f32
    %59 = vector.broadcast %cst_22 : f32 to vector<10x8x32xf32>
    %60 = arith.maximumf %58, %59 : vector<10x8x32xf32>
    %c216 = arith.constant 216 : index
    %c0_23 = arith.constant 0 : index
    %61 = vector.load %arg4[%c216, %c0_23] : memref<312x128xf32, #tpu.memory_space<vmem>>, vector<32x16xf32>
    %c248 = arith.constant 248 : index
    %c0_24 = arith.constant 0 : index
    %62 = vector.load %arg4[%c248, %c0_24] : memref<312x128xf32, #tpu.memory_space<vmem>>, vector<1x16xf32>
    %63 = vector.shape_cast %60 : vector<10x8x32xf32> to vector<80x32xf32>
    %cst_25 = arith.constant dense<0.000000e+00> : vector<80x16xf32>
    %64 = tpu.matmul %63, %61, %cst_25 {dimension_numbers = #tpu.dot_dimension_numbers<[1], [0], [0], [1], [0, 0, 1, 1], [], []>} : vector<80x32xf32>, vector<32x16xf32>, vector<80x16xf32> -> vector<80x16xf32>
    %65 = vector.shape_cast %64 : vector<80x16xf32> to vector<10x8x16xf32>
    %66 = tpu.transpose %65, [0, 2, 1] : vector<10x8x16xf32> -> vector<10x16x8xf32>
    %67 = vector.shape_cast %66 : vector<10x16x8xf32> to vector<160x8xf32>
    %c0_26 = arith.constant 0 : index
    %c0_27 = arith.constant 0 : index
    %c0_28 = arith.constant 0 : index
    %68 = vector.load %arg2[%c0_26, %c0_27, %c0_28] : memref<1x8x8xf32, #tpu.memory_space<vmem>>, vector<1x8x8xf32>
    %69 = vector.shape_cast %68 : vector<1x8x8xf32> to vector<8x8xf32>
    %cst_29 = arith.constant dense<0.000000e+00> : vector<160x8xf32>
    %70 = tpu.matmul %67, %69, %cst_29 {dimension_numbers = #tpu.dot_dimension_numbers<[1], [0], [0], [1], [0, 0, 1, 1], [], []>} : vector<160x8xf32>, vector<8x8xf32>, vector<160x8xf32> -> vector<160x8xf32>
    %71 = vector.shape_cast %70 : vector<160x8xf32> to vector<10x16x8xf32>
    %72 = tpu.transpose %71, [0, 2, 1] : vector<10x16x8xf32> -> vector<10x8x16xf32>
    %73 = vector.shape_cast %62 : vector<1x16xf32> to vector<1x1x16xf32>
    %74 = vector.broadcast %73 : vector<1x1x16xf32> to vector<10x8x16xf32>
    %75 = arith.addf %72, %74 : vector<10x8x16xf32>
    %cst_30 = arith.constant 0.000000e+00 : f32
    %76 = vector.broadcast %cst_30 : f32 to vector<10x8x16xf32>
    %77 = arith.maximumf %75, %76 : vector<10x8x16xf32>
    %c256 = arith.constant 256 : index
    %c0_31 = arith.constant 0 : index
    %78 = vector.load %arg4[%c256, %c0_31] : memref<312x128xf32, #tpu.memory_space<vmem>>, vector<48x32xf32>
    %c304 = arith.constant 304 : index
    %c0_32 = arith.constant 0 : index
    %79 = vector.load %arg4[%c304, %c0_32] : memref<312x128xf32, #tpu.memory_space<vmem>>, vector<1x32xf32>
    %80 = vector.extract_strided_slice %77 {offsets = [0, 0, 0], sizes = [8, 8, 16], strides = [1, 1, 1]} : vector<10x8x16xf32> to vector<8x8x16xf32>
    %81 = vector.extract_strided_slice %77 {offsets = [1, 0, 0], sizes = [8, 8, 16], strides = [1, 1, 1]} : vector<10x8x16xf32> to vector<8x8x16xf32>
    %82 = vector.extract_strided_slice %77 {offsets = [2, 0, 0], sizes = [8, 8, 16], strides = [1, 1, 1]} : vector<10x8x16xf32> to vector<8x8x16xf32>
    %83 = tpu.concatenate %80, %81, %82 in 2 : vector<8x8x16xf32>, vector<8x8x16xf32>, vector<8x8x16xf32> -> vector<8x8x48xf32>
    %84 = vector.shape_cast %83 : vector<8x8x48xf32> to vector<64x48xf32>
    %cst_33 = arith.constant dense<0.000000e+00> : vector<64x32xf32>
    %85 = tpu.matmul %84, %78, %cst_33 {dimension_numbers = #tpu.dot_dimension_numbers<[1], [0], [0], [1], [0, 0, 1, 1], [], []>} : vector<64x48xf32>, vector<48x32xf32>, vector<64x32xf32> -> vector<64x32xf32>
    %86 = vector.shape_cast %85 : vector<64x32xf32> to vector<8x8x32xf32>
    %87 = vector.shape_cast %79 : vector<1x32xf32> to vector<1x1x32xf32>
    %88 = vector.broadcast %87 : vector<1x1x32xf32> to vector<8x8x32xf32>
    %89 = arith.addf %86, %88 : vector<8x8x32xf32>
    %cst_34 = arith.constant 0.000000e+00 : f32
    %90 = vector.broadcast %cst_34 : f32 to vector<8x8x32xf32>
    %91 = arith.maximumf %89, %90 : vector<8x8x32xf32>
    %c0_35 = arith.constant 0 : index
    %c0_36 = arith.constant 0 : index
    %c0_37 = arith.constant 0 : index
    %c0_38 = arith.constant 0 : index
    %92 = vector.load %arg6[%c0_35, %c0_36, %c0_37, %c0_38] : memref<1x8x8x32xf32, #tpu.memory_space<vmem>>, vector<1x8x8x32xf32>
    %93 = vector.shape_cast %92 : vector<1x8x8x32xf32> to vector<8x8x32xf32>
    %94 = vector.shape_cast %91 : vector<8x8x32xf32> to vector<1x8x8x32xf32>
    tpu.vector_store %arg6[%c0_35, %c0_36, %c0_37, %c0_38], %94 {strides = array<i32>} : memref<1x8x8x32xf32, #tpu.memory_space<vmem>>, vector<1x8x8x32xf32>,
    %c0_39 = arith.constant 0 : index
    %c0_40 = arith.constant 0 : index
    %95 = vector.load %arg5[%c0_39, %c0_40] : memref<312x128xf32, #tpu.memory_space<vmem>>, vector<6x32xf32>
    %c8_41 = arith.constant 8 : index
    %c0_42 = arith.constant 0 : index
    %96 = vector.load %arg5[%c8_41, %c0_42] : memref<312x128xf32, #tpu.memory_space<vmem>>, vector<1x32xf32>
    %97 = vector.extract_strided_slice %1 {offsets = [0, 0, 0], sizes = [14, 8, 2], strides = [1, 1, 1]} : vector<16x8x2xf32> to vector<14x8x2xf32>
    %98 = vector.extract_strided_slice %1 {offsets = [1, 0, 0], sizes = [14, 8, 2], strides = [1, 1, 1]} : vector<16x8x2xf32> to vector<14x8x2xf32>
    %99 = vector.extract_strided_slice %1 {offsets = [2, 0, 0], sizes = [14, 8, 2], strides = [1, 1, 1]} : vector<16x8x2xf32> to vector<14x8x2xf32>
    %100 = tpu.concatenate %97, %98, %99 in 2 : vector<14x8x2xf32>, vector<14x8x2xf32>, vector<14x8x2xf32> -> vector<14x8x6xf32>
    %101 = vector.shape_cast %100 : vector<14x8x6xf32> to vector<112x6xf32>
    %cst_43 = arith.constant dense<0.000000e+00> : vector<112x32xf32>
    %102 = tpu.matmul %101, %95, %cst_43 {dimension_numbers = #tpu.dot_dimension_numbers<[1], [0], [0], [1], [0, 0, 1, 1], [], []>} : vector<112x6xf32>, vector<6x32xf32>, vector<112x32xf32> -> vector<112x32xf32>
    %103 = vector.shape_cast %102 : vector<112x32xf32> to vector<14x8x32xf32>
    %104 = vector.shape_cast %96 : vector<1x32xf32> to vector<1x1x32xf32>
    %105 = vector.broadcast %104 : vector<1x1x32xf32> to vector<14x8x32xf32>
    %106 = arith.addf %103, %105 : vector<14x8x32xf32>
    %cst_44 = arith.constant 0.000000e+00 : f32
    %107 = vector.broadcast %cst_44 : f32 to vector<14x8x32xf32>
    %108 = arith.maximumf %106, %107 : vector<14x8x32xf32>
    %c16_45 = arith.constant 16 : index
    %c0_46 = arith.constant 0 : index
    %109 = vector.load %arg5[%c16_45, %c0_46] : memref<312x128xf32, #tpu.memory_space<vmem>>, vector<32x48xf32>
    %c48_47 = arith.constant 48 : index
    %c0_48 = arith.constant 0 : index
    %110 = vector.load %arg5[%c48_47, %c0_48] : memref<312x128xf32, #tpu.memory_space<vmem>>, vector<1x16xf32>
    %111 = vector.shape_cast %108 : vector<14x8x32xf32> to vector<112x32xf32>
    %cst_49 = arith.constant dense<0.000000e+00> : vector<112x48xf32>
    %112 = tpu.matmul %111, %109, %cst_49 {dimension_numbers = #tpu.dot_dimension_numbers<[1], [0], [0], [1], [0, 0, 1, 1], [], []>} : vector<112x32xf32>, vector<32x48xf32>, vector<112x48xf32> -> vector<112x48xf32>
    %113 = vector.shape_cast %112 : vector<112x48xf32> to vector<14x8x48xf32>
    %114 = tpu.transpose %113, [0, 2, 1] : vector<14x8x48xf32> -> vector<14x48x8xf32>
    %115 = vector.extract_strided_slice %114 {offsets = [0, 0, 0], sizes = [14, 16, 8], strides = [1, 1, 1]} : vector<14x48x8xf32> to vector<14x16x8xf32>
    %116 = vector.shape_cast %115 : vector<14x16x8xf32> to vector<224x8xf32>
    %c0_50 = arith.constant 0 : index
    %c0_51 = arith.constant 0 : index
    %c0_52 = arith.constant 0 : index
    %117 = vector.load %arg3[%c0_50, %c0_51, %c0_52] : memref<3x8x8xf32, #tpu.memory_space<vmem>>, vector<1x8x8xf32>
    %118 = vector.shape_cast %117 : vector<1x8x8xf32> to vector<8x8xf32>
    %cst_53 = arith.constant dense<0.000000e+00> : vector<224x8xf32>
    %119 = tpu.matmul %116, %118, %cst_53 {dimension_numbers = #tpu.dot_dimension_numbers<[1], [0], [0], [1], [0, 0, 1, 1], [], []>} : vector<224x8xf32>, vector<8x8xf32>, vector<224x8xf32> -> vector<224x8xf32>
    %120 = vector.extract_strided_slice %114 {offsets = [0, 16, 0], sizes = [14, 16, 8], strides = [1, 1, 1]} : vector<14x48x8xf32> to vector<14x16x8xf32>
    %121 = vector.shape_cast %120 : vector<14x16x8xf32> to vector<224x8xf32>
    %c1 = arith.constant 1 : index
    %c0_54 = arith.constant 0 : index
    %c0_55 = arith.constant 0 : index
    %122 = vector.load %arg3[%c1, %c0_54, %c0_55] : memref<3x8x8xf32, #tpu.memory_space<vmem>>, vector<1x8x8xf32>
    %123 = vector.shape_cast %122 : vector<1x8x8xf32> to vector<8x8xf32>
    %cst_56 = arith.constant dense<0.000000e+00> : vector<224x8xf32>
    %124 = tpu.matmul %121, %123, %cst_56 {dimension_numbers = #tpu.dot_dimension_numbers<[1], [0], [0], [1], [0, 0, 1, 1], [], []>} : vector<224x8xf32>, vector<8x8xf32>, vector<224x8xf32> -> vector<224x8xf32>
    %125 = arith.addf %119, %124 : vector<224x8xf32>
    %126 = vector.extract_strided_slice %114 {offsets = [0, 32, 0], sizes = [14, 16, 8], strides = [1, 1, 1]} : vector<14x48x8xf32> to vector<14x16x8xf32>
    %127 = vector.shape_cast %126 : vector<14x16x8xf32> to vector<224x8xf32>
    %c2 = arith.constant 2 : index
    %c0_57 = arith.constant 0 : index
    %c0_58 = arith.constant 0 : index
    %128 = vector.load %arg3[%c2, %c0_57, %c0_58] : memref<3x8x8xf32, #tpu.memory_space<vmem>>, vector<1x8x8xf32>
    %129 = vector.shape_cast %128 : vector<1x8x8xf32> to vector<8x8xf32>
    %cst_59 = arith.constant dense<0.000000e+00> : vector<224x8xf32>
    %130 = tpu.matmul %127, %129, %cst_59 {dimension_numbers = #tpu.dot_dimension_numbers<[1], [0], [0], [1], [0, 0, 1, 1], [], []>} : vector<224x8xf32>, vector<8x8xf32>, vector<224x8xf32> -> vector<224x8xf32>
    %131 = arith.addf %125, %130 : vector<224x8xf32>
    %132 = vector.shape_cast %131 : vector<224x8xf32> to vector<14x16x8xf32>
    %133 = tpu.transpose %132, [0, 2, 1] : vector<14x16x8xf32> -> vector<14x8x16xf32>
    %134 = vector.shape_cast %110 : vector<1x16xf32> to vector<1x1x16xf32>
    %135 = vector.broadcast %134 : vector<1x1x16xf32> to vector<14x8x16xf32>
    %136 = arith.addf %133, %135 : vector<14x8x16xf32>
    %cst_60 = arith.constant 0.000000e+00 : f32
    %137 = vector.broadcast %cst_60 : f32 to vector<14x8x16xf32>
    %138 = arith.maximumf %136, %137 : vector<14x8x16xf32>
    %c56_61 = arith.constant 56 : index
    %c0_62 = arith.constant 0 : index
    %139 = vector.load %arg5[%c56_61, %c0_62] : memref<312x128xf32, #tpu.memory_space<vmem>>, vector<48x32xf32>
    %c104_63 = arith.constant 104 : index
    %c0_64 = arith.constant 0 : index
    %140 = vector.load %arg5[%c104_63, %c0_64] : memref<312x128xf32, #tpu.memory_space<vmem>>, vector<1x32xf32>
    %141 = vector.extract_strided_slice %138 {offsets = [0, 0, 0], sizes = [12, 8, 16], strides = [1, 1, 1]} : vector<14x8x16xf32> to vector<12x8x16xf32>
    %142 = vector.extract_strided_slice %138 {offsets = [1, 0, 0], sizes = [12, 8, 16], strides = [1, 1, 1]} : vector<14x8x16xf32> to vector<12x8x16xf32>
    %143 = vector.extract_strided_slice %138 {offsets = [2, 0, 0], sizes = [12, 8, 16], strides = [1, 1, 1]} : vector<14x8x16xf32> to vector<12x8x16xf32>
    %144 = tpu.concatenate %141, %142, %143 in 2 : vector<12x8x16xf32>, vector<12x8x16xf32>, vector<12x8x16xf32> -> vector<12x8x48xf32>
    %145 = vector.shape_cast %144 : vector<12x8x48xf32> to vector<96x48xf32>
    %cst_65 = arith.constant dense<0.000000e+00> : vector<96x32xf32>
    %146 = tpu.matmul %145, %139, %cst_65 {dimension_numbers = #tpu.dot_dimension_numbers<[1], [0], [0], [1], [0, 0, 1, 1], [], []>} : vector<96x48xf32>, vector<48x32xf32>, vector<96x32xf32> -> vector<96x32xf32>
    %147 = vector.shape_cast %146 : vector<96x32xf32> to vector<12x8x32xf32>
    %148 = vector.shape_cast %140 : vector<1x32xf32> to vector<1x1x32xf32>
    %149 = vector.broadcast %148 : vector<1x1x32xf32> to vector<12x8x32xf32>
    %150 = arith.addf %147, %149 : vector<12x8x32xf32>
    %cst_66 = arith.constant 0.000000e+00 : f32
    %151 = vector.broadcast %cst_66 : f32 to vector<12x8x32xf32>
    %152 = arith.maximumf %150, %151 : vector<12x8x32xf32>
    %c112_67 = arith.constant 112 : index
    %c0_68 = arith.constant 0 : index
    %153 = vector.load %arg5[%c112_67, %c0_68] : memref<312x128xf32, #tpu.memory_space<vmem>>, vector<96x32xf32>
    %c208_69 = arith.constant 208 : index
    %c0_70 = arith.constant 0 : index
    %154 = vector.load %arg5[%c208_69, %c0_70] : memref<312x128xf32, #tpu.memory_space<vmem>>, vector<1x32xf32>
    %155 = vector.extract_strided_slice %152 {offsets = [0, 0, 0], sizes = [10, 8, 32], strides = [1, 1, 1]} : vector<12x8x32xf32> to vector<10x8x32xf32>
    %156 = vector.extract_strided_slice %152 {offsets = [1, 0, 0], sizes = [10, 8, 32], strides = [1, 1, 1]} : vector<12x8x32xf32> to vector<10x8x32xf32>
    %157 = vector.extract_strided_slice %152 {offsets = [2, 0, 0], sizes = [10, 8, 32], strides = [1, 1, 1]} : vector<12x8x32xf32> to vector<10x8x32xf32>
    %158 = tpu.concatenate %155, %156, %157 in 2 : vector<10x8x32xf32>, vector<10x8x32xf32>, vector<10x8x32xf32> -> vector<10x8x96xf32>
    %159 = vector.shape_cast %158 : vector<10x8x96xf32> to vector<80x96xf32>
    %cst_71 = arith.constant dense<0.000000e+00> : vector<80x32xf32>
    %160 = tpu.matmul %159, %153, %cst_71 {dimension_numbers = #tpu.dot_dimension_numbers<[1], [0], [0], [1], [0, 0, 1, 1], [], []>} : vector<80x96xf32>, vector<96x32xf32>, vector<80x32xf32> -> vector<80x32xf32>
    %161 = vector.shape_cast %160 : vector<80x32xf32> to vector<10x8x32xf32>
    %162 = vector.shape_cast %154 : vector<1x32xf32> to vector<1x1x32xf32>
    %163 = vector.broadcast %162 : vector<1x1x32xf32> to vector<10x8x32xf32>
    %164 = arith.addf %161, %163 : vector<10x8x32xf32>
    %cst_72 = arith.constant 0.000000e+00 : f32
    %165 = vector.broadcast %cst_72 : f32 to vector<10x8x32xf32>
    %166 = arith.maximumf %164, %165 : vector<10x8x32xf32>
    %c216_73 = arith.constant 216 : index
    %c0_74 = arith.constant 0 : index
    %167 = vector.load %arg5[%c216_73, %c0_74] : memref<312x128xf32, #tpu.memory_space<vmem>>, vector<32x48xf32>
    %c248_75 = arith.constant 248 : index
    %c0_76 = arith.constant 0 : index
    %168 = vector.load %arg5[%c248_75, %c0_76] : memref<312x128xf32, #tpu.memory_space<vmem>>, vector<1x16xf32>
    %169 = vector.shape_cast %166 : vector<10x8x32xf32> to vector<80x32xf32>
    %cst_77 = arith.constant dense<0.000000e+00> : vector<80x48xf32>
    %170 = tpu.matmul %169, %167, %cst_77 {dimension_numbers = #tpu.dot_dimension_numbers<[1], [0], [0], [1], [0, 0, 1, 1], [], []>} : vector<80x32xf32>, vector<32x48xf32>, vector<80x48xf32> -> vector<80x48xf32>
    %171 = vector.shape_cast %170 : vector<80x48xf32> to vector<10x8x48xf32>
    %172 = tpu.transpose %171, [0, 2, 1] : vector<10x8x48xf32> -> vector<10x48x8xf32>
    %173 = vector.extract_strided_slice %172 {offsets = [0, 0, 0], sizes = [10, 16, 8], strides = [1, 1, 1]} : vector<10x48x8xf32> to vector<10x16x8xf32>
    %174 = vector.shape_cast %173 : vector<10x16x8xf32> to vector<160x8xf32>
    %c0_78 = arith.constant 0 : index
    %c0_79 = arith.constant 0 : index
    %c0_80 = arith.constant 0 : index
    %175 = vector.load %arg3[%c0_78, %c0_79, %c0_80] : memref<3x8x8xf32, #tpu.memory_space<vmem>>, vector<1x8x8xf32>
    %176 = vector.shape_cast %175 : vector<1x8x8xf32> to vector<8x8xf32>
    %cst_81 = arith.constant dense<0.000000e+00> : vector<160x8xf32>
    %177 = tpu.matmul %174, %176, %cst_81 {dimension_numbers = #tpu.dot_dimension_numbers<[1], [0], [0], [1], [0, 0, 1, 1], [], []>} : vector<160x8xf32>, vector<8x8xf32>, vector<160x8xf32> -> vector<160x8xf32>
    %178 = vector.extract_strided_slice %172 {offsets = [0, 16, 0], sizes = [10, 16, 8], strides = [1, 1, 1]} : vector<10x48x8xf32> to vector<10x16x8xf32>
    %179 = vector.shape_cast %178 : vector<10x16x8xf32> to vector<160x8xf32>
    %c1_82 = arith.constant 1 : index
    %c0_83 = arith.constant 0 : index
    %c0_84 = arith.constant 0 : index
    %180 = vector.load %arg3[%c1_82, %c0_83, %c0_84] : memref<3x8x8xf32, #tpu.memory_space<vmem>>, vector<1x8x8xf32>
    %181 = vector.shape_cast %180 : vector<1x8x8xf32> to vector<8x8xf32>
    %cst_85 = arith.constant dense<0.000000e+00> : vector<160x8xf32>
    %182 = tpu.matmul %179, %181, %cst_85 {dimension_numbers = #tpu.dot_dimension_numbers<[1], [0], [0], [1], [0, 0, 1, 1], [], []>} : vector<160x8xf32>, vector<8x8xf32>, vector<160x8xf32> -> vector<160x8xf32>
    %183 = arith.addf %177, %182 : vector<160x8xf32>
    %184 = vector.extract_strided_slice %172 {offsets = [0, 32, 0], sizes = [10, 16, 8], strides = [1, 1, 1]} : vector<10x48x8xf32> to vector<10x16x8xf32>
    %185 = vector.shape_cast %184 : vector<10x16x8xf32> to vector<160x8xf32>
    %c2_86 = arith.constant 2 : index
    %c0_87 = arith.constant 0 : index
    %c0_88 = arith.constant 0 : index
    %186 = vector.load %arg3[%c2_86, %c0_87, %c0_88] : memref<3x8x8xf32, #tpu.memory_space<vmem>>, vector<1x8x8xf32>
    %187 = vector.shape_cast %186 : vector<1x8x8xf32> to vector<8x8xf32>
    %cst_89 = arith.constant dense<0.000000e+00> : vector<160x8xf32>
    %188 = tpu.matmul %185, %187, %cst_89 {dimension_numbers = #tpu.dot_dimension_numbers<[1], [0], [0], [1], [0, 0, 1, 1], [], []>} : vector<160x8xf32>, vector<8x8xf32>, vector<160x8xf32> -> vector<160x8xf32>
    %189 = arith.addf %183, %188 : vector<160x8xf32>
    %190 = vector.shape_cast %189 : vector<160x8xf32> to vector<10x16x8xf32>
    %191 = tpu.transpose %190, [0, 2, 1] : vector<10x16x8xf32> -> vector<10x8x16xf32>
    %192 = vector.shape_cast %168 : vector<1x16xf32> to vector<1x1x16xf32>
    %193 = vector.broadcast %192 : vector<1x1x16xf32> to vector<10x8x16xf32>
    %194 = arith.addf %191, %193 : vector<10x8x16xf32>
    %cst_90 = arith.constant 0.000000e+00 : f32
    %195 = vector.broadcast %cst_90 : f32 to vector<10x8x16xf32>
    %196 = arith.maximumf %194, %195 : vector<10x8x16xf32>
    %c256_91 = arith.constant 256 : index
    %c0_92 = arith.constant 0 : index
    %197 = vector.load %arg5[%c256_91, %c0_92] : memref<312x128xf32, #tpu.memory_space<vmem>>, vector<48x32xf32>
    %c304_93 = arith.constant 304 : index
    %c0_94 = arith.constant 0 : index
    %198 = vector.load %arg5[%c304_93, %c0_94] : memref<312x128xf32, #tpu.memory_space<vmem>>, vector<1x32xf32>
    %199 = vector.extract_strided_slice %196 {offsets = [0, 0, 0], sizes = [8, 8, 16], strides = [1, 1, 1]} : vector<10x8x16xf32> to vector<8x8x16xf32>
    %200 = vector.extract_strided_slice %196 {offsets = [1, 0, 0], sizes = [8, 8, 16], strides = [1, 1, 1]} : vector<10x8x16xf32> to vector<8x8x16xf32>
    %201 = vector.extract_strided_slice %196 {offsets = [2, 0, 0], sizes = [8, 8, 16], strides = [1, 1, 1]} : vector<10x8x16xf32> to vector<8x8x16xf32>
    %202 = tpu.concatenate %199, %200, %201 in 2 : vector<8x8x16xf32>, vector<8x8x16xf32>, vector<8x8x16xf32> -> vector<8x8x48xf32>
    %203 = vector.shape_cast %202 : vector<8x8x48xf32> to vector<64x48xf32>
    %cst_95 = arith.constant dense<0.000000e+00> : vector<64x32xf32>
    %204 = tpu.matmul %203, %197, %cst_95 {dimension_numbers = #tpu.dot_dimension_numbers<[1], [0], [0], [1], [0, 0, 1, 1], [], []>} : vector<64x48xf32>, vector<48x32xf32>, vector<64x32xf32> -> vector<64x32xf32>
    %205 = vector.shape_cast %204 : vector<64x32xf32> to vector<8x8x32xf32>
    %206 = vector.shape_cast %198 : vector<1x32xf32> to vector<1x1x32xf32>
    %207 = vector.broadcast %206 : vector<1x1x32xf32> to vector<8x8x32xf32>
    %208 = arith.addf %205, %207 : vector<8x8x32xf32>
    %cst_96 = arith.constant 0.000000e+00 : f32
    %209 = vector.broadcast %cst_96 : f32 to vector<8x8x32xf32>
    %210 = arith.maximumf %208, %209 : vector<8x8x32xf32>
    %c0_97 = arith.constant 0 : index
    %c0_98 = arith.constant 0 : index
    %c0_99 = arith.constant 0 : index
    %c0_100 = arith.constant 0 : index
    %211 = vector.load %arg7[%c0_97, %c0_98, %c0_99, %c0_100] : memref<1x8x8x32xf32, #tpu.memory_space<vmem>>, vector<1x8x8x32xf32>
    %212 = vector.shape_cast %211 : vector<1x8x8x32xf32> to vector<8x8x32xf32>
    %213 = vector.shape_cast %210 : vector<8x8x32xf32> to vector<1x8x8x32xf32>
    tpu.vector_store %arg7[%c0_97, %c0_98, %c0_99, %c0_100], %213 {strides = array<i32>} : memref<1x8x8x32xf32, #tpu.memory_space<vmem>>, vector<1x8x8x32xf32>,
    return
  }
  func.func @transform_0(%arg0: i32) -> (i32, i32, i32, i32) {
    %c0_i32 = arith.constant 0 : i32
    %c0_i32_0 = arith.constant 0 : i32
    %c0_i32_1 = arith.constant 0 : i32
    %c0_i32_2 = arith.constant 0 : i32
    return %arg0, %c0_i32, %c0_i32_0, %c0_i32_1 : i32, i32, i32, i32
  }
  func.func @transform_1(%arg0: i32) -> (i32, i32, i32) {
    %c0_i32 = arith.constant 0 : i32
    %c0_i32_0 = arith.constant 0 : i32
    %c0_i32_1 = arith.constant 0 : i32
    %c0_i32_2 = arith.constant 0 : i32
    return %c0_i32, %c0_i32_0, %c0_i32_1 : i32, i32, i32
  }
  func.func @transform_2(%arg0: i32) -> (i32, i32, i32) {
    %c0_i32 = arith.constant 0 : i32
    %c0_i32_0 = arith.constant 0 : i32
    %c0_i32_1 = arith.constant 0 : i32
    %c0_i32_2 = arith.constant 0 : i32
    return %c0_i32, %c0_i32_0, %c0_i32_1 : i32, i32, i32
  }
  func.func @transform_3(%arg0: i32) -> (i32, i32) {
    %c0_i32 = arith.constant 0 : i32
    %c0_i32_0 = arith.constant 0 : i32
    %c0_i32_1 = arith.constant 0 : i32
    return %c0_i32, %c0_i32_0 : i32, i32
  }
  func.func @transform_4(%arg0: i32) -> (i32, i32) {
    %c0_i32 = arith.constant 0 : i32
    %c0_i32_0 = arith.constant 0 : i32
    %c0_i32_1 = arith.constant 0 : i32
    return %c0_i32, %c0_i32_0 : i32, i32
  }
  func.func @transform_5(%arg0: i32) -> (i32, i32, i32, i32) {
    %c0_i32 = arith.constant 0 : i32
    %c0_i32_0 = arith.constant 0 : i32
    %c0_i32_1 = arith.constant 0 : i32
    %c0_i32_2 = arith.constant 0 : i32
    return %arg0, %c0_i32, %c0_i32_0, %c0_i32_1 : i32, i32, i32, i32
  }
  func.func @transform_6(%arg0: i32) -> (i32, i32, i32, i32) {
    %c0_i32 = arith.constant 0 : i32
    %c0_i32_0 = arith.constant 0 : i32
    %c0_i32_1 = arith.constant 0 : i32
    %c0_i32_2 = arith.constant 0 : i32
    return %arg0, %c0_i32, %c0_i32_0, %c0_i32_1 : i32, i32, i32, i32
  }
}

</mosaic_0001>

<bundles_post_ra>
// kernel: stable_st_forward.1
= control target key start
LH: loop header
LB: loop body
LE: loop exit
PB: predicated region body
PF: predicated region fallthrough
CT: control target
= control target key end

     0   :  { %12 = vsyncpa [#allocation3], 0  ;;  %s12082_s0 = inlined_call_operand.vmem [shape: f32[2,16,8,2], index: 0, kind: input, shape index: {}]   ;;  %s12083_s1 = inlined_call_operand.vmem [shape: f32[1,8,8], index: 1, kind: input, shape index: {}]   ;;  %s12084_s2 = inlined_call_operand.vmem [shape: f32[3,8,8], index: 2, kind: input, shape index: {}]   ;;  %s12085_s3 = inlined_call_operand.vmem [shape: f32[312,128], index: 3, kind: input, shape index: {}]   ;;  %s12086_s4 = inlined_call_operand.vmem [shape: f32[312,128], index: 4, kind: input, shape index: {}]   ;;  %s12087_s5 = inlined_call_operand.hbm [shape: f32[2,8,8,32], index: 5, kind: output, shape index: {0}]   ;;  %s12088_s6 = inlined_call_operand.hbm [shape: f32[2,8,8,32], index: 6, kind: output, shape index: {1}]  }
   0x1   :  { %14 = vsyncpa [#allocation3 + $0x1], 0 }
   0x2   :  { %15 = vsyncpa [#allocation5], 0 }
   0x3   :  { %17 = vsyncpa [#allocation5 + $0x1], 0  ;;  %s10343_s21 = smov 0   ;;  %s10345_s22 = smov 0  }
   0x4   :  { %s10347_s23 = smov 0   ;;  %s10349_s24 = smov 0  }
   0x5 LB: > { %s10364_s25 = sadd.s32 4294967295, %s10297_s24   ;;  %s8517_s26 = sadd.s32 4294967294, %s10297_s24   ;;  %s10297_s24 = sphi %s10349_s24, %s12096_s24   ;;  %s10293_s23 = sphi %s10347_s23, %s12095_s23   ;;  %s10289_s22 = sphi %s10345_s22, %s12094_s22   ;;  %s10285_s21 = sphi %s10343_s21, %s12093_s21  }
   0x6   : > { %s10368_s27 = sadd.s32 1, %s10297_s24   ;;  %s140_s28 = sadd.s32 1, %s10293_s23 }
   0x7   : > { %s137_s29 = ssub.s32 %s10297_s24, %s10368_s27  ;;  %p150_p0 = scmp.ne.s32.totalorder %s10293_s23, %s10289_s22 }
   0x8   : > { %p138_p1 = scmp.eq.s32.totalorder %s137_s29, 0  ;;  %p151_p2 = scmp.eq.s32.totalorder %s10364_s25, 1 }
   0x9   : > { %p156_p3 = scmp.ne.s32.totalorder %s10289_s22, %s10285_s21  ;;  %p157_p4 = scmp.eq.s32.totalorder %s8517_s26, 1 }
   0xa   : > { %s10379_s30 = scalar_select %p138_p1, %s10293_s23, %s140_s28  }
   0xb   : > { %p10381_p5 = por %p151_p2, %p150_p0  ;;  %p10385_p6 = por %p157_p4, %p156_p3 }
   0xc   : > { %p8520_p7 = scmp.ge.s32.totalorder %s10297_s24, 1  ;;  %p221_p8 = scmp.lt.s32.totalorder %s10297_s24, 3 }
   0xe   : > { %p222_p9 = pnand %p8520_p7, %p221_p8 }
   0xf   : > { %p256_p10 = scmp.lt.s32.totalorder (!%p222_p9), %s10364_s25, 1  ;;  %vm451_vm0 = vcmask (!%p222_p9), 1045504   ;;  %v277_v0 = vld [vmem:[%s12085_s3] sm:$0x3f] (!%p222_p9)  ;;  %s10299_s16 = smov (!%p222_p9), 4   ;;  %v622_v14 = vld [vmem:[%s12085_s3 + $0x10] sm:$0xff] (!%p222_p9) }
  0x10   : > { %225 = sbr.rel (%p222_p9) target bundleno = 5933 (0x172d), region = 40  ;;  %9282 = vmatprep.subr.msk.mxu0 (!%p222_p9), %vm451_vm0, %v277_v0  ;;  %10050 = vmatprep.subr.msk.mxu1 (!%p222_p9), %vm451_vm0, %v277_v0  ;;  %s10300_s17 = smov (!%p222_p9), 2   ;;  %v623_v15 = vld [vmem:[%s12085_s3 + $0x18] sm:$0xff] (!%p222_p9)  ;;  %vm378_vm1 = vcmask (!%p222_p9), 15360   ;;  %vm393_vm2 = vcmask (!%p222_p9), 31744   ;;  %vm408_vm3 = vcmask (!%p222_p9), 48128  }
  0x11   : > { %9283 = vmatpush3.msk.msra.mxu0 (!%p222_p9), %vm451_vm0, %v277_v0  ;;  %10051 = vmatpush3.msk.msra.mxu1 (!%p222_p9), %vm451_vm0, %v277_v0  ;;  %v10487_v16 = vpack.c.bf16 (!%p222_p9), %v623_v15, %v622_v14  ;;  %v8540_v15 = vld [vmem:[%s12085_s3 + $0x8] ss:$0 sm:$0xff] (!%p222_p9)  ;;  %vm627_vm4 = vcmask (!%p222_p9), 261120   ;;  %vm1254_vm5 = vcmask (!%p222_p9), 64512   ;;  %s10302_s18 = smov (!%p222_p9), 32   ;;  %vm2116_vm6 = vcmask (!%p222_p9), 130048  }
  0x12   : > { %vm2141_vm7 = vcmask (!%p222_p9), 392192   ;;  %vm2425_vm8 = vcmask (!%p222_p9), 523264   ;;  %vm2436_vm9 = vcmask (!%p222_p9), 785408   ;;  %s11162_s14 = sand.u32 (!%p222_p9), 1, %s10289_s22   ;;  %s10304_s10 = smov (!%p222_p9), [#allocation2]  }
  0x13   : > { %9923 = vmatprep.subr.bf16.mxu1 (!%p222_p9), %v10487_v16  ;;  %s12089_s20 = sshll.u32 (!%p222_p9), %s11162_s14, 6  ;;  %s8389_s29 = scalar_lea.sflag (!%p222_p9), [#allocation3], %s11162_s14 }
  0x14   : > { %s11170_s26 = scalar_lea.vmem (!%p222_p9), [#allocation2], %s12089_s20 }
  0x17   : > { %s257_s11 = scalar_select %p256_p10, %s10364_s25, 1 }
  0x19   : > { %s8877_s12 = sshll.u32 %s257_s11, 7  ;;  %s10207_s11 = sshll.u32 %s10304_s10, 4  ;;  %s10208_s11 = int_to_ptr.vmem [resolvable:$false] %s10207_s11 }
  0x1a   : > { %s10403_s15 = scalar_lea.vmem %s12082_s0, %s8877_s12 }
  0x1b   : > { %v10406_v1 = vld [vmem:[%s10403_s15 + $0x10] sm:$0xff]  ;;  %v262_v2 = vld [vmem:[%s10403_s15 + $0x8] sm:$0xff]  ;;  %v264_v3 = vld [vmem:[%s10403_s15 + $0x18] sm:$0xff] }
  0x1c   : > { %336 = vrot.lane.b32.xlu1 %v10406_v1, %s10299_s16  ;;  %293 = vrot.lane.b32.xlu0 %v262_v2, %s10300_s17  ;;  %v10417_v4 = vld [vmem:[%s10403_s15 + $0x20] sm:$0xff]  ;;  %v10423_v5 = vld [vmem:[%s10403_s15 + $0x28] sm:$0xff] }
  0x1d   : > { %v10430_v6 = vld [vmem:[%s10403_s15 + $0x30] sm:$0xff]  ;;  %v10437_v7 = vld [vmem:[%s10403_s15 + $0x38] sm:$0xff]  ;;  %v10444_v8 = vld [vmem:[%s10403_s15 + $0x40] sm:$0xff] }
  0x1e   : > { %v10451_v9 = vld [vmem:[%s10403_s15 + $0x48] sm:$0xff]  ;;  %v10458_v10 = vld [vmem:[%s10403_s15 + $0x50] sm:$0xff]  ;;  %v10465_v11 = vld [vmem:[%s10403_s15 + $0x58] sm:$0xff] }
  0x1f   : > { %v10472_v12 = vld [vmem:[%s10403_s15 + $0x60] sm:$0xff]  ;;  %v10479_v13 = vld [vmem:[%s10403_s15 + $0x68] sm:$0xff]  ;;  %v275_v17 = vld [vmem:[%s10403_s15 + $0x70] sm:$0xff] }
  0x20   : > { %338 = vrot.lane.b32.xlu1 %v264_v3, %s10299_s16  ;;  %295 = vrot.lane.b32.xlu0 %v10406_v1, %s10300_s17  ;;  %v276_v18 = vld [vmem:[%s10403_s15 + $0x78] sm:$0xff]  ;;  %v261_v19 = vld [vmem:[%s10403_s15] sm:$0xff] }
  0x24   : > { %299 = vrot.lane.b32.xlu1 %v10417_v4, %s10300_s17  ;;  %297 = vrot.lane.b32.xlu0 %v264_v3, %s10300_s17 }
  0x28   : > { %342 = vrot.lane.b32.xlu1 %v10423_v5, %s10299_s16  ;;  %340 = vrot.lane.b32.xlu0 %v10417_v4, %s10299_s16 }
  0x2c   : > { %301 = vrot.lane.b32.xlu0 %v10423_v5, %s10300_s17  ;;  %303 = vrot.lane.b32.xlu1 %v10430_v6, %s10300_s17 }
  0x30   : > { %344 = vrot.lane.b32.xlu0 %v10430_v6, %s10299_s16  ;;  %346 = vrot.lane.b32.xlu1 %v10437_v7, %s10299_s16 }
  0x34   : > { %305 = vrot.lane.b32.xlu0 %v10437_v7, %s10300_s17  ;;  %307 = vrot.lane.b32.xlu1 %v10444_v8, %s10300_s17 }
  0x38   : > { %348 = vrot.lane.b32.xlu0 %v10444_v8, %s10299_s16  ;;  %350 = vrot.lane.b32.xlu1 %v10451_v9, %s10299_s16 }
  0x3c   : > { %309 = vrot.lane.b32.xlu0 %v10451_v9, %s10300_s17  ;;  %311 = vrot.lane.b32.xlu1 %v10458_v10, %s10300_s17 }
  0x40   : > { %352 = vrot.lane.b32.xlu0 %v10458_v10, %s10299_s16  ;;  %354 = vrot.lane.b32.xlu1 %v10465_v11, %s10299_s16 }
  0x44   : > { %313 = vrot.lane.b32.xlu0 %v10465_v11, %s10300_s17  ;;  %315 = vrot.lane.b32.xlu1 %v10472_v12, %s10300_s17 }
  0x48   : > { %356 = vrot.lane.b32.xlu0 %v10472_v12, %s10299_s16  ;;  %358 = vrot.lane.b32.xlu1 %v10479_v13, %s10299_s16 }
  0x4c   : > { %317 = vrot.lane.b32.xlu0 %v10479_v13, %s10300_s17  ;;  %319 = vrot.lane.b32.xlu1 %v275_v17, %s10300_s17  ;;  %s10301_s17 = smov 16  }
  0x50   : > { %360 = vrot.lane.b32.xlu0 %v275_v17, %s10299_s16  ;;  %362 = vrot.lane.b32.xlu1 %v276_v18, %s10299_s16  ;;  %s10303_s16 = smov 64  }
  0x8e   : > { %v337_v20 = vpop.permute.xlu1 %336  ;;  %v294_v21 = vpop.permute.xlu0 %293 }
  0x8f   : > { %v379_v22 = vsel %vm378_vm1, %v261_v19, %v294_v21 }
  0x90   : > { %v10504_v23 = vsel %vm393_vm2, %v379_v22, %v337_v20 }
  0x91   : > { %9284 = vmatprep.mubr.msk.f32.mxu0 %vm408_vm3, %v10504_v23 }
  0x92   : > { %v339_v24 = vpop.permute.xlu1 %338  ;;  %v296_v25 = vpop.permute.xlu0 %295 }
  0x93   : > { %v380_v26 = vsel %vm378_vm1, %v262_v2, %v296_v25 }
  0x94   : > { %v10510_v27 = vsel %vm393_vm2, %v380_v26, %v339_v24 }
  0x95   : > { %9285 = vmatmul.mubr.msk.f32.vlgmr.msra.gmra.mrb[0].mxu0 %vm408_vm3, %v10510_v27 }
  0x96   : > { %v300_v28 = vpop.permute.xlu1 %299  ;;  %v298_v29 = vpop.permute.xlu0 %297 }
  0x97   : > { %v382_v30 = vsel %vm378_vm1, %v264_v3, %v300_v28  ;;  %v381_v31 = vsel %vm378_vm1, %v10406_v1, %v298_v29 }
  0x9a   : > { %v343_v32 = vpop.permute.xlu1 %342  ;;  %v341_v33 = vpop.permute.xlu0 %340 }
  0x9b   : > { %v10518_v34 = vsel %vm393_vm2, %v382_v30, %v343_v32  ;;  %v10521_v35 = vsel %vm393_vm2, %v381_v31, %v341_v33 }
  0x9c   : > { %9287 = vmatprep.mubr.msk.f32.mxu0 %vm408_vm3, %v10521_v35 }
  0x9d   : > { %9288 = vmatmul.mubr.msk.f32.gmra.mrb[2].mxu0 %vm408_vm3, %v10518_v34 }
  0x9e   : > { %v302_v36 = vpop.permute.xlu0 %301  ;;  %v304_v37 = vpop.permute.xlu1 %303 }
  0x9f   : > { %v383_v38 = vsel %vm378_vm1, %v10417_v4, %v302_v36  ;;  %v384_v39 = vsel %vm378_vm1, %v10423_v5, %v304_v37 }
  0xa2   : > { %v345_v40 = vpop.permute.xlu0 %344  ;;  %v347_v41 = vpop.permute.xlu1 %346 }
  0xa3   : > { %v10532_v42 = vsel %vm393_vm2, %v383_v38, %v345_v40  ;;  %v10535_v43 = vsel %vm393_vm2, %v384_v39, %v347_v41 }
  0xa4   : > { %9290 = vmatprep.mubr.msk.f32.mxu0 %vm408_vm3, %v10532_v42 }
  0xa5   : > { %9291 = vmatmul.mubr.msk.f32.gmra.mrb[4].mxu0 %vm408_vm3, %v10535_v43 }
  0xa6   : > { %v306_v44 = vpop.permute.xlu0 %305  ;;  %v308_v45 = vpop.permute.xlu1 %307 }
  0xa7   : > { %v385_v46 = vsel %vm378_vm1, %v10430_v6, %v306_v44  ;;  %v386_v47 = vsel %vm378_vm1, %v10437_v7, %v308_v45 }
  0xaa   : > { %v349_v48 = vpop.permute.xlu0 %348  ;;  %v351_v49 = vpop.permute.xlu1 %350 }
  0xab   : > { %v10546_v50 = vsel %vm393_vm2, %v385_v46, %v349_v48  ;;  %v10549_v51 = vsel %vm393_vm2, %v386_v47, %v351_v49 }
  0xac   : > { %9293 = vmatprep.mubr.msk.f32.mxu0 %vm408_vm3, %v10546_v50 }
  0xad   : > { %9294 = vmatmul.mubr.msk.f32.gmra.mrb[6].mxu0 %vm408_vm3, %v10549_v51 }
  0xae   : > { %v310_v52 = vpop.permute.xlu0 %309  ;;  %v312_v53 = vpop.permute.xlu1 %311 }
  0xaf   : > { %v387_v54 = vsel %vm378_vm1, %v10444_v8, %v310_v52  ;;  %v388_v55 = vsel %vm378_vm1, %v10451_v9, %v312_v53 }
  0xb2   : > { %v353_v56 = vpop.permute.xlu0 %352  ;;  %v355_v57 = vpop.permute.xlu1 %354 }
  0xb3   : > { %v10560_v58 = vsel %vm393_vm2, %v387_v54, %v353_v56  ;;  %v10563_v59 = vsel %vm393_vm2, %v388_v55, %v355_v57 }
  0xb4   : > { %9296 = vmatprep.mubr.msk.f32.mxu0 %vm408_vm3, %v10560_v58 }
  0xb5   : > { %9297 = vmatmul.mubr.msk.f32.gmra.mrb[8].mxu0 %vm408_vm3, %v10563_v59 }
  0xb6   : > { %v314_v60 = vpop.permute.xlu0 %313  ;;  %v316_v61 = vpop.permute.xlu1 %315 }
  0xb7   : > { %v389_v62 = vsel %vm378_vm1, %v10458_v10, %v314_v60  ;;  %v390_v63 = vsel %vm378_vm1, %v10465_v11, %v316_v61 }
  0xba   : > { %v357_v0 = vpop.permute.xlu0 %356  ;;  %v359_v1 = vpop.permute.xlu1 %358 }
  0xbb   : > { %v10574_v2 = vsel %vm393_vm2, %v390_v63, %v359_v1  ;;  %v10577_v3 = vsel %vm393_vm2, %v389_v62, %v357_v0 }
  0xbc   : > { %9299 = vmatprep.mubr.msk.f32.mxu1 %vm408_vm3, %v10577_v3 }
  0xbd   : > { %9300 = vmatmul.mubr.msk.f32.vlgmr.msra.gmra.mrb[0].mxu1 %vm408_vm3, %v10574_v2 }
  0xbe   : > { %v318_v4 = vpop.permute.xlu0 %317  ;;  %v320_v5 = vpop.permute.xlu1 %319  ;;  %9925 = vmatpush3.bf16.msra.mxu1 %v10487_v16 }
  0xbf   : > { %v391_v6 = vsel %vm378_vm1, %v10472_v12, %v318_v4  ;;  %v392_v7 = vsel %vm378_vm1, %v10479_v13, %v320_v5  ;;  %v624_v12 = vld [vmem:[%s12085_s3 + $0x20] sm:$0xff]  ;;  %v625_v13 = vld [vmem:[%s12085_s3 + $0x28] sm:$0xff] }
  0xc0   : > { %v9926_v14 = vpack.c.bf16 %v625_v13, %v624_v12 }
  0xc2   : > { %v361_v8 = vpop.permute.xlu0 %360  ;;  %v363_v9 = vpop.permute.xlu1 %362  ;;  %9927 = vmatprep.subr.bf16.mxu1 %v9926_v14 }
  0xc3   : > { %v10589_v10 = vsel %vm393_vm2, %v391_v6, %v361_v8  ;;  %v10592_v11 = vsel %vm393_vm2, %v392_v7, %v363_v9  ;;  %9929 = vmatpush3.bf16.msra.mxu1 %v9926_v14  ;;  %v1253_v6 = vld [vmem:[%s12083_s1] sm:$0xff] }
  0xc4   : > { %9302 = vmatprep.mubr.msk.f32.mxu1 %vm408_vm3, %v10589_v10  ;;  %9334 = vmatprep.subr.mxu0 %v1253_v6 }
  0xc5   : > { %9303 = vmatmul.mubr.msk.f32.gmra.mrb[2].mxu1 %vm408_vm3, %v10592_v11  ;;  %9335 = vmatpush3.msra.mxu0 %v1253_v6 }
  0xc6   : > { %9470 = vmatprep.subr.mxu0 %v1253_v6 }
 0x168   : > { %v9286_v16 = vpop.f32.mrb[0].mxu0 }
 0x169   : > { %v595_v17 = vadd.f32 %v9286_v16, %v8540_v15  ;;  %v521_v18 = vpop.f32.mrb[1].mxu0 }
 0x16a   : > { %v594_v19 = vadd.f32 %v8540_v15, %v521_v18 }
 0x16b   : > { %v609_v21 = vmax.f32 %v595_v17, 0.0 }
 0x16c   : > { %v608_v20 = vmax.f32 %v594_v19, 0.0 }
 0x16e   : > { %9313 = vmatprep.mubr.msk.f32.mxu1 %vm627_vm4, %v608_v20 }
 0x16f   : > { %9314 = vmatmul.mubr.msk.f32.vlgmr.msra.gmra.mrb[4].mxu1 %vm627_vm4, %v609_v21 }
 0x170   : > { %v9289_v22 = vpop.f32.mrb[2].mxu0 }
 0x171   : > { %v597_v24 = vadd.f32 %v9289_v22, %v8540_v15  ;;  %v531_v25 = vpop.f32.mrb[3].mxu0 }
 0x172   : > { %v596_v26 = vadd.f32 %v8540_v15, %v531_v25 }
 0x173   : > { %v611_v29 = vmax.f32 %v597_v24, 0.0 }
 0x174   : > { %v610_v28 = vmax.f32 %v596_v26, 0.0 }
 0x176   : > { %9316 = vmatprep.mubr.msk.f32.mxu1 %vm627_vm4, %v610_v28 }
 0x177   : > { %9317 = vmatmul.mubr.msk.f32.gmra.mrb[6].mxu1 %vm627_vm4, %v611_v29 }
 0x178   : > { %v9292_v30 = vpop.f32.mrb[4].mxu0 }
 0x179   : > { %v599_v31 = vadd.f32 %v9292_v30, %v8540_v15  ;;  %v541_v32 = vpop.f32.mrb[5].mxu0 }
 0x17a   : > { %v598_v33 = vadd.f32 %v8540_v15, %v541_v32 }
 0x17b   : > { %v613_v36 = vmax.f32 %v599_v31, 0.0 }
 0x17c   : > { %v612_v37 = vmax.f32 %v598_v33, 0.0 }
 0x17e   : > { %9319 = vmatprep.mubr.msk.f32.mxu1 %vm627_vm4, %v612_v37 }
 0x17f   : > { %9320 = vmatmul.mubr.msk.f32.gmra.mrb[8].mxu1 %vm627_vm4, %v613_v36 }
 0x180   : > { %v9295_v38 = vpop.f32.mrb[6].mxu0 }
 0x181   : > { %v601_v39 = vadd.f32 %v9295_v38, %v8540_v15  ;;  %v551_v40 = vpop.f32.mrb[7].mxu0 }
 0x182   : > { %v600_v41 = vadd.f32 %v8540_v15, %v551_v40 }
 0x183   : > { %v615_v44 = vmax.f32 %v601_v39, 0.0 }
 0x184   : > { %v614_v45 = vmax.f32 %v600_v41, 0.0 }
 0x186   : > { %9322 = vmatprep.mubr.msk.f32.mxu1 %vm627_vm4, %v614_v45 }
 0x187   : > { %9323 = vmatmul.mubr.msk.f32.gmra.mrb[10].mxu1 %vm627_vm4, %v615_v44 }
 0x188   : > { %v9298_v46 = vpop.f32.mrb[8].mxu0 }
 0x189   : > { %v603_v47 = vadd.f32 %v9298_v46, %v8540_v15  ;;  %v561_v48 = vpop.f32.mrb[9].mxu0 }
 0x18a   : > { %v602_v49 = vadd.f32 %v8540_v15, %v561_v48 }
 0x18b   : > { %v617_v52 = vmax.f32 %v603_v47, 0.0 }
 0x18c   : > { %v616_v53 = vmax.f32 %v602_v49, 0.0 }
 0x18e   : > { %9325 = vmatprep.mubr.msk.f32.mxu1 %vm627_vm4, %v616_v53 }
 0x18f   : > { %9326 = vmatmul.mubr.msk.f32.gmra.mrb[12].mxu1 %vm627_vm4, %v617_v52 }
 0x190   : > { %v9301_v54 = vpop.f32.mrb[0].mxu1 }
 0x191   : > { %v605_v55 = vadd.f32 %v9301_v54, %v8540_v15  ;;  %v571_v56 = vpop.f32.mrb[1].mxu1 }
 0x192   : > { %v604_v57 = vadd.f32 %v8540_v15, %v571_v56 }
 0x193   : > { %v619_v60 = vmax.f32 %v605_v55, 0.0 }
 0x194   : > { %v618_v61 = vmax.f32 %v604_v57, 0.0 }
 0x196   : > { %9328 = vmatprep.mubr.msk.f32.mxu1 %vm627_vm4, %v618_v61 }
 0x197   : > { %9329 = vmatmul.mubr.msk.f32.gmra.mrb[14].mxu1 %vm627_vm4, %v619_v60 }
 0x198   : > { %v9304_v62 = vpop.f32.mrb[2].mxu1 }
 0x199   : > { %v607_v63 = vadd.f32 %v9304_v62, %v8540_v15  ;;  %v581_v0 = vpop.f32.mrb[3].mxu1 }
 0x19a   : > { %v606_v1 = vadd.f32 %v8540_v15, %v581_v0 }
 0x19b   : > { %v621_v4 = vmax.f32 %v607_v63, 0.0 }
 0x19c   : > { %v620_v5 = vmax.f32 %v606_v1, 0.0 }
 0x19e   : > { %9331 = vmatprep.mubr.msk.f32.mxu1 %vm627_vm4, %v620_v5 }
 0x19f   : > { %9332 = vmatmul.mubr.msk.f32.gmra.mrb[16].mxu1 %vm627_vm4, %v621_v4 }
 0x242   : > { %v9315_v7 = vpop.f32.mrb[4].mxu1 }
 0x243   : > { %837 = vxpose.xlu1.b32.start.end [1/1] (short) (narrow) %v9315_v7, 16  ;;  %v736_v8 = vpop.f32.mrb[5].mxu1 }
 0x244   : > { %805 = vxpose.xlu0.b32.start.end [1/1] (short) (narrow) %v736_v8, 16 }
 0x24a   : > { %v9318_v9 = vpop.f32.mrb[6].mxu1 }
 0x24b   : > { %v746_v12 = vpop.f32.mrb[7].mxu1 }
 0x24c   : > { %869 = vxpose.xlu0.b32.start.end [1/1] (short) (narrow) %v746_v12, 16 }
 0x251   : > { %901 = vxpose.xlu0.b32.start.end [1/1] (short) (narrow) %v9318_v9, 16 }
 0x252   : > { %v9321_v13 = vpop.f32.mrb[8].mxu1 }
 0x253   : > { %v756_v14 = vpop.f32.mrb[9].mxu1  ;;  %965 = vxpose.xlu1.b32.start.end [1/1] (short) (narrow) %v9321_v13, 16 }
 0x256   : > { %933 = vxpose.xlu0.b32.start.end [1/1] (short) (narrow) %v756_v14, 16 }
 0x25a   : > { %v9324_v15 = vpop.f32.mrb[10].mxu1 }
 0x25b   : > { %v766_v16 = vpop.f32.mrb[11].mxu1  ;;  %1029 = vxpose.xlu1.b32.start.end [1/1] (short) (narrow) %v9324_v15, 16 }
 0x25c   : > { %997 = vxpose.xlu0.b32.start.end [1/1] (short) (narrow) %v766_v16, 16 }
 0x262   : > { %v9327_v17 = vpop.f32.mrb[12].mxu1 }
 0x263   : > { %v776_v18 = vpop.f32.mrb[13].mxu1  ;;  %1093 = vxpose.xlu1.b32.start.end [1/1] (short) (narrow) %v9327_v17, 16 }
 0x264   : > { %1061 = vxpose.xlu0.b32.start.end [1/1] (short) (narrow) %v776_v18, 16 }
 0x26a   : > { %v9330_v19 = vpop.f32.mrb[14].mxu1 }
 0x26b   : > { %v786_v20 = vpop.f32.mrb[15].mxu1  ;;  %1157 = vxpose.xlu1.b32.start.end [1/1] (short) (narrow) %v9330_v19, 16 }
 0x26c   : > { %1125 = vxpose.xlu0.b32.start.end [1/1] (short) (narrow) %v786_v20, 16 }
 0x272   : > { %v9333_v21 = vpop.f32.mrb[16].mxu1 }
 0x273   : > { %v796_v22 = vpop.f32.mrb[17].mxu1  ;;  %1221 = vxpose.xlu1.b32.start.end [1/1] (short) (narrow) %v9333_v21, 16 }
 0x274   : > { %1189 = vxpose.xlu0.b32.start.end [1/1] (short) (narrow) %v796_v22, 16 }
 0x2c3   : > { %v853_v25 = vpop.trf.xlu1 }
 0x2c4   : > { %v821_v24 = vpop.trf.xlu0 }
 0x2c5   : > { %9336 = vmatprep.mubr.msk.f32.mxu0 %vm1254_vm5, %v821_v24 }
 0x2c7   : > { %v854_v28 = vpop.trf.xlu1 }
 0x2c8   : > { %v822_v26 = vpop.trf.xlu0 }
 0x2c9   : > { %9337 = vmatmul.mubr.msk.f32.vlgmr.msra.gmra.mrb[10].mxu0 %vm1254_vm5, %v822_v26 }
 0x2ca   : > { %9339 = vmatprep.mubr.msk.f32.mxu0 %vm1254_vm5, %v853_v25  ;;  %9471 = vmatpush3.msra.mxu0 %v1253_v6 }
 0x2cc   : > { %v885_v29 = vpop.trf.xlu0 }
 0x2cd   : > { %9340 = vmatmul.mubr.msk.f32.gmra.mrb[12].mxu0 %vm1254_vm5, %v854_v28 }
 0x2ce   : > { %9342 = vmatprep.mubr.msk.f32.mxu0 %vm1254_vm5, %v885_v29 }
 0x2d0   : > { %v886_v30 = vpop.trf.xlu0 }
 0x2d1   : > { %9343 = vmatmul.mubr.msk.f32.gmra.mrb[14].mxu0 %vm1254_vm5, %v886_v30 }
 0x2d3   : > { %v981_v31 = vpop.trf.xlu1 }
 0x2d4   : > { %v917_v32 = vpop.trf.xlu0 }
 0x2d5   : > { %9345 = vmatprep.mubr.msk.f32.mxu0 %vm1254_vm5, %v917_v32 }
 0x2d7   : > { %v982_v36 = vpop.trf.xlu1 }
 0x2d8   : > { %v918_v33 = vpop.trf.xlu0 }
 0x2d9   : > { %9346 = vmatmul.mubr.msk.f32.gmra.mrb[16].mxu0 %vm1254_vm5, %v918_v33 }
 0x2db   : > { %v1045_v38 = vpop.trf.xlu1 }
 0x2dc   : > { %v949_v37 = vpop.trf.xlu0 }
 0x2dd   : > { %9348 = vmatprep.mubr.msk.f32.mxu0 %vm1254_vm5, %v949_v37 }
 0x2df   : > { %v1046_v41 = vpop.trf.xlu1 }
 0x2e0   : > { %v950_v39 = vpop.trf.xlu0 }
 0x2e1   : > { %9349 = vmatmul.mubr.msk.f32.gmra.mrb[18].mxu0 %vm1254_vm5, %v950_v39 }
 0x2e2   : > { %9351 = vmatprep.mubr.msk.f32.mxu0 %vm1254_vm5, %v981_v31  ;;  %v10659_v31 = vld [vmem:[%s12085_s3 + $0x30] ss:$0 sm:$0xff] }
 0x2e3   : > { %v1109_v45 = vpop.trf.xlu1 }
 0x2e4   : > { %v1013_v40 = vpop.trf.xlu0 }
 0x2e5   : > { %9352 = vmatmul.mubr.msk.f32.gmra.mrb[20].mxu0 %vm1254_vm5, %v982_v36 }
 0x2e6   : > { %9354 = vmatprep.mubr.msk.f32.mxu0 %vm1254_vm5, %v1013_v40 }
 0x2e7   : > { %v1110_v47 = vpop.trf.xlu1 }
 0x2e8   : > { %v1014_v44 = vpop.trf.xlu0 }
 0x2e9   : > { %9355 = vmatmul.mubr.msk.f32.gmra.mrb[22].mxu0 %vm1254_vm5, %v1014_v44 }
 0x2ea   : > { %9357 = vmatprep.mubr.msk.f32.mxu0 %vm1254_vm5, %v1045_v38 }
 0x2eb   : > { %v1173_v49 = vpop.trf.xlu1 }
 0x2ec   : > { %v1077_v46 = vpop.trf.xlu0 }
 0x2ed   : > { %9358 = vmatmul.mubr.msk.f32.gmra.mrb[24].mxu0 %vm1254_vm5, %v1046_v41 }
 0x2ee   : > { %9360 = vmatprep.mubr.msk.f32.mxu0 %vm1254_vm5, %v1077_v46 }
 0x2ef   : > { %v1174_v54 = vpop.trf.xlu1 }
 0x2f0   : > { %v1078_v48 = vpop.trf.xlu0 }
 0x2f1   : > { %9361 = vmatmul.mubr.msk.f32.gmra.mrb[26].mxu0 %vm1254_vm5, %v1078_v48 }
 0x2f2   : > { %9363 = vmatprep.mubr.msk.f32.mxu0 %vm1254_vm5, %v1109_v45 }
 0x2f3   : > { %v1237_v56 = vpop.trf.xlu1 }
 0x2f4   : > { %v1141_v52 = vpop.trf.xlu0 }
 0x2f5   : > { %9364 = vmatmul.mubr.msk.f32.gmra.mrb[28].mxu0 %vm1254_vm5, %v1110_v47 }
 0x2f6   : > { %9366 = vmatprep.mubr.msk.f32.mxu0 %vm1254_vm5, %v1141_v52 }
 0x2f7   : > { %v1238_v60 = vpop.trf.xlu1 }
 0x2f8   : > { %v1142_v53 = vpop.trf.xlu0 }
 0x2f9   : > { %9367 = vmatmul.mubr.msk.f32.gmra.mrb[30].mxu0 %vm1254_vm5, %v1142_v53 }
 0x2fa   : > { %9369 = vmatprep.mubr.msk.f32.mxu0 %vm1254_vm5, %v1173_v49 }
 0x2fc   : > { %v1205_v55 = vpop.trf.xlu0 }
 0x2fd   : > { %9370 = vmatmul.mubr.msk.f32.gmra.mrb[32].mxu0 %vm1254_vm5, %v1174_v54 }
 0x2fe   : > { %9372 = vmatprep.mubr.msk.f32.mxu0 %vm1254_vm5, %v1205_v55 }
 0x300   : > { %v1206_v57 = vpop.trf.xlu0 }
 0x301   : > { %9373 = vmatmul.mubr.msk.f32.gmra.mrb[34].mxu0 %vm1254_vm5, %v1206_v57 }
 0x302   : > { %9375 = vmatprep.mubr.msk.f32.mxu0 %vm1254_vm5, %v1237_v56 }
 0x305   : > { %9376 = vmatmul.mubr.msk.f32.gmra.mrb[36].mxu0 %vm1254_vm5, %v1238_v60 }
 0x39c   : > { %v10652_v61 = vpop.f32.mrb[10].mxu0 }
 0x39d   : > { %v10654_v62 = vpop.f32.mrb[11].mxu0 }
 0x3a0   : > { %v9341_v63 = vpop.f32.mrb[12].mxu0 }
 0x3a1   : > { %v1415_v0 = vpop.f32.mrb[13].mxu0 }
 0x3a2   : > { %1576 = vxpose.xlu0.b32.start [1/2] (short) (narrow) %v1415_v0, 8 }
 0x3a4   : > { %v9344_v1 = vpop.f32.mrb[14].mxu0 }
 0x3a5   : > { %v1425_v4 = vpop.f32.mrb[15].mxu0 }
 0x3a6   : > { %1608 = vxpose.xlu1.b32.start [1/2] (short) (narrow) %v1425_v4, 8  ;;  %1577 = vxpose.xlu0.b32.end [2/2] (short) (narrow) %v9341_v63, 8 }
 0x3aa   : > { %1609 = vxpose.xlu1.b32.end [2/2] (short) (narrow) %v9344_v1, 8 }
 0x3ac   : > { %v9347_v5 = vpop.f32.mrb[16].mxu0 }
 0x3ad   : > { %v1435_v6 = vpop.f32.mrb[17].mxu0 }
 0x3ae   : > { %1640 = vxpose.xlu0.b32.start [1/2] (short) (narrow) %v1435_v6, 8 }
 0x3b2   : > { %1641 = vxpose.xlu0.b32.end [2/2] (short) (narrow) %v9347_v5, 8 }
 0x3b4   : > { %v9350_v7 = vpop.f32.mrb[18].mxu0 }
 0x3b5   : > { %v1445_v8 = vpop.f32.mrb[19].mxu0 }
 0x3b6   : > { %1672 = vxpose.xlu1.b32.start [1/2] (short) (narrow) %v1445_v8, 8 }
 0x3b8   : > { %v9353_v9 = vpop.f32.mrb[20].mxu0 }
 0x3b9   : > { %v1455_v12 = vpop.f32.mrb[21].mxu0 }
 0x3ba   : > { %1673 = vxpose.xlu1.b32.end [2/2] (short) (narrow) %v9350_v7, 8  ;;  %1704 = vxpose.xlu0.b32.start [1/2] (short) (narrow) %v1455_v12, 8  ;;  %v2025_v12 = vld [vmem:[%s12085_s3 + $0x40] sm:$0xff] }
 0x3bc   : > { %v9356_v13 = vpop.f32.mrb[22].mxu0 }
 0x3bd   : > { %v1465_v14 = vpop.f32.mrb[23].mxu0 }
 0x3be   : > { %1736 = vxpose.xlu1.b32.start [1/2] (short) (narrow) %v1465_v14, 8  ;;  %1705 = vxpose.xlu0.b32.end [2/2] (short) (narrow) %v9353_v9, 8  ;;  %v2024_v9 = vld [vmem:[%s12085_s3 + $0x38] sm:$0xff] }
 0x3bf   : > { %v9930_v14 = vpack.c.bf16 %v2025_v12, %v2024_v9 }
 0x3c0   : > { %v9359_v15 = vpop.f32.mrb[24].mxu0 }
 0x3c1   : > { %v1475_v16 = vpop.f32.mrb[25].mxu0  ;;  %9931 = vmatprep.subr.bf16.mxu1 %v9930_v14 }
 0x3c2   : > { %1737 = vxpose.xlu1.b32.end [2/2] (short) (narrow) %v9356_v13, 8  ;;  %1768 = vxpose.xlu0.b32.start [1/2] (short) (narrow) %v1475_v16, 8 }
 0x3c3   : > { %9933 = vmatpush3.bf16.msra.mxu1 %v9930_v14 }
 0x3c4   : > { %v9362_v17 = vpop.f32.mrb[26].mxu0 }
 0x3c5   : > { %v1485_v18 = vpop.f32.mrb[27].mxu0 }
 0x3c6   : > { %1769 = vxpose.xlu0.b32.end [2/2] (short) (narrow) %v9359_v15, 8  ;;  %1800 = vxpose.xlu1.b32.start [1/2] (short) (narrow) %v1485_v18, 8  ;;  %v2027_v18 = vld [vmem:[%s12085_s3 + $0x50] sm:$0xff] }
 0x3c8   : > { %v9365_v19 = vpop.f32.mrb[28].mxu0 }
 0x3c9   : > { %v1495_v20 = vpop.f32.mrb[29].mxu0 }
 0x3ca   : > { %1801 = vxpose.xlu1.b32.end [2/2] (short) (narrow) %v9362_v17, 8  ;;  %1832 = vxpose.xlu0.b32.start [1/2] (short) (narrow) %v1495_v20, 8  ;;  %v2026_v17 = vld [vmem:[%s12085_s3 + $0x48] sm:$0xff] }
 0x3cb   : > { %v9934_v20 = vpack.c.bf16 %v2027_v18, %v2026_v17 }
 0x3cc   : > { %v9368_v21 = vpop.f32.mrb[30].mxu0 }
 0x3cd   : > { %v1505_v22 = vpop.f32.mrb[31].mxu0  ;;  %9935 = vmatprep.subr.bf16.mxu1 %v9934_v20 }
 0x3ce   : > { %1833 = vxpose.xlu0.b32.end [2/2] (short) (narrow) %v9365_v19, 8  ;;  %1864 = vxpose.xlu1.b32.start [1/2] (short) (narrow) %v1505_v22, 8  ;;  %v2028_v22 = vld [vmem:[%s12085_s3 + $0x58] sm:$0xff] }
 0x3cf   : > { %9937 = vmatpush3.bf16.msra.mxu1 %v9934_v20 }
 0x3d0   : > { %v9371_v24 = vpop.f32.mrb[32].mxu0 }
 0x3d1   : > { %v1515_v25 = vpop.f32.mrb[33].mxu0 }
 0x3d2   : > { %1865 = vxpose.xlu1.b32.end [2/2] (short) (narrow) %v9368_v21, 8  ;;  %1896 = vxpose.xlu0.b32.start [1/2] (short) (narrow) %v1515_v25, 8 }
 0x3d4   : > { %v9374_v26 = vpop.f32.mrb[34].mxu0 }
 0x3d5   : > { %v1525_v28 = vpop.f32.mrb[35].mxu0 }
 0x3d6   : > { %1897 = vxpose.xlu0.b32.end [2/2] (short) (narrow) %v9371_v24, 8  ;;  %1928 = vxpose.xlu1.b32.start [1/2] (short) (narrow) %v1525_v28, 8  ;;  %v2029_v24 = vld [vmem:[%s12085_s3 + $0x60] sm:$0xff] }
 0x3d8   : > { %v9377_v29 = vpop.f32.mrb[36].mxu0 }
 0x3d9   : > { %v1535_v30 = vpop.f32.mrb[37].mxu0 }
 0x3da   : > { %1929 = vxpose.xlu1.b32.end [2/2] (short) (narrow) %v9374_v26, 8  ;;  %1960 = vxpose.xlu0.b32.start [1/2] (short) (narrow) %v1535_v30, 8  ;;  %v9938_v26 = vpack.c.bf16 %v2029_v24, %v2028_v22 }
 0x3dc   : > { %9939 = vmatprep.subr.bf16.mxu1 %v9938_v26 }
 0x3dd   : > { %9941 = vmatpush3.bf16.msra.mxu1 %v9938_v26 }
 0x3de   : > { %1961 = vxpose.xlu0.b32.end [2/2] (short) (narrow) %v9377_v29, 8 }
 0x422   : > { %v1592_v32 = vpop.trf.xlu0 }
 0x423   : > { %v10662_v33 = vadd.f32 %v10659_v31, %v1592_v32 }
 0x425   : > { %v2011_v36 = vmax.f32 %v10662_v33, 0.0 }
 0x426   : > { %v1624_v37 = vpop.trf.xlu1 }
 0x427   : > { %v1998_v38 = vadd.f32 %v10659_v31, %v1624_v37  ;;  %2043 = vrot.lane.b32.xlu1 %v2011_v36, %s10301_s17 }
 0x429   : > { %v10669_v39 = vmax.f32 %v1998_v38, 0.0 }
 0x42b   : > { %2045 = vrot.lane.b32.xlu0 %v10669_v39, %s10301_s17  ;;  %2080 = vrot.lane.b32.xlu1 %v10669_v39, %s10302_s18 }
 0x42e   : > { %v1656_v40 = vpop.trf.xlu0 }
 0x42f   : > { %v1999_v41 = vadd.f32 %v10659_v31, %v1656_v40 }
 0x431   : > { %v10676_v44 = vmax.f32 %v1999_v41, 0.0 }
 0x433   : > { %2082 = vrot.lane.b32.xlu1 %v10676_v44, %s10302_s18 }
 0x436   : > { %v1688_v45 = vpop.trf.xlu1 }
 0x437   : > { %v2000_v46 = vadd.f32 %v10659_v31, %v1688_v45  ;;  %2047 = vrot.lane.b32.xlu1 %v10676_v44, %s10301_s17 }
 0x439   : > { %v10683_v47 = vmax.f32 %v2000_v46, 0.0 }
 0x43a   : > { %v1720_v48 = vpop.trf.xlu0 }
 0x43b   : > { %v2001_v49 = vadd.f32 %v10659_v31, %v1720_v48  ;;  %2049 = vrot.lane.b32.xlu1 %v10683_v47, %s10301_s17 }
 0x43d   : > { %v10688_v52 = vmax.f32 %v2001_v49, 0.0 }
 0x43e   : > { %v1752_v53 = vpop.trf.xlu1 }
 0x43f   : > { %v2002_v54 = vadd.f32 %v10659_v31, %v1752_v53  ;;  %2084 = vrot.lane.b32.xlu1 %v10683_v47, %s10302_s18  ;;  %2086 = vrot.lane.b32.xlu0 %v10688_v52, %s10302_s18 }
 0x441   : > { %v10695_v55 = vmax.f32 %v2002_v54, 0.0 }
 0x442   : > { %v1784_v56 = vpop.trf.xlu0 }
 0x443   : > { %v2003_v57 = vadd.f32 %v10659_v31, %v1784_v56  ;;  %2051 = vrot.lane.b32.xlu1 %v10688_v52, %s10301_s17  ;;  %2053 = vrot.lane.b32.xlu0 %v10695_v55, %s10301_s17 }
 0x445   : > { %v10702_v60 = vmax.f32 %v2003_v57, 0.0 }
 0x446   : > { %v1816_v63 = vpop.trf.xlu1 }
 0x447   : > { %2088 = vrot.lane.b32.xlu1 %v10695_v55, %s10302_s18  ;;  %2090 = vrot.lane.b32.xlu0 %v10702_v60, %s10302_s18  ;;  %v2004_v0 = vadd.f32 %v10659_v31, %v1816_v63 }
 0x449   : > { %v10709_v1 = vmax.f32 %v2004_v0, 0.0 }
 0x44a   : > { %v1848_v4 = vpop.trf.xlu0 }
 0x44b   : > { %2055 = vrot.lane.b32.xlu0 %v10702_v60, %s10301_s17  ;;  %v2005_v5 = vadd.f32 %v10659_v31, %v1848_v4 }
 0x44d   : > { %v10716_v6 = vmax.f32 %v2005_v5, 0.0 }
 0x44e   : > { %v1880_v7 = vpop.trf.xlu1 }
 0x44f   : > { %2057 = vrot.lane.b32.xlu0 %v10709_v1, %s10301_s17  ;;  %v2006_v8 = vadd.f32 %v10659_v31, %v1880_v7 }
 0x451   : > { %v10729_v13 = vmax.f32 %v2006_v8, 0.0 }
 0x452   : > { %v1912_v15 = vpop.trf.xlu0 }
 0x453   : > { %2092 = vrot.lane.b32.xlu0 %v10709_v1, %s10302_s18  ;;  %v2007_v16 = vadd.f32 %v10659_v31, %v1912_v15 }
 0x455   : > { %v10742_v19 = vmax.f32 %v2007_v16, 0.0 }
 0x456   : > { %v1944_v21 = vpop.trf.xlu1 }
 0x457   : > { %2094 = vrot.lane.b32.xlu0 %v10716_v6, %s10302_s18  ;;  %v2008_v25 = vadd.f32 %v10659_v31, %v1944_v21 }
 0x459   : > { %v2022_v28 = vmax.f32 %v2008_v25, 0.0 }
 0x45a   : > { %v1976_v29 = vpop.trf.xlu0 }
 0x45b   : > { %2059 = vrot.lane.b32.xlu0 %v10716_v6, %s10301_s17  ;;  %v2009_v30 = vadd.f32 %v10659_v31, %v1976_v29 }
 0x45d   : > { %v2023_v32 = vmax.f32 %v2009_v30, 0.0 }
 0x45f   : > { %2061 = vrot.lane.b32.xlu0 %v10729_v13, %s10301_s17 }
 0x463   : > { %2096 = vrot.lane.b32.xlu0 %v10729_v13, %s10302_s18 }
 0x467   : > { %2098 = vrot.lane.b32.xlu0 %v10742_v19, %s10302_s18 }
 0x46b   : > { %2063 = vrot.lane.b32.xlu0 %v10742_v19, %s10301_s17 }
 0x46f   : > { %2065 = vrot.lane.b32.xlu0 %v2022_v28, %s10301_s17 }
 0x470   : > { %1544 = vxpose.xlu1.b32.start [1/2] (short) (narrow) %v10654_v62, 8 }
 0x473   : > { %2100 = vrot.lane.b32.xlu0 %v2022_v28, %s10302_s18 }
 0x474   : > { %1545 = vxpose.xlu1.b32.end [2/2] (short) (narrow) %v10652_v61, 8 }
 0x492   : > { %2102 = vrot.lane.b32.xlu1 %v2023_v32, %s10302_s18 }
 0x499   : > { %v2044_v41 = vpop.permute.xlu1 %2043 }
 0x49d   : > { %v2046_v37 = vpop.permute.xlu0 %2045  ;;  %v2081_v46 = vpop.permute.xlu1 %2080 }
 0x49e   : > { %v2118_v16 = vsel %vm2116_vm6, %v2011_v36, %v2046_v37 }
 0x4a5   : > { %v2083_v49 = vpop.permute.xlu1 %2082 }
 0x4a6   : > { %v2130_v18 = vsel %vm627_vm4, %v2118_v16, %v2083_v49  ;;  %v2335_v49 = vld [vmem:[%s12085_s3 + $0x90] sm:$0xff] }
 0x4a9   : > { %v2048_v62 = vpop.permute.xlu1 %2047 }
 0x4aa   : > { %v2119_v20 = vsel %vm2116_vm6, %v10669_v39, %v2048_v62 }
 0x4ad   : > { %v2050_v56 = vpop.permute.xlu1 %2049 }
 0x4ae   : > { %v2120_v33 = vsel %vm2116_vm6, %v10676_v44, %v2050_v56  ;;  %v2338_v56 = vld [vmem:[%s12085_s3 + $0xa8] sm:$0xff] }
 0x4b1   : > { %v2087_v38 = vpop.permute.xlu0 %2086  ;;  %v2085_v61 = vpop.permute.xlu1 %2084 }
 0x4b2   : > { %v2132_v36 = vsel %vm627_vm4, %v2120_v33, %v2087_v38 }
 0x4b5   : > { %v2054_v40 = vpop.permute.xlu0 %2053  ;;  %v2052_v0 = vpop.permute.xlu1 %2051 }
 0x4b6   : > { %v2121_v22 = vsel %vm2116_vm6, %v10683_v47, %v2052_v0  ;;  %v2122_v39 = vsel %vm2116_vm6, %v10688_v52, %v2054_v40  ;;  %v2340_v0 = vld [vmem:[%s12085_s3 + $0xb8] sm:$0xff] }
 0x4b9   : > { %v2091_v45 = vpop.permute.xlu0 %2090  ;;  %v2089_v5 = vpop.permute.xlu1 %2088 }
 0x4ba   : > { %v2133_v24 = vsel %vm627_vm4, %v2121_v22, %v2089_v5  ;;  %v2134_v25 = vsel %vm627_vm4, %v2122_v39, %v2091_v45  ;;  %v2333_v45 = vld [vmem:[%s12085_s3 + $0x80] sm:$0xff] }
 0x4bd   : > { %v2056_v48 = vpop.permute.xlu0 %2055 }
 0x4be   : > { %v2123_v26 = vsel %vm2116_vm6, %v10695_v55, %v2056_v48 }
 0x4c1   : > { %v2058_v53 = vpop.permute.xlu0 %2057 }
 0x4c2   : > { %v2124_v47 = vsel %vm2116_vm6, %v10702_v60, %v2058_v53  ;;  %v2336_v53 = vld [vmem:[%s12085_s3 + $0x98] sm:$0xff] }
 0x4c3   : > { %v9950_v62 = vpack.c.bf16 %v2336_v53, %v2335_v49 }
 0x4c5   : > { %v2093_v54 = vpop.permute.xlu0 %2092 }
 0x4c6   : > { %v2135_v28 = vsel %vm627_vm4, %v2123_v26, %v2093_v54  ;;  %v2337_v54 = vld [vmem:[%s12085_s3 + $0xa0] sm:$0xff] }
 0x4c9   : > { %v2095_v57 = vpop.permute.xlu0 %2094 }
 0x4ca   : > { %v2136_v29 = vsel %vm627_vm4, %v2124_v47, %v2095_v57  ;;  %v9954_v57 = vpack.c.bf16 %v2338_v56, %v2337_v54 }
 0x4cd   : > { %v2060_v63 = vpop.permute.xlu0 %2059 }
 0x4ce   : > { %v2125_v52 = vsel %vm2116_vm6, %v10709_v1, %v2060_v63  ;;  %v2339_v63 = vld [vmem:[%s12085_s3 + $0xb0] sm:$0xff] }
 0x4cf   : > { %v9958_v5 = vpack.c.bf16 %v2340_v0, %v2339_v63 }
 0x4d1   : > { %v2062_v4 = vpop.permute.xlu0 %2061 }
 0x4d2   : > { %v2126_v32 = vsel %vm2116_vm6, %v10716_v6, %v2062_v4  ;;  %v2331_v6 = vld [vmem:[%s12085_s3 + $0x70] sm:$0xff] }
 0x4d5   : > { %v2097_v7 = vpop.permute.xlu0 %2096 }
 0x4d6   : > { %v2137_v30 = vsel %vm627_vm4, %v2125_v52, %v2097_v7 }
 0x4d9   : > { %v2099_v12 = vpop.permute.xlu0 %2098 }
 0x4da   : > { %v2138_v37 = vsel %vm627_vm4, %v2126_v32, %v2099_v12 }
 0x4dd   : > { %v2064_v21 = vpop.permute.xlu0 %2063 }
 0x4de   : > { %v2127_v60 = vsel %vm2116_vm6, %v10729_v13, %v2064_v21  ;;  %v2332_v13 = vld [vmem:[%s12085_s3 + $0x78] sm:$0xff] }
 0x4e1   : > { %v2066_v44 = vpop.permute.xlu0 %2065 }
 0x4e2   : > { %v2128_v1 = vsel %vm2116_vm6, %v10742_v19, %v2066_v44  ;;  %v2334_v19 = vld [vmem:[%s12085_s3 + $0x88] sm:$0xff] }
 0x4e3   : > { %v9946_v48 = vpack.c.bf16 %v2334_v19, %v2333_v45  ;;  %v2606_v45 = vld [vmem:[%s12085_s3 + $0xd8] sm:$0xff] }
 0x4e5   : > { %v2101_v55 = vpop.permute.xlu0 %2100 }
 0x4e6   : > { %v2139_v38 = vsel %vm627_vm4, %v2127_v60, %v2101_v55 }
 0x4f0   : > { %v1560_v8 = vpop.trf.xlu1 }
 0x4f1   : > { %v1996_v9 = vadd.f32 %v10659_v31, %v1560_v8  ;;  %v2131_v31 = vsel %vm627_vm4, %v2119_v20, %v2085_v61  ;;  %v10839_v61 = vld [vmem:[%s12085_s3 + $0x68] ss:$0 sm:$0xff] }
 0x4f3   : > { %v2010_v14 = vmax.f32 %v1996_v9, 0.0 }
 0x4f5   : > { %v2117_v15 = vsel %vm2116_vm6, %v2010_v14, %v2044_v41  ;;  %v2341_v14 = vld [vmem:[%s12085_s3 + $0xc0] sm:$0xff] }
 0x4f6   : > { %v2129_v17 = vsel %vm627_vm4, %v2117_v15, %v2081_v46  ;;  %v9942_v46 = vpack.c.bf16 %v2332_v13, %v2331_v6  ;;  %v2342_v15 = vld [vmem:[%s12085_s3 + $0xc8] sm:$0xff] }
 0x4f7   : > { %9390 = vmatprep.mubr.msk.f32.mxu1 %vm2141_vm7, %v2129_v17  ;;  %v9962_v17 = vpack.c.bf16 %v2342_v15, %v2341_v14 }
 0x4f8   : > { %9391 = vmatmul.mubr.msk.f32.vlgmr.msra.gmra.mrb[18].mxu1 %vm2141_vm7, %v2130_v18  ;;  %9943 = vmatprep.subr.bf16.mxu1 %v9942_v46 }
 0x4f9   : > { %9393 = vmatprep.mubr.msk.f32.mxu1 %vm2141_vm7, %v2131_v31  ;;  %9945 = vmatpush3.bf16.msra.mxu1 %v9942_v46  ;;  %v2607_v46 = vld [vmem:[%s12085_s3 + $0xe0] sm:$0xff] }
 0x4fa   : > { %9947 = vmatprep.subr.bf16.mxu1 %v9946_v48  ;;  %v9966_v19 = vpack.c.bf16 %v2607_v46, %v2606_v45 }
 0x4fc   : > { %9394 = vmatmul.mubr.msk.f32.gmra.mrb[20].mxu1 %vm2141_vm7, %v2132_v36 }
 0x4fd   : > { %9396 = vmatprep.mubr.msk.f32.mxu1 %vm2141_vm7, %v2133_v24  ;;  %9949 = vmatpush3.bf16.msra.mxu1 %v9946_v48 }
 0x4fe   : > { %9951 = vmatprep.subr.bf16.mxu1 %v9950_v62 }
 0x500   : > { %9397 = vmatmul.mubr.msk.f32.gmra.mrb[22].mxu1 %vm2141_vm7, %v2134_v25 }
 0x501   : > { %9399 = vmatprep.mubr.msk.f32.mxu1 %vm2141_vm7, %v2135_v28  ;;  %9953 = vmatpush3.bf16.msra.mxu1 %v9950_v62 }
 0x502   : > { %9955 = vmatprep.subr.bf16.mxu1 %v9954_v57 }
 0x504   : > { %9400 = vmatmul.mubr.msk.f32.gmra.mrb[24].mxu1 %vm2141_vm7, %v2136_v29  ;;  %v2103_v40 = vpop.permute.xlu1 %2102 }
 0x505   : > { %9402 = vmatprep.mubr.msk.f32.mxu1 %vm2141_vm7, %v2137_v30  ;;  %v2140_v41 = vsel %vm627_vm4, %v2128_v1, %v2103_v40  ;;  %9957 = vmatpush3.bf16.msra.mxu1 %v9954_v57 }
 0x506   : > { %9959 = vmatprep.subr.bf16.mxu1 %v9958_v5 }
 0x508   : > { %9403 = vmatmul.mubr.msk.f32.gmra.mrb[26].mxu1 %vm2141_vm7, %v2138_v37 }
 0x509   : > { %9405 = vmatprep.mubr.msk.f32.mxu1 %vm2141_vm7, %v2139_v38  ;;  %9961 = vmatpush3.bf16.msra.mxu1 %v9958_v5 }
 0x50a   : > { %9963 = vmatprep.subr.bf16.mxu1 %v9962_v17 }
 0x50c   : > { %9406 = vmatmul.mubr.msk.f32.gmra.mrb[28].mxu1 %vm2141_vm7, %v2140_v41 }
 0x50d   : > { %9965 = vmatpush3.bf16.msra.mxu1 %v9962_v17 }
 0x50e   : > { %9967 = vmatprep.subr.bf16.mxu1 %v9966_v19 }
 0x5cb   : > { %v9392_v4 = vpop.f32.mrb[18].mxu1 }
 0x5cc   : > { %v10848_v7 = vadd.f32 %v9392_v4, %v10839_v61  ;;  %v2244_v8 = vpop.f32.mrb[19].mxu1 }
 0x5cd   : > { %v10851_v9 = vadd.f32 %v10839_v61, %v2244_v8 }
 0x5ce   : > { %v2320_v12 = vmax.f32 %v10848_v7, 0.0 }
 0x5cf   : > { %v9395_v16 = vpop.f32.mrb[20].mxu1  ;;  %v2319_v63 = vmax.f32 %v10851_v9, 0.0 }
 0x5d0   : > { %v2310_v18 = vadd.f32 %v9395_v16, %v10839_v61  ;;  %2354 = vrot.lane.b32.xlu0 %v2320_v12, %s10302_s18  ;;  %v2254_v20 = vpop.f32.mrb[21].mxu1 }
 0x5d1   : > { %v2309_v22 = vadd.f32 %v10839_v61, %v2254_v20 }
 0x5d2   : > { %v10864_v31 = vmax.f32 %v2310_v18, 0.0 }
 0x5d3   : > { %v9398_v21 = vpop.f32.mrb[22].mxu1  ;;  %v2321_v44 = vmax.f32 %v2309_v22, 0.0 }
 0x5d4   : > { %v2312_v33 = vadd.f32 %v9398_v21, %v10839_v61  ;;  %2387 = vrot.lane.b32.xlu0 %v10864_v31, %s10303_s16  ;;  %v2264_v36 = vpop.f32.mrb[23].mxu1 }
 0x5d5   : > { %v2311_v30 = vadd.f32 %v10839_v61, %v2264_v36 }
 0x5d6   : > { %v10870_v24 = vmax.f32 %v2312_v33, 0.0 }
 0x5d7   : > { %v9401_v39 = vpop.f32.mrb[24].mxu1  ;;  %v2323_v38 = vmax.f32 %v2311_v30, 0.0 }
 0x5d8   : > { %2358 = vrot.lane.b32.xlu0 %v10864_v31, %s10302_s18  ;;  %2362 = vrot.lane.b32.xlu1 %v10870_v24, %s10302_s18  ;;  %v2274_v25 = vpop.f32.mrb[25].mxu1  ;;  %v2314_v28 = vadd.f32 %v9401_v39, %v10839_v61 }
 0x5d9   : > { %v2313_v26 = vadd.f32 %v10839_v61, %v2274_v25 }
 0x5da   : > { %v10884_v55 = vmax.f32 %v2314_v28, 0.0 }
 0x5db   : > { %v10878_v47 = vmax.f32 %v2313_v26, 0.0  ;;  %v9404_v29 = vpop.f32.mrb[26].mxu1 }
 0x5dc   : > { %2356 = vrot.lane.b32.xlu0 %v2321_v44, %s10302_s18  ;;  %v2284_v52 = vpop.f32.mrb[27].mxu1  ;;  %v2316_v40 = vadd.f32 %v9404_v29, %v10839_v61 }
 0x5dd   : > { %2393 = vrot.lane.b32.xlu1 %v10878_v47, %s10303_s16  ;;  %v2315_v32 = vadd.f32 %v10839_v61, %v2284_v52 }
 0x5de   : > { %v10896_v41 = vmax.f32 %v2316_v40, 0.0 }
 0x5df   : > { %v9407_v37 = vpop.f32.mrb[28].mxu1  ;;  %v10891_v1 = vmax.f32 %v2315_v32, 0.0 }
 0x5e0   : > { %2385 = vrot.lane.b32.xlu0 %v2321_v44, %s10303_s16  ;;  %v2294_v60 = vpop.f32.mrb[29].mxu1  ;;  %v2318_v48 = vadd.f32 %v9407_v37, %v10839_v61 }
 0x5e1   : > { %2366 = vrot.lane.b32.xlu1 %v10884_v55, %s10302_s18  ;;  %v2317_v6 = vadd.f32 %v10839_v61, %v2294_v60 }
 0x5e2   : > { %v2330_v49 = vmax.f32 %v2318_v48, 0.0 }
 0x5e3   : > { %v2329_v13 = vmax.f32 %v2317_v6, 0.0 }
 0x5e4   : > { %2360 = vrot.lane.b32.xlu0 %v2323_v38, %s10302_s18 }
 0x5e5   : > { %2397 = vrot.lane.b32.xlu1 %v10891_v1, %s10303_s16 }
 0x5e8   : > { %2389 = vrot.lane.b32.xlu0 %v2323_v38, %s10303_s16 }
 0x5e9   : > { %2370 = vrot.lane.b32.xlu1 %v10896_v41, %s10302_s18 }
 0x5ec   : > { %2391 = vrot.lane.b32.xlu0 %v10870_v24, %s10303_s16 }
 0x5ed   : > { %2401 = vrot.lane.b32.xlu1 %v2329_v13, %s10303_s16 }
 0x5f0   : > { %2364 = vrot.lane.b32.xlu0 %v10878_v47, %s10302_s18 }
 0x5f4   : > { %2395 = vrot.lane.b32.xlu0 %v10884_v55, %s10303_s16 }
 0x5f8   : > { %2368 = vrot.lane.b32.xlu0 %v10891_v1, %s10302_s18 }
 0x5fc   : > { %2399 = vrot.lane.b32.xlu0 %v10896_v41, %s10303_s16 }
 0x600   : > { %2372 = vrot.lane.b32.xlu0 %v2329_v13, %s10302_s18 }
 0x604   : > { %2403 = vrot.lane.b32.xlu0 %v2330_v49, %s10303_s16 }
 0x642   : > { %v2355_v53 = vpop.permute.xlu0 %2354 }
 0x643   : > { %v2415_v61 = vsel %vm627_vm4, %v2319_v63, %v2355_v53 }
 0x646   : > { %v2388_v62 = vpop.permute.xlu0 %2387 }
 0x64a   : > { %v2359_v54 = vpop.permute.xlu0 %2358  ;;  %v2363_v57 = vpop.permute.xlu1 %2362 }
 0x64b   : > { %v2417_v9 = vsel %vm627_vm4, %v2321_v44, %v2359_v54  ;;  %v2419_v20 = vsel %vm627_vm4, %v2323_v38, %v2363_v57 }
 0x64e   : > { %v2357_v56 = vpop.permute.xlu0 %2356 }
 0x64f   : > { %v2416_v0 = vsel %vm627_vm4, %v2320_v12, %v2357_v56  ;;  %v2394_v14 = vpop.permute.xlu1 %2393 }
 0x650   : > { %v2427_v8 = vsel %vm2425_vm8, %v2416_v0, %v2388_v62  ;;  %v2430_v33 = vsel %vm2425_vm8, %v2419_v20, %v2394_v14 }
 0x652   : > { %v2386_v4 = vpop.permute.xlu0 %2385 }
 0x653   : > { %v2426_v5 = vsel %vm2425_vm8, %v2415_v61, %v2386_v4  ;;  %v2367_v16 = vpop.permute.xlu1 %2366 }
 0x654   : > { %9432 = vmatprep.mubr.msk.f32.mxu1 %vm2436_vm9, %v2426_v5 }
 0x655   : > { %9433 = vmatmul.mubr.msk.f32.vlgmr.msra.gmra.mrb[30].mxu1 %vm2436_vm9, %v2427_v8 }
 0x656   : > { %v2361_v15 = vpop.permute.xlu0 %2360  ;;  %9969 = vmatpush3.bf16.msra.mxu1 %v9966_v19 }
 0x657   : > { %v2418_v17 = vsel %vm627_vm4, %v10864_v31, %v2361_v15  ;;  %v2398_v36 = vpop.permute.xlu1 %2397  ;;  %v2421_v31 = vsel %vm627_vm4, %v10878_v47, %v2367_v16 }
 0x658   : > { %v2432_v28 = vsel %vm2425_vm8, %v2421_v31, %v2398_v36 }
 0x65a   : > { %v2390_v7 = vpop.permute.xlu0 %2389 }
 0x65b   : > { %v2428_v12 = vsel %vm2425_vm8, %v2417_v9, %v2390_v7  ;;  %v2371_v26 = vpop.permute.xlu1 %2370 }
 0x65c   : > { %9435 = vmatprep.mubr.msk.f32.mxu1 %vm2436_vm9, %v2428_v12 }
 0x65e   : > { %v2392_v18 = vpop.permute.xlu0 %2391 }
 0x65f   : > { %v2429_v21 = vsel %vm2425_vm8, %v2418_v17, %v2392_v18  ;;  %v2402_v52 = vpop.permute.xlu1 %2401 }
 0x660   : > { %9436 = vmatmul.mubr.msk.f32.gmra.mrb[32].mxu1 %vm2436_vm9, %v2429_v21 }
 0x661   : > { %9438 = vmatprep.mubr.msk.f32.mxu1 %vm2436_vm9, %v2430_v33 }
 0x662   : > { %v2365_v22 = vpop.permute.xlu0 %2364 }
 0x663   : > { %v2420_v39 = vsel %vm627_vm4, %v10870_v24, %v2365_v22  ;;  %v2423_v24 = vsel %vm627_vm4, %v10891_v1, %v2371_v26  ;;  %v2609_v1 = vld [vmem:[%s12085_s3 + $0xf0] sm:$0xff] }
 0x664   : > { %v2434_v37 = vsel %vm2425_vm8, %v2423_v24, %v2402_v52 }
 0x666   : > { %v2396_v25 = vpop.permute.xlu0 %2395 }
 0x667   : > { %v2431_v44 = vsel %vm2425_vm8, %v2420_v39, %v2396_v25 }
 0x668   : > { %9439 = vmatmul.mubr.msk.f32.gmra.mrb[34].mxu1 %vm2436_vm9, %v2431_v44 }
 0x669   : > { %9441 = vmatprep.mubr.msk.f32.mxu1 %vm2436_vm9, %v2432_v28 }
 0x66a   : > { %v2369_v29 = vpop.permute.xlu0 %2368 }
 0x66b   : > { %v2422_v30 = vsel %vm627_vm4, %v10884_v55, %v2369_v29  ;;  %v2608_v55 = vld [vmem:[%s12085_s3 + $0xe8] sm:$0xff] }
 0x66c   : > { %v9970_v13 = vpack.c.bf16 %v2609_v1, %v2608_v55 }
 0x66e   : > { %v2400_v32 = vpop.permute.xlu0 %2399  ;;  %9971 = vmatprep.subr.bf16.mxu1 %v9970_v13 }
 0x66f   : > { %v2433_v47 = vsel %vm2425_vm8, %v2422_v30, %v2400_v32  ;;  %9973 = vmatpush3.bf16.msra.mxu1 %v9970_v13 }
 0x670   : > { %9442 = vmatmul.mubr.msk.f32.gmra.mrb[36].mxu1 %vm2436_vm9, %v2433_v47 }
 0x671   : > { %9444 = vmatprep.mubr.msk.f32.mxu1 %vm2436_vm9, %v2434_v37 }
 0x672   : > { %v2373_v60 = vpop.permute.xlu0 %2372 }
 0x673   : > { %v2424_v38 = vsel %vm627_vm4, %v10896_v41, %v2373_v60  ;;  %v8607_v41 = vld [vmem:[%s12085_s3 + $0xd0] ss:$0 sm:$0xff] }
 0x676   : > { %v2404_v40 = vpop.permute.xlu0 %2403 }
 0x677   : > { %v2435_v6 = vsel %vm2425_vm8, %v2424_v38, %v2404_v40 }
 0x678   : > { %9445 = vmatmul.mubr.msk.f32.gmra.mrb[38].mxu1 %vm2436_vm9, %v2435_v6 }
 0x728   : > { %v9434_v45 = vpop.f32.mrb[30].mxu1 }
 0x729   : > { %v2587_v46 = vadd.f32 %v9434_v45, %v8607_v41  ;;  %v2533_v19 = vpop.f32.mrb[31].mxu1 }
 0x72a   : > { %v2586_v48 = vadd.f32 %v8607_v41, %v2533_v19 }
 0x72b   : > { %v2597_v53 = vmax.f32 %v2587_v46, 0.0 }
 0x72c   : > { %v2596_v49 = vmax.f32 %v2586_v48, 0.0 }
 0x72e   : > { %9455 = vmatprep.mubr.msk.f32.mxu1 %vm627_vm4, %v2596_v49 }
 0x72f   : > { %9456 = vmatmul.mubr.msk.f32.vlgmr.msra.gmra.mrb[40].mxu1 %vm627_vm4, %v2597_v53 }
 0x733   : > { %v9437_v62 = vpop.f32.mrb[32].mxu1 }
 0x734   : > { %v2589_v54 = vadd.f32 %v9437_v62, %v8607_v41  ;;  %v2543_v56 = vpop.f32.mrb[33].mxu1 }
 0x735   : > { %v2588_v57 = vadd.f32 %v8607_v41, %v2543_v56 }
 0x736   : > { %v2599_v0 = vmax.f32 %v2589_v54, 0.0 }
 0x737   : > { %v2598_v63 = vmax.f32 %v2588_v57, 0.0 }
 0x739   : > { %9458 = vmatprep.mubr.msk.f32.mxu1 %vm627_vm4, %v2598_v63 }
 0x73a   : > { %9459 = vmatmul.mubr.msk.f32.gmra.mrb[42].mxu1 %vm627_vm4, %v2599_v0 }
 0x73b   : > { %v9440_v61 = vpop.f32.mrb[34].mxu1 }
 0x73c   : > { %v2591_v4 = vadd.f32 %v9440_v61, %v8607_v41  ;;  %v2553_v5 = vpop.f32.mrb[35].mxu1 }
 0x73d   : > { %v2590_v8 = vadd.f32 %v8607_v41, %v2553_v5 }
 0x73e   : > { %v2601_v15 = vmax.f32 %v2591_v4, 0.0 }
 0x73f   : > { %v2600_v14 = vmax.f32 %v2590_v8, 0.0 }
 0x741   : > { %9461 = vmatprep.mubr.msk.f32.mxu1 %vm627_vm4, %v2600_v14 }
 0x742   : > { %9462 = vmatmul.mubr.msk.f32.gmra.mrb[44].mxu1 %vm627_vm4, %v2601_v15 }
 0x743   : > { %v9443_v9 = vpop.f32.mrb[36].mxu1 }
 0x744   : > { %v2593_v7 = vadd.f32 %v9443_v9, %v8607_v41  ;;  %v2563_v16 = vpop.f32.mrb[37].mxu1 }
 0x745   : > { %v2592_v12 = vadd.f32 %v8607_v41, %v2563_v16 }
 0x746   : > { %v2603_v18 = vmax.f32 %v2593_v7, 0.0 }
 0x747   : > { %v2602_v17 = vmax.f32 %v2592_v12, 0.0 }
 0x749   : > { %9464 = vmatprep.mubr.msk.f32.mxu1 %vm627_vm4, %v2602_v17 }
 0x74a   : > { %9465 = vmatmul.mubr.msk.f32.gmra.mrb[46].mxu1 %vm627_vm4, %v2603_v18 }
 0x74b   : > { %v9446_v20 = vpop.f32.mrb[38].mxu1 }
 0x74c   : > { %v2595_v21 = vadd.f32 %v9446_v20, %v8607_v41  ;;  %v2573_v33 = vpop.f32.mrb[39].mxu1 }
 0x74d   : > { %v2594_v36 = vadd.f32 %v8607_v41, %v2573_v33 }
 0x74e   : > { %v2605_v39 = vmax.f32 %v2595_v21, 0.0 }
 0x74f   : > { %v2604_v22 = vmax.f32 %v2594_v36, 0.0 }
 0x751   : > { %9467 = vmatprep.mubr.msk.f32.mxu1 %vm627_vm4, %v2604_v22 }
 0x752   : > { %9468 = vmatmul.mubr.msk.f32.gmra.mrb[48].mxu1 %vm627_vm4, %v2605_v39 }
 0x802   : > { %v9457_v25 = vpop.f32.mrb[40].mxu1 }
 0x803   : > { %2788 = vxpose.xlu0.b32.start.end [1/1] (short) (narrow) %v9457_v25, 16  ;;  %v2707_v31 = vpop.f32.mrb[41].mxu1  ;;  %v11007_v25 = vld [vmem:[%s12085_s3 + $0xf8] ss:$0 sm:$0xff] }
 0x804   : > { %2756 = vxpose.xlu1.b32.start.end [1/1] (short) (narrow) %v2707_v31, 16 }
 0x80d   : > { %v9460_v26 = vpop.f32.mrb[42].mxu1 }
 0x80e   : > { %v2717_v44 = vpop.f32.mrb[43].mxu1 }
 0x80f   : > { %2820 = vxpose.xlu0.b32.start.end [1/1] (short) (narrow) %v2717_v44, 16 }
 0x814   : > { %2852 = vxpose.xlu0.b32.start.end [1/1] (short) (narrow) %v9460_v26, 16 }
 0x815   : > { %v9463_v28 = vpop.f32.mrb[44].mxu1 }
 0x816   : > { %v2727_v29 = vpop.f32.mrb[45].mxu1 }
 0x817   : > { %2884 = vxpose.xlu1.b32.start.end [1/1] (short) (narrow) %v2727_v29, 16 }
 0x819   : > { %2916 = vxpose.xlu0.b32.start.end [1/1] (short) (narrow) %v9463_v28, 16 }
 0x81d   : > { %v9466_v52 = vpop.f32.mrb[46].mxu1 }
 0x81e   : > { %2980 = vxpose.xlu0.b32.start.end [1/1] (short) (narrow) %v9466_v52, 16  ;;  %v2737_v30 = vpop.f32.mrb[47].mxu1 }
 0x81f   : > { %2948 = vxpose.xlu1.b32.start.end [1/1] (short) (narrow) %v2737_v30, 16 }
 0x825   : > { %v9469_v32 = vpop.f32.mrb[48].mxu1 }
 0x826   : > { %3044 = vxpose.xlu0.b32.start.end [1/1] (short) (narrow) %v9469_v32, 16  ;;  %v2747_v24 = vpop.f32.mrb[49].mxu1 }
 0x827   : > { %3012 = vxpose.xlu1.b32.start.end [1/1] (short) (narrow) %v2747_v24, 16 }
 0x883   : > { %v2804_v47 = vpop.trf.xlu0 }
 0x884   : > { %v2772_v37 = vpop.trf.xlu1 }
 0x885   : > { %9472 = vmatprep.mubr.msk.f32.mxu0 %vm1254_vm5, %v2772_v37 }
 0x887   : > { %v2805_v38 = vpop.trf.xlu0 }
 0x888   : > { %v2773_v60 = vpop.trf.xlu1 }
 0x889   : > { %9473 = vmatmul.mubr.msk.f32.vlgmr.msra.gmra.mrb[38].mxu0 %vm1254_vm5, %v2773_v60 }
 0x88a   : > { %9475 = vmatprep.mubr.msk.f32.mxu0 %vm1254_vm5, %v2804_v47 }
 0x88d   : > { %9476 = vmatmul.mubr.msk.f32.gmra.mrb[40].mxu0 %vm1254_vm5, %v2805_v38 }
 0x88f   : > { %v2836_v40 = vpop.trf.xlu0 }
 0x890   : > { %9478 = vmatprep.mubr.msk.f32.mxu0 %vm1254_vm5, %v2836_v40 }
 0x893   : > { %v2837_v6 = vpop.trf.xlu0 }
 0x894   : > { %9479 = vmatmul.mubr.msk.f32.gmra.mrb[42].mxu0 %vm1254_vm5, %v2837_v6 }
 0x897   : > { %v2868_v55 = vpop.trf.xlu0  ;;  %v2900_v1 = vpop.trf.xlu1 }
 0x898   : > { %9481 = vmatprep.mubr.msk.f32.mxu0 %vm1254_vm5, %v2868_v55 }
 0x89b   : > { %v2869_v13 = vpop.trf.xlu0  ;;  %v2901_v41 = vpop.trf.xlu1 }
 0x89c   : > { %9482 = vmatmul.mubr.msk.f32.gmra.mrb[44].mxu0 %vm1254_vm5, %v2869_v13 }
 0x89d   : > { %9484 = vmatprep.mubr.msk.f32.mxu0 %vm1254_vm5, %v2900_v1 }
 0x89f   : > { %v2932_v45 = vpop.trf.xlu0  ;;  %v2964_v46 = vpop.trf.xlu1 }
 0x8a0   : > { %9485 = vmatmul.mubr.msk.f32.gmra.mrb[46].mxu0 %vm1254_vm5, %v2901_v41 }
 0x8a1   : > { %9487 = vmatprep.mubr.msk.f32.mxu0 %vm1254_vm5, %v2932_v45  ;;  %v3645_v45 = vld [vmem:[%s12085_s3 + $0x100] sm:$0xff] }
 0x8a3   : > { %v2933_v19 = vpop.trf.xlu0  ;;  %v2965_v48 = vpop.trf.xlu1 }
 0x8a4   : > { %9488 = vmatmul.mubr.msk.f32.gmra.mrb[48].mxu0 %vm1254_vm5, %v2933_v19  ;;  %v3647_v19 = vld [vmem:[%s12085_s3 + $0x110] sm:$0xff] }
 0x8a5   : > { %9490 = vmatprep.mubr.msk.f32.mxu0 %vm1254_vm5, %v2964_v46  ;;  %v3646_v46 = vld [vmem:[%s12085_s3 + $0x108] sm:$0xff] }
 0x8a7   : > { %v2996_v49 = vpop.trf.xlu0  ;;  %v3028_v53 = vpop.trf.xlu1 }
 0x8a8   : > { %9491 = vmatmul.mubr.msk.f32.gmra.mrb[50].mxu0 %vm1254_vm5, %v2965_v48 }
 0x8a9   : > { %9493 = vmatprep.mubr.msk.f32.mxu0 %vm1254_vm5, %v2996_v49  ;;  %v9974_v49 = vpack.c.bf16 %v3646_v46, %v3645_v45 }
 0x8ab   : > { %v2997_v62 = vpop.trf.xlu0  ;;  %v3029_v54 = vpop.trf.xlu1  ;;  %9975 = vmatprep.subr.bf16.mxu1 %v9974_v49 }
 0x8ac   : > { %9494 = vmatmul.mubr.msk.f32.gmra.mrb[52].mxu0 %vm1254_vm5, %v2997_v62  ;;  %9977 = vmatpush3.bf16.msra.mxu1 %v9974_v49 }
 0x8ad   : > { %9496 = vmatprep.mubr.msk.f32.mxu0 %vm1254_vm5, %v3028_v53  ;;  %v3648_v53 = vld [vmem:[%s12085_s3 + $0x118] sm:$0xff] }
 0x8ae   : > { %v9978_v62 = vpack.c.bf16 %v3648_v53, %v3647_v19 }
 0x8af   : > { %v3060_v56 = vpop.trf.xlu0 }
 0x8b0   : > { %9497 = vmatmul.mubr.msk.f32.gmra.mrb[54].mxu0 %vm1254_vm5, %v3029_v54  ;;  %9979 = vmatprep.subr.bf16.mxu1 %v9978_v62 }
 0x8b1   : > { %9499 = vmatprep.mubr.msk.f32.mxu0 %vm1254_vm5, %v3060_v56  ;;  %9981 = vmatpush3.bf16.msra.mxu1 %v9978_v62 }
 0x8b3   : > { %v3061_v57 = vpop.trf.xlu0 }
 0x8b4   : > { %9500 = vmatmul.mubr.msk.f32.gmra.mrb[56].mxu0 %vm1254_vm5, %v3061_v57 }
 0x95c   : > { %v11000_v63 = vpop.f32.mrb[38].mxu0 }
 0x95d   : > { %v11002_v0 = vpop.f32.mrb[39].mxu0 }
 0x960   : > { %v9477_v61 = vpop.f32.mrb[40].mxu0 }
 0x961   : > { %v3212_v4 = vpop.f32.mrb[41].mxu0 }
 0x962   : > { %3333 = vxpose.xlu1.b32.start [1/2] (short) (narrow) %v3212_v4, 8 }
 0x966   : > { %3334 = vxpose.xlu1.b32.end [2/2] (short) (narrow) %v9477_v61, 8 }
 0x967   : > { %v9480_v5 = vpop.f32.mrb[42].mxu0 }
 0x968   : > { %v3222_v8 = vpop.f32.mrb[43].mxu0 }
 0x969   : > { %3365 = vxpose.xlu0.b32.start [1/2] (short) (narrow) %v3222_v8, 8 }
 0x96d   : > { %3366 = vxpose.xlu0.b32.end [2/2] (short) (narrow) %v9480_v5, 8 }
 0x96f   : > { %v9483_v14 = vpop.f32.mrb[44].mxu0 }
 0x970   : > { %v3232_v15 = vpop.f32.mrb[45].mxu0 }
 0x971   : > { %3397 = vxpose.xlu1.b32.start [1/2] (short) (narrow) %v3232_v15, 8  ;;  %v3650_v15 = vld [vmem:[%s12085_s3 + $0x128] sm:$0xff] }
 0x973   : > { %v9486_v9 = vpop.f32.mrb[46].mxu0 }
 0x974   : > { %v3242_v7 = vpop.f32.mrb[47].mxu0 }
 0x975   : > { %3429 = vxpose.xlu0.b32.start [1/2] (short) (narrow) %v3242_v7, 8  ;;  %3398 = vxpose.xlu1.b32.end [2/2] (short) (narrow) %v9483_v14, 8  ;;  %v3649_v14 = vld [vmem:[%s12085_s3 + $0x120] sm:$0xff] }
 0x976   : > { %v3882_v7 = vld [vmem:[%s12086_s4] sm:$0x3f] }
 0x977   : > { %v9489_v16 = vpop.f32.mrb[48].mxu0 }
 0x978   : > { %v3252_v12 = vpop.f32.mrb[49].mxu0 }
 0x979   : > { %3430 = vxpose.xlu0.b32.end [2/2] (short) (narrow) %v9486_v9, 8  ;;  %3461 = vxpose.xlu1.b32.start [1/2] (short) (narrow) %v3252_v12, 8  ;;  %v9982_v9 = vpack.c.bf16 %v3650_v15, %v3649_v14 }
 0x97b   : > { %v9492_v17 = vpop.f32.mrb[50].mxu0  ;;  %9983 = vmatprep.subr.bf16.mxu1 %v9982_v9 }
 0x97c   : > { %v3262_v18 = vpop.f32.mrb[51].mxu0  ;;  %9985 = vmatpush3.bf16.msra.mxu1 %v9982_v9 }
 0x97d   : > { %3493 = vxpose.xlu0.b32.start [1/2] (short) (narrow) %v3262_v18, 8  ;;  %3462 = vxpose.xlu1.b32.end [2/2] (short) (narrow) %v9489_v16, 8  ;;  %v4055_v16 = vld [vmem:[%s12086_s4 + $0x18] sm:$0xff] }
 0x97e   : > { %9526 = vmatprep.subr.msk.mxu1 %vm451_vm0, %v3882_v7 }
 0x97f   : > { %v9495_v20 = vpop.f32.mrb[52].mxu0 }
 0x980   : > { %v3272_v21 = vpop.f32.mrb[53].mxu0 }
 0x981   : > { %3494 = vxpose.xlu0.b32.end [2/2] (short) (narrow) %v9492_v17, 8  ;;  %3525 = vxpose.xlu1.b32.start [1/2] (short) (narrow) %v3272_v21, 8 }
 0x983   : > { %v9498_v33 = vpop.f32.mrb[54].mxu0 }
 0x984   : > { %v3282_v36 = vpop.f32.mrb[55].mxu0 }
 0x985   : > { %3526 = vxpose.xlu1.b32.end [2/2] (short) (narrow) %v9495_v20, 8  ;;  %3557 = vxpose.xlu0.b32.start [1/2] (short) (narrow) %v3282_v36, 8 }
 0x987   : > { %v9501_v22 = vpop.f32.mrb[56].mxu0 }
 0x988   : > { %v3292_v39 = vpop.f32.mrb[57].mxu0 }
 0x989   : > { %3558 = vxpose.xlu0.b32.end [2/2] (short) (narrow) %v9498_v33, 8  ;;  %3589 = vxpose.xlu1.b32.start [1/2] (short) (narrow) %v3292_v39, 8 }
 0x98d   : > { %3590 = vxpose.xlu1.b32.end [2/2] (short) (narrow) %v9501_v22, 8 }
 0x9e2   : > { %v3349_v31 = vpop.trf.xlu1 }
 0x9e3   : > { %v11010_v26 = vadd.f32 %v11007_v25, %v3349_v31 }
 0x9e5   : > { %v3636_v44 = vmax.f32 %v11010_v26, 0.0 }
 0x9e7   : > { %3660 = vrot.lane.b32.xlu0 %v3636_v44, %s10301_s17 }
 0x9e9   : > { %v3381_v28 = vpop.trf.xlu0 }
 0x9ea   : > { %v3627_v29 = vadd.f32 %v11007_v25, %v3381_v28 }
 0x9ec   : > { %v11017_v52 = vmax.f32 %v3627_v29, 0.0 }
 0x9ee   : > { %3662 = vrot.lane.b32.xlu1 %v11017_v52, %s10301_s17 }
 0x9f1   : > { %v3413_v30 = vpop.trf.xlu1 }
 0x9f2   : > { %v3628_v32 = vadd.f32 %v11007_v25, %v3413_v30  ;;  %3685 = vrot.lane.b32.xlu1 %v11017_v52, %s10302_s18 }
 0x9f4   : > { %v11024_v24 = vmax.f32 %v3628_v32, 0.0 }
 0x9f5   : > { %v3445_v47 = vpop.trf.xlu0 }
 0x9f6   : > { %v3629_v37 = vadd.f32 %v11007_v25, %v3445_v47  ;;  %3664 = vrot.lane.b32.xlu0 %v11024_v24, %s10301_s17  ;;  %3687 = vrot.lane.b32.xlu1 %v11024_v24, %s10302_s18 }
 0x9f8   : > { %v11031_v60 = vmax.f32 %v3629_v37, 0.0 }
 0x9f9   : > { %v3477_v38 = vpop.trf.xlu1 }
 0x9fa   : > { %v3630_v40 = vadd.f32 %v11007_v25, %v3477_v38  ;;  %3689 = vrot.lane.b32.xlu0 %v11031_v60, %s10302_s18  ;;  %3666 = vrot.lane.b32.xlu1 %v11031_v60, %s10301_s17 }
 0x9fc   : > { %v11038_v6 = vmax.f32 %v3630_v40, 0.0 }
 0x9fd   : > { %v3509_v55 = vpop.trf.xlu0 }
 0x9fe   : > { %v3631_v1 = vadd.f32 %v11007_v25, %v3509_v55  ;;  %3668 = vrot.lane.b32.xlu0 %v11038_v6, %s10301_s17  ;;  %3691 = vrot.lane.b32.xlu1 %v11038_v6, %s10302_s18 }
 0xa00   : > { %v11045_v13 = vmax.f32 %v3631_v1, 0.0 }
 0xa01   : > { %v3541_v41 = vpop.trf.xlu1 }
 0xa02   : > { %v3632_v48 = vadd.f32 %v11007_v25, %v3541_v41  ;;  %3693 = vrot.lane.b32.xlu0 %v11045_v13, %s10302_s18  ;;  %3670 = vrot.lane.b32.xlu1 %v11045_v13, %s10301_s17 }
 0xa04   : > { %v11064_v54 = vmax.f32 %v3632_v48, 0.0 }
 0xa05   : > { %v3573_v56 = vpop.trf.xlu0 }
 0xa06   : > { %v3633_v57 = vadd.f32 %v11007_v25, %v3573_v56  ;;  %3672 = vrot.lane.b32.xlu0 %v11064_v54, %s10301_s17  ;;  %3695 = vrot.lane.b32.xlu1 %v11064_v54, %s10302_s18 }
 0xa08   : > { %v3643_v61 = vmax.f32 %v3633_v57, 0.0 }
 0xa09   : > { %v3605_v4 = vpop.trf.xlu1 }
 0xa0a   : > { %v3634_v5 = vadd.f32 %v11007_v25, %v3605_v4  ;;  %3697 = vrot.lane.b32.xlu0 %v3643_v61, %s10302_s18  ;;  %3674 = vrot.lane.b32.xlu1 %v3643_v61, %s10301_s17 }
 0xa0c   : > { %v3644_v8 = vmax.f32 %v3634_v5, 0.0 }
 0xa0e   : > { %3699 = vrot.lane.b32.xlu1 %v3644_v8, %s10302_s18 }
 0xa28   : > { %3301 = vxpose.xlu0.b32.start [1/2] (short) (narrow) %v11002_v0, 8  ;;  %v4054_v0 = vld [vmem:[%s12086_s4 + $0x10] sm:$0xff] }
 0xa29   : > { %v9986_v12 = vpack.c.bf16 %v4055_v16, %v4054_v0  ;;  %v8663_v0 = vld [vmem:[%s12086_s4 + $0x8] ss:$0 sm:$0xff] }
 0xa2b   : > { %9987 = vmatprep.subr.bf16.mxu0 %v9986_v12 }
 0xa2c   : > { %3302 = vxpose.xlu0.b32.end [2/2] (short) (narrow) %v11000_v63, 8  ;;  %9989 = vmatpush3.bf16.msra.mxu0 %v9986_v12 }
 0xa59   : > { %v3661_v63 = vpop.permute.xlu0 %3660 }
 0xa60   : > { %v3663_v18 = vpop.permute.xlu1 %3662 }
 0xa61   : > { %v3710_v55 = vsel %vm2116_vm6, %v3636_v44, %v3663_v18 }
 0xa64   : > { %v3686_v21 = vpop.permute.xlu1 %3685 }
 0xa68   : > { %v3665_v17 = vpop.permute.xlu0 %3664  ;;  %v3688_v36 = vpop.permute.xlu1 %3687 }
 0xa69   : > { %v3711_v41 = vsel %vm2116_vm6, %v11017_v52, %v3665_v17  ;;  %v3718_v45 = vsel %vm627_vm4, %v3710_v55, %v3688_v36 }
 0xa6c   : > { %v3690_v20 = vpop.permute.xlu0 %3689  ;;  %v3667_v39 = vpop.permute.xlu1 %3666 }
 0xa6d   : > { %v3719_v46 = vsel %vm627_vm4, %v3711_v41, %v3690_v20 }
 0xa70   : > { %v3669_v33 = vpop.permute.xlu0 %3668  ;;  %v3692_v28 = vpop.permute.xlu1 %3691 }
 0xa71   : > { %v3713_v44 = vsel %vm2116_vm6, %v11031_v60, %v3669_v33 }
 0xa74   : > { %v3694_v22 = vpop.permute.xlu0 %3693  ;;  %v3671_v30 = vpop.permute.xlu1 %3670 }
 0xa75   : > { %v3721_v19 = vsel %vm627_vm4, %v3713_v44, %v3694_v22  ;;  %v3714_v48 = vsel %vm2116_vm6, %v11038_v6, %v3671_v30 }
 0xa78   : > { %v3673_v31 = vpop.permute.xlu0 %3672  ;;  %v3696_v38 = vpop.permute.xlu1 %3695 }
 0xa79   : > { %v3715_v49 = vsel %vm2116_vm6, %v11045_v13, %v3673_v31 }
 0xa7c   : > { %v3698_v29 = vpop.permute.xlu0 %3697  ;;  %v3675_v26 = vpop.permute.xlu1 %3674 }
 0xa7d   : > { %v3723_v53 = vsel %vm627_vm4, %v3715_v49, %v3698_v29  ;;  %v3716_v60 = vsel %vm2116_vm6, %v11064_v54, %v3675_v26 }
 0xa80   : > { %v3700_v62 = vpop.permute.xlu1 %3699 }
 0xa81   : > { %v3724_v56 = vsel %vm627_vm4, %v3716_v60, %v3700_v62 }
 0xaa8   : > { %v3317_v32 = vpop.trf.xlu0 }
 0xaa9   : > { %v3625_v47 = vadd.f32 %v11007_v25, %v3317_v32  ;;  %v3712_v25 = vsel %vm2116_vm6, %v11024_v24, %v3667_v39  ;;  %v3722_v24 = vsel %vm627_vm4, %v3714_v48, %v3696_v38 }
 0xaaa   : > { %v3720_v52 = vsel %vm627_vm4, %v3712_v25, %v3692_v28 }
 0xaab   : > { %v3635_v37 = vmax.f32 %v3625_v47, 0.0 }
 0xaad   : > { %v3709_v40 = vsel %vm2116_vm6, %v3635_v37, %v3661_v63 }
 0xaae   : > { %v3717_v1 = vsel %vm627_vm4, %v3709_v40, %v3686_v21 }
 0xaaf   : > { %9514 = vmatprep.mubr.msk.f32.mxu1 %vm2141_vm7, %v3717_v1 }
 0xab0   : > { %9515 = vmatmul.mubr.msk.f32.vlgmr.msra.gmra.mrb[50].mxu1 %vm2141_vm7, %v3718_v45 }
 0xab1   : > { %9527 = vmatpush3.msk.msra.mxu1 %vm451_vm0, %v3882_v7  ;;  %9517 = vmatprep.mubr.msk.f32.mxu1 %vm2141_vm7, %v3719_v46 }
 0xab4   : > { %9518 = vmatmul.mubr.msk.f32.gmra.mrb[52].mxu1 %vm2141_vm7, %v3720_v52 }
 0xab5   : > { %9520 = vmatprep.mubr.msk.f32.mxu1 %vm2141_vm7, %v3721_v19 }
 0xab8   : > { %9521 = vmatmul.mubr.msk.f32.gmra.mrb[54].mxu1 %vm2141_vm7, %v3722_v24 }
 0xab9   : > { %9523 = vmatprep.mubr.msk.f32.mxu1 %vm2141_vm7, %v3723_v53 }
 0xabc   : > { %9524 = vmatmul.mubr.msk.f32.gmra.mrb[56].mxu1 %vm2141_vm7, %v3724_v56 }
 0xabd   : > { %9528 = vmatprep.mubr.msk.f32.mxu1 %vm408_vm3, %v10504_v23  ;;  %v4056_v23 = vld [vmem:[%s12086_s4 + $0x20] sm:$0xff] }
 0xac0   : > { %9529 = vmatmul.mubr.msk.f32.vlgmr.msra.gmra.mrb[58].mxu1 %vm408_vm3, %v10510_v27  ;;  %v4057_v27 = vld [vmem:[%s12086_s4 + $0x28] sm:$0xff] }
 0xac1   : > { %9531 = vmatprep.mubr.msk.f32.mxu1 %vm408_vm3, %v10521_v35  ;;  %v8647_v35 = vld [vmem:[%s12085_s3 + $0x130] ss:$0 sm:$0xff] }
 0xac4   : > { %9532 = vmatmul.mubr.msk.f32.gmra.mrb[60].mxu1 %vm408_vm3, %v10518_v34  ;;  %v9990_v34 = vpack.c.bf16 %v4057_v27, %v4056_v23 }
 0xac5   : > { %9534 = vmatprep.mubr.msk.f32.mxu1 %vm408_vm3, %v10532_v42 }
 0xac6   : > { %9991 = vmatprep.subr.bf16.mxu0 %v9990_v34 }
 0xac7   : > { %9993 = vmatpush3.bf16.msra.mxu0 %v9990_v34 }
 0xac8   : > { %9535 = vmatmul.mubr.msk.f32.gmra.mrb[62].mxu1 %vm408_vm3, %v10535_v43 }
 0xac9   : > { %9537 = vmatprep.mubr.msk.f32.mxu1 %vm408_vm3, %v10546_v50 }
 0xacc   : > { %9538 = vmatmul.mubr.msk.f32.gmra.mrb[64].mxu1 %vm408_vm3, %v10549_v51 }
 0xacd   : > { %9540 = vmatprep.mubr.msk.f32.mxu1 %vm408_vm3, %v10560_v58 }
 0xad0   : > { %9541 = vmatmul.mubr.msk.f32.gmra.mrb[66].mxu1 %vm408_vm3, %v10563_v59 }
 0xad1   : > { %9543 = vmatprep.mubr.msk.f32.mxu1 %vm408_vm3, %v10577_v3 }
 0xad4   : > { %9544 = vmatmul.mubr.msk.f32.gmra.mrb[68].mxu1 %vm408_vm3, %v10574_v2 }
 0xad5   : > { %9546 = vmatprep.mubr.msk.f32.mxu1 %vm408_vm3, %v10589_v10 }
 0xad8   : > { %9547 = vmatmul.mubr.msk.f32.gmra.mrb[70].mxu1 %vm408_vm3, %v10592_v11 }
 0xb83   : > { %v9516_v42 = vpop.f32.mrb[50].mxu1 }
 0xb84   : > { %v3859_v43 = vadd.f32 %v9516_v42, %v8647_v35  ;;  %v3815_v50 = vpop.f32.mrb[51].mxu1 }
 0xb85   : > { %v3858_v51 = vadd.f32 %v8647_v35, %v3815_v50 }
 0xb86   : > { %v3867_v58 = vmax.f32 %v3859_v43, 0.0 }
 0xb87   : > { %v3866_v59 = vmax.f32 %v3858_v51, 0.0  ;;  %v9519_v2 = vpop.f32.mrb[52].mxu1 }
 0xb88   : > { %3875 = vst.msk [vmem:[%s11170_s26 + $0x8] sm:$0xff] %vm627_vm4, %v3867_v58  ;;  %v3861_v3 = vadd.f32 %v9519_v2, %v8647_v35  ;;  %v3825_v10 = vpop.f32.mrb[53].mxu1 }
 0xb89   : > { %3874 = vst.msk [vmem:[%s11170_s26] sm:$0xff] %vm627_vm4, %v3866_v59  ;;  %v3860_v11 = vadd.f32 %v8647_v35, %v3825_v10 }
 0xb8a   : > { %v3869_v6 = vmax.f32 %v3861_v3, 0.0 }
 0xb8b   : > { %v3868_v13 = vmax.f32 %v3860_v11, 0.0  ;;  %v9522_v54 = vpop.f32.mrb[54].mxu1  ;;  %v11208_v11 = vld [vmem:[%s12084_s2 + $0x8] sm:$0xff] }
 0xb8c   : > { %3877 = vst.msk [vmem:[%s11170_s26 + $0x18] sm:$0xff] %vm627_vm4, %v3869_v6  ;;  %v3863_v57 = vadd.f32 %v9522_v54, %v8647_v35  ;;  %v3835_v61 = vpop.f32.mrb[55].mxu1  ;;  %9578 = vmatprep.subr.mxu1 %v11208_v11 }
 0xb8d   : > { %3876 = vst.msk [vmem:[%s11170_s26 + $0x10] sm:$0xff] %vm627_vm4, %v3868_v13  ;;  %v3862_v4 = vadd.f32 %v8647_v35, %v3835_v61  ;;  %9579 = vmatpush3.msra.mxu1 %v11208_v11 }
 0xb8e   : > { %v3871_v5 = vmax.f32 %v3863_v57, 0.0 }
 0xb8f   : > { %v3870_v8 = vmax.f32 %v3862_v4, 0.0  ;;  %v9525_v14 = vpop.f32.mrb[56].mxu1 }
 0xb90   : > { %3879 = vst.msk [vmem:[%s11170_s26 + $0x28] sm:$0xff] %vm627_vm4, %v3871_v5  ;;  %v3865_v15 = vadd.f32 %v9525_v14, %v8647_v35  ;;  %v3845_v9 = vpop.f32.mrb[57].mxu1  ;;  %v4684_v14 = vld [vmem:[%s12084_s2] sm:$0xff] }
 0xb91   : > { %3878 = vst.msk [vmem:[%s11170_s26 + $0x20] sm:$0xff] %vm627_vm4, %v3870_v8  ;;  %v3864_v7 = vadd.f32 %v8647_v35, %v3845_v9  ;;  %9622 = vmatprep.subr.mxu1 %v4684_v14 }
 0xb92   : > { %v3873_v16 = vmax.f32 %v3865_v15, 0.0 }
 0xb93   : > { %v3872_v12 = vmax.f32 %v3864_v7, 0.0  ;;  %v9530_v63 = vpop.f32.mrb[58].mxu1 }
 0xb94   : > { %3881 = vst.msk [vmem:[%s11170_s26 + $0x38] sm:$0xff] %vm627_vm4, %v3873_v16  ;;  %v4027_v17 = vadd.f32 %v9530_v63, %v8663_v0  ;;  %v3953_v18 = vpop.f32.mrb[59].mxu1 }
 0xb95   : > { %3880 = vst.msk [vmem:[%s11170_s26 + $0x30] sm:$0xff] %vm627_vm4, %v3872_v12  ;;  %v4026_v20 = vadd.f32 %v8663_v0, %v3953_v18 }
 0xb96   : > { %v4041_v36 = vmax.f32 %v4027_v17, 0.0 }
 0xb97   : > { %v4040_v21 = vmax.f32 %v4026_v20, 0.0  ;;  %v9533_v33 = vpop.f32.mrb[60].mxu1 }
 0xb98   : > { %v4029_v22 = vadd.f32 %v9533_v33, %v8663_v0  ;;  %v3963_v39 = vpop.f32.mrb[61].mxu1 }
 0xb99   : > { %v4028_v31 = vadd.f32 %v8663_v0, %v3963_v39  ;;  %9557 = vmatprep.mubr.msk.f32.mxu0 %vm627_vm4, %v4040_v21 }
 0xb9a   : > { %9558 = vmatmul.mubr.msk.f32.vlgmr.msra.gmra.mrb[58].mxu0 %vm627_vm4, %v4041_v36  ;;  %v4043_v30 = vmax.f32 %v4029_v22, 0.0 }
 0xb9b   : > { %v4042_v28 = vmax.f32 %v4028_v31, 0.0  ;;  %v9536_v29 = vpop.f32.mrb[62].mxu1 }
 0xb9c   : > { %v4031_v32 = vadd.f32 %v9536_v29, %v8663_v0  ;;  %v3973_v47 = vpop.f32.mrb[63].mxu1 }
 0xb9d   : > { %v4030_v37 = vadd.f32 %v8663_v0, %v3973_v47  ;;  %9560 = vmatprep.mubr.msk.f32.mxu0 %vm627_vm4, %v4042_v28 }
 0xb9e   : > { %9561 = vmatmul.mubr.msk.f32.gmra.mrb[60].mxu0 %vm627_vm4, %v4043_v30  ;;  %v4045_v55 = vmax.f32 %v4031_v32, 0.0  ;;  %v11247_v30 = vld [vmem:[%s12084_s2 + $0x10] sm:$0xff] }
 0xb9f   : > { %v4044_v38 = vmax.f32 %v4030_v37, 0.0  ;;  %v9539_v40 = vpop.f32.mrb[64].mxu1 }
 0xba0   : > { %v4033_v1 = vadd.f32 %v9539_v40, %v8663_v0  ;;  %v3983_v41 = vpop.f32.mrb[65].mxu1 }
 0xba1   : > { %v4032_v45 = vadd.f32 %v8663_v0, %v3983_v41  ;;  %9563 = vmatprep.mubr.msk.f32.mxu0 %vm627_vm4, %v4044_v38 }
 0xba2   : > { %9564 = vmatmul.mubr.msk.f32.gmra.mrb[62].mxu0 %vm627_vm4, %v4045_v55  ;;  %v4047_v26 = vmax.f32 %v4033_v1, 0.0 }
 0xba3   : > { %v4046_v46 = vmax.f32 %v4032_v45, 0.0  ;;  %v9542_v25 = vpop.f32.mrb[66].mxu1 }
 0xba4   : > { %v4035_v44 = vadd.f32 %v9542_v25, %v8663_v0  ;;  %v3993_v52 = vpop.f32.mrb[67].mxu1 }
 0xba5   : > { %v4034_v19 = vadd.f32 %v8663_v0, %v3993_v52  ;;  %9566 = vmatprep.mubr.msk.f32.mxu0 %vm627_vm4, %v4046_v46 }
 0xba6   : > { %9567 = vmatmul.mubr.msk.f32.gmra.mrb[64].mxu0 %vm627_vm4, %v4047_v26  ;;  %v4049_v24 = vmax.f32 %v4035_v44, 0.0 }
 0xba7   : > { %v4048_v48 = vmax.f32 %v4034_v19, 0.0  ;;  %v9545_v49 = vpop.f32.mrb[68].mxu1 }
 0xba8   : > { %v4037_v53 = vadd.f32 %v9545_v49, %v8663_v0  ;;  %v4003_v62 = vpop.f32.mrb[69].mxu1 }
 0xba9   : > { %v4036_v60 = vadd.f32 %v8663_v0, %v4003_v62  ;;  %9569 = vmatprep.mubr.msk.f32.mxu0 %vm627_vm4, %v4048_v48 }
 0xbaa   : > { %9570 = vmatmul.mubr.msk.f32.gmra.mrb[66].mxu0 %vm627_vm4, %v4049_v24  ;;  %v4051_v27 = vmax.f32 %v4037_v53, 0.0 }
 0xbab   : > { %v4050_v56 = vmax.f32 %v4036_v60, 0.0  ;;  %v9548_v23 = vpop.f32.mrb[70].mxu1 }
 0xbac   : > { %v4039_v34 = vadd.f32 %v9548_v23, %v8663_v0  ;;  %v4013_v35 = vpop.f32.mrb[71].mxu1 }
 0xbad   : > { %v4038_v42 = vadd.f32 %v8663_v0, %v4013_v35  ;;  %9572 = vmatprep.mubr.msk.f32.mxu0 %vm627_vm4, %v4050_v56 }
 0xbae   : > { %9573 = vmatmul.mubr.msk.f32.gmra.mrb[68].mxu0 %vm627_vm4, %v4051_v27  ;;  %v4053_v50 = vmax.f32 %v4039_v34, 0.0 }
 0xbaf   : > { %v4052_v43 = vmax.f32 %v4038_v42, 0.0 }
 0xbb1   : > { %9575 = vmatprep.mubr.msk.f32.mxu0 %vm627_vm4, %v4052_v43 }
 0xbb2   : > { %9576 = vmatmul.mubr.msk.f32.gmra.mrb[70].mxu0 %vm627_vm4, %v4053_v50 }
 0xc6d   : > { %v9559_v51 = vpop.f32.mrb[58].mxu0 }
 0xc6e   : > { %4268 = vxpose.xlu0.b32.start.end [1/1] (short) (narrow) %v9559_v51, 48  ;;  %v4167_v58 = vpop.f32.mrb[59].mxu0 }
 0xc6f   : > { %4236 = vxpose.xlu1.b32.start.end [1/1] (short) (narrow) %v4167_v58, 48 }
 0xc71   : > { %v9562_v59 = vpop.f32.mrb[60].mxu0 }
 0xc72   : > { %v4177_v2 = vpop.f32.mrb[61].mxu0 }
 0xc75   : > { %v9565_v3 = vpop.f32.mrb[62].mxu0 }
 0xc76   : > { %v4187_v10 = vpop.f32.mrb[63].mxu0 }
 0xc79   : > { %v9568_v6 = vpop.f32.mrb[64].mxu0 }
 0xc7a   : > { %v4197_v13 = vpop.f32.mrb[65].mxu0 }
 0xc7d   : > { %v9571_v54 = vpop.f32.mrb[66].mxu0 }
 0xc7e   : > { %v4207_v57 = vpop.f32.mrb[67].mxu0 }
 0xc81   : > { %v9574_v61 = vpop.f32.mrb[68].mxu0 }
 0xc82   : > { %v4217_v4 = vpop.f32.mrb[69].mxu0 }
 0xc83   : > { %4300 = vxpose.xlu0.b32.start.end [1/1] (short) (narrow) %v4177_v2, 48 }
 0xc84   : > { %4332 = vxpose.xlu1.b32.start.end [1/1] (short) (narrow) %v9562_v59, 48 }
 0xc85   : > { %v9577_v5 = vpop.f32.mrb[70].mxu0 }
 0xc86   : > { %v4227_v8 = vpop.f32.mrb[71].mxu0 }
 0xc98   : > { %4364 = vxpose.xlu0.b32.start.end [1/1] (short) (narrow) %v4187_v10, 48 }
 0xc99   : > { %4396 = vxpose.xlu1.b32.start.end [1/1] (short) (narrow) %v9565_v3, 48 }
 0xcad   : > { %4428 = vxpose.xlu0.b32.start.end [1/1] (short) (narrow) %v4197_v13, 48 }
 0xcae   : > { %4460 = vxpose.xlu1.b32.start.end [1/1] (short) (narrow) %v9568_v6, 48 }
 0xcc2   : > { %4492 = vxpose.xlu0.b32.start.end [1/1] (short) (narrow) %v4207_v57, 48 }
 0xcc3   : > { %4524 = vxpose.xlu1.b32.start.end [1/1] (short) (narrow) %v9571_v54, 48 }
 0xcd7   : > { %4556 = vxpose.xlu0.b32.start.end [1/1] (short) (narrow) %v4217_v4, 48 }
 0xcd8   : > { %4588 = vxpose.xlu1.b32.start.end [1/1] (short) (narrow) %v9574_v61, 48 }
 0xcec   : > { %4620 = vxpose.xlu0.b32.start.end [1/1] (short) (narrow) %v4227_v8, 48 }
 0xced   : > { %4652 = vxpose.xlu1.b32.start.end [1/1] (short) (narrow) %v9577_v5, 48 }
 0xcee   : > { %v11215_v15 = vpop.trf.xlu0 }
 0xcef   : > { %v11217_v9 = vpop.trf.xlu1 }
 0xcf2   : > { %v11219_v7 = vpop.trf.xlu0 }
 0xcf3   : > { %v11221_v0 = vpop.trf.xlu1 }
 0xcf6   : > { %v4286_v16 = vpop.trf.xlu0 }
 0xcf7   : > { %v4254_v12 = vpop.trf.xlu1 }
 0xcf8   : > { %9580 = vmatprep.mubr.msk.f32.mxu1 %vm1254_vm5, %v4254_v12 }
 0xcfa   : > { %v4287_v63 = vpop.trf.xlu0 }
 0xcfb   : > { %v4255_v17 = vpop.trf.xlu1 }
 0xcfc   : > { %9581 = vmatmul.mubr.msk.f32.vlgmr.msra.gmra.mrb[72].mxu1 %vm1254_vm5, %v4255_v17 }
 0xcfd   : > { %9583 = vmatprep.mubr.msk.f32.mxu1 %vm1254_vm5, %v4286_v16  ;;  %9623 = vmatpush3.msra.mxu1 %v4684_v14 }
 0xcfe   : > { %v11226_v18 = vpop.trf.xlu0  ;;  %9666 = vmatprep.subr.mxu1 %v11247_v30 }
 0xcff   : > { %v11228_v20 = vpop.trf.xlu1 }
 0xd00   : > { %9584 = vmatmul.mubr.msk.f32.gmra.mrb[74].mxu1 %vm1254_vm5, %v4287_v63 }
 0xd02   : > { %v11231_v21 = vpop.trf.xlu0 }
 0xd03   : > { %v11233_v33 = vpop.trf.xlu1 }
 0xd06   : > { %v11235_v36 = vpop.trf.xlu0 }
 0xd07   : > { %v11237_v22 = vpop.trf.xlu1 }
 0xd0a   : > { %v11239_v39 = vpop.trf.xlu0 }
 0xd0b   : > { %v11241_v31 = vpop.trf.xlu1 }
 0xd0e   : > { %v4318_v28 = vpop.trf.xlu0 }
 0xd0f   : > { %9586 = vmatprep.mubr.msk.f32.mxu1 %vm1254_vm5, %v4318_v28  ;;  %v4350_v29 = vpop.trf.xlu1 }
 0xd12   : > { %v4319_v32 = vpop.trf.xlu0 }
 0xd13   : > { %9587 = vmatmul.mubr.msk.f32.gmra.mrb[76].mxu1 %vm1254_vm5, %v4319_v32  ;;  %v4351_v47 = vpop.trf.xlu1 }
 0xd14   : > { %9589 = vmatprep.mubr.msk.f32.mxu1 %vm1254_vm5, %v4350_v29 }
 0xd16   : > { %v11252_v37 = vpop.trf.xlu0 }
 0xd17   : > { %9590 = vmatmul.mubr.msk.f32.gmra.mrb[78].mxu1 %vm1254_vm5, %v4351_v47  ;;  %v11255_v38 = vpop.trf.xlu1 }
 0xd1a   : > { %v11257_v40 = vpop.trf.xlu0 }
 0xd1b   : > { %v11259_v55 = vpop.trf.xlu1 }
 0xd1e   : > { %v11261_v1 = vpop.trf.xlu0 }
 0xd1f   : > { %v11263_v41 = vpop.trf.xlu1 }
 0xd22   : > { %v11265_v45 = vpop.trf.xlu0 }
 0xd23   : > { %v11267_v46 = vpop.trf.xlu1 }
 0xd26   : > { %v4382_v25 = vpop.trf.xlu0 }
 0xd27   : > { %9592 = vmatprep.mubr.msk.f32.mxu1 %vm1254_vm5, %v4382_v25  ;;  %v4414_v26 = vpop.trf.xlu1 }
 0xd2a   : > { %v4383_v44 = vpop.trf.xlu0 }
 0xd2b   : > { %9593 = vmatmul.mubr.msk.f32.gmra.mrb[80].mxu1 %vm1254_vm5, %v4383_v44  ;;  %v4415_v52 = vpop.trf.xlu1 }
 0xd2c   : > { %9595 = vmatprep.mubr.msk.f32.mxu1 %vm1254_vm5, %v4414_v26 }
 0xd2e   : > { %v11272_v19 = vpop.trf.xlu0 }
 0xd2f   : > { %9596 = vmatmul.mubr.msk.f32.gmra.mrb[82].mxu1 %vm1254_vm5, %v4415_v52  ;;  %v11275_v48 = vpop.trf.xlu1 }
 0xd32   : > { %v11277_v49 = vpop.trf.xlu0 }
 0xd33   : > { %v11279_v24 = vpop.trf.xlu1 }
 0xd36   : > { %v11281_v53 = vpop.trf.xlu0 }
 0xd37   : > { %v11283_v62 = vpop.trf.xlu1 }
 0xd3a   : > { %v11285_v60 = vpop.trf.xlu0 }
 0xd3b   : > { %v11287_v56 = vpop.trf.xlu1 }
 0xd3e   : > { %v4446_v23 = vpop.trf.xlu0 }
 0xd3f   : > { %9598 = vmatprep.mubr.msk.f32.mxu1 %vm1254_vm5, %v4446_v23  ;;  %v4478_v27 = vpop.trf.xlu1 }
 0xd42   : > { %v4447_v34 = vpop.trf.xlu0 }
 0xd43   : > { %9599 = vmatmul.mubr.msk.f32.gmra.mrb[84].mxu1 %vm1254_vm5, %v4447_v34  ;;  %v4479_v35 = vpop.trf.xlu1 }
 0xd44   : > { %9601 = vmatprep.mubr.msk.f32.mxu1 %vm1254_vm5, %v4478_v27 }
 0xd46   : > { %v11292_v42 = vpop.trf.xlu0 }
 0xd47   : > { %9602 = vmatmul.mubr.msk.f32.gmra.mrb[86].mxu1 %vm1254_vm5, %v4479_v35  ;;  %v11295_v43 = vpop.trf.xlu1 }
 0xd4a   : > { %v11297_v50 = vpop.trf.xlu0 }
 0xd4b   : > { %v11299_v51 = vpop.trf.xlu1 }
 0xd4e   : > { %v4508_v58 = vpop.trf.xlu0 }
 0xd4f   : > { %v4540_v59 = vpop.trf.xlu1 }
 0xd52   : > { %v4509_v2 = vpop.trf.xlu0 }
 0xd53   : > { %v4541_v3 = vpop.trf.xlu1 }
 0xd56   : > { %v4510_v10 = vpop.trf.xlu0 }
 0xd57   : > { %9604 = vmatprep.mubr.msk.f32.mxu1 %vm1254_vm5, %v4510_v10  ;;  %v4542_v6 = vpop.trf.xlu1 }
 0xd5a   : > { %v4511_v13 = vpop.trf.xlu0 }
 0xd5b   : > { %9605 = vmatmul.mubr.msk.f32.gmra.mrb[88].mxu1 %vm1254_vm5, %v4511_v13  ;;  %v4543_v54 = vpop.trf.xlu1 }
 0xd5c   : > { %9607 = vmatprep.mubr.msk.f32.mxu1 %vm1254_vm5, %v4542_v6 }
 0xd5e   : > { %v11304_v57 = vpop.trf.xlu0 }
 0xd5f   : > { %9608 = vmatmul.mubr.msk.f32.gmra.mrb[90].mxu1 %vm1254_vm5, %v4543_v54  ;;  %v11307_v61 = vpop.trf.xlu1 }
 0xd62   : > { %v11309_v4 = vpop.trf.xlu0 }
 0xd63   : > { %v11311_v5 = vpop.trf.xlu1 }
 0xd66   : > { %v4572_v8 = vpop.trf.xlu0 }
 0xd67   : > { %v4604_v14 = vpop.trf.xlu1 }
 0xd6a   : > { %v4573_v16 = vpop.trf.xlu0 }
 0xd6b   : > { %v4605_v12 = vpop.trf.xlu1 }
 0xd6e   : > { %v4574_v63 = vpop.trf.xlu0 }
 0xd6f   : > { %9610 = vmatprep.mubr.msk.f32.mxu1 %vm1254_vm5, %v4574_v63  ;;  %v4606_v17 = vpop.trf.xlu1 }
 0xd72   : > { %v4575_v28 = vpop.trf.xlu0 }
 0xd73   : > { %9611 = vmatmul.mubr.msk.f32.gmra.mrb[92].mxu1 %vm1254_vm5, %v4575_v28  ;;  %v4607_v29 = vpop.trf.xlu1 }
 0xd74   : > { %9613 = vmatprep.mubr.msk.f32.mxu1 %vm1254_vm5, %v4606_v17 }
 0xd76   : > { %v11316_v32 = vpop.trf.xlu0 }
 0xd77   : > { %9614 = vmatmul.mubr.msk.f32.gmra.mrb[94].mxu1 %vm1254_vm5, %v4607_v29  ;;  %v11319_v47 = vpop.trf.xlu1 }
 0xd7a   : > { %v11321_v25 = vpop.trf.xlu0 }
 0xd7b   : > { %v11323_v26 = vpop.trf.xlu1 }
 0xd7e   : > { %v4636_v44 = vpop.trf.xlu0 }
 0xd7f   : > { %v4668_v52 = vpop.trf.xlu1 }
 0xd82   : > { %v4637_v23 = vpop.trf.xlu0 }
 0xd83   : > { %v4669_v27 = vpop.trf.xlu1 }
 0xd86   : > { %v4638_v34 = vpop.trf.xlu0 }
 0xd87   : > { %9616 = vmatprep.mubr.msk.f32.mxu1 %vm1254_vm5, %v4638_v34  ;;  %v4670_v35 = vpop.trf.xlu1 }
 0xd8a   : > { %v4639_v10 = vpop.trf.xlu0 }
 0xd8b   : > { %9617 = vmatmul.mubr.msk.f32.gmra.mrb[96].mxu1 %vm1254_vm5, %v4639_v10  ;;  %v4671_v6 = vpop.trf.xlu1 }
 0xd8c   : > { %9619 = vmatprep.mubr.msk.f32.mxu1 %vm1254_vm5, %v4670_v35 }
 0xd8f   : > { %9620 = vmatmul.mubr.msk.f32.gmra.mrb[98].mxu1 %vm1254_vm5, %v4671_v6  ;;  %v6066_v6 = vld [vmem:[%s12086_s4 + $0x48] sm:$0xff] }
 0xd90   : > { %9624 = vmatprep.mubr.msk.f32.mxu1 %vm1254_vm5, %v11217_v9  ;;  %v4672_v9 = vpop.trf.xlu1 }
 0xd93   : > { %9625 = vmatmul.mubr.msk.f32.vlgmr.msra.gmra.mrb[72].mxu1 %vm1254_vm5, %v11221_v0 }
 0xd94   : > { %9667 = vmatpush3.msra.mxu1 %v11247_v30  ;;  %9627 = vmatprep.mubr.msk.f32.mxu1 %vm1254_vm5, %v11215_v15  ;;  %v4640_v15 = vpop.trf.xlu0  ;;  %v4673_v0 = vpop.trf.xlu1 }
 0xd97   : > { %9628 = vmatmul.mubr.msk.f32.gmra.mrb[74].mxu1 %vm1254_vm5, %v11219_v7 }
 0xd98   : > { %9630 = vmatprep.mubr.msk.f32.mxu1 %vm1254_vm5, %v11235_v36  ;;  %v4641_v7 = vpop.trf.xlu0 }
 0xd9b   : > { %9631 = vmatmul.mubr.msk.f32.gmra.mrb[76].mxu1 %vm1254_vm5, %v11239_v39 }
 0xd9c   : > { %9633 = vmatprep.mubr.msk.f32.mxu1 %vm1254_vm5, %v11237_v22 }
 0xd9f   : > { %9634 = vmatmul.mubr.msk.f32.gmra.mrb[78].mxu1 %vm1254_vm5, %v11241_v31 }
 0xda0   : > { %9636 = vmatprep.mubr.msk.f32.mxu1 %vm1254_vm5, %v11261_v1 }
 0xda3   : > { %9637 = vmatmul.mubr.msk.f32.gmra.mrb[80].mxu1 %vm1254_vm5, %v11265_v45 }
 0xda4   : > { %9639 = vmatprep.mubr.msk.f32.mxu1 %vm1254_vm5, %v11263_v41 }
 0xda7   : > { %9640 = vmatmul.mubr.msk.f32.gmra.mrb[82].mxu1 %vm1254_vm5, %v11267_v46 }
 0xda8   : > { %9642 = vmatprep.mubr.msk.f32.mxu1 %vm1254_vm5, %v11281_v53 }
 0xdab   : > { %9643 = vmatmul.mubr.msk.f32.gmra.mrb[84].mxu1 %vm1254_vm5, %v11285_v60 }
 0xdac   : > { %9645 = vmatprep.mubr.msk.f32.mxu1 %vm1254_vm5, %v11283_v62 }
 0xdaf   : > { %9646 = vmatmul.mubr.msk.f32.gmra.mrb[86].mxu1 %vm1254_vm5, %v11287_v56 }
 0xdb0   : > { %9648 = vmatprep.mubr.msk.f32.mxu1 %vm1254_vm5, %v4508_v58 }
 0xdb3   : > { %9649 = vmatmul.mubr.msk.f32.gmra.mrb[88].mxu1 %vm1254_vm5, %v4509_v2 }
 0xdb4   : > { %9651 = vmatprep.mubr.msk.f32.mxu1 %vm1254_vm5, %v4540_v59 }
 0xdb7   : > { %9652 = vmatmul.mubr.msk.f32.gmra.mrb[90].mxu1 %vm1254_vm5, %v4541_v3 }
 0xdb8   : > { %9654 = vmatprep.mubr.msk.f32.mxu1 %vm1254_vm5, %v4572_v8 }
 0xdbb   : > { %9655 = vmatmul.mubr.msk.f32.gmra.mrb[92].mxu1 %vm1254_vm5, %v4573_v16 }
 0xdbc   : > { %9657 = vmatprep.mubr.msk.f32.mxu1 %vm1254_vm5, %v4604_v14 }
 0xdbf   : > { %9658 = vmatmul.mubr.msk.f32.gmra.mrb[94].mxu1 %vm1254_vm5, %v4605_v12 }
 0xdc0   : > { %9660 = vmatprep.mubr.msk.f32.mxu1 %vm1254_vm5, %v4636_v44  ;;  %v6064_v44 = vld [vmem:[%s12086_s4 + $0x38] sm:$0xff] }
 0xdc3   : > { %9661 = vmatmul.mubr.msk.f32.gmra.mrb[96].mxu1 %vm1254_vm5, %v4637_v23 }
 0xdc4   : > { %9663 = vmatprep.mubr.msk.f32.mxu1 %vm1254_vm5, %v4668_v52  ;;  %v6065_v52 = vld [vmem:[%s12086_s4 + $0x40] sm:$0xff] }
 0xdc7   : > { %9664 = vmatmul.mubr.msk.f32.gmra.mrb[98].mxu1 %vm1254_vm5, %v4669_v27  ;;  %v9994_v27 = vpack.c.bf16 %v6065_v52, %v6064_v44 }
 0xdc8   : > { %9668 = vmatprep.mubr.msk.f32.mxu1 %vm1254_vm5, %v11228_v20 }
 0xdc9   : > { %9995 = vmatprep.subr.bf16.mxu0 %v9994_v27 }
 0xdca   : > { %9997 = vmatpush3.bf16.msra.mxu0 %v9994_v27 }
 0xdcb   : > { %9669 = vmatmul.mubr.msk.f32.vlgmr.msra.gmra.mrb[72].mxu1 %vm1254_vm5, %v11233_v33 }
 0xdcc   : > { %9671 = vmatprep.mubr.msk.f32.mxu1 %vm1254_vm5, %v11226_v18 }
 0xdcf   : > { %9672 = vmatmul.mubr.msk.f32.gmra.mrb[74].mxu1 %vm1254_vm5, %v11231_v21 }
 0xdd0   : > { %9674 = vmatprep.mubr.msk.f32.mxu1 %vm1254_vm5, %v11252_v37 }
 0xdd3   : > { %9675 = vmatmul.mubr.msk.f32.gmra.mrb[76].mxu1 %vm1254_vm5, %v11257_v40 }
 0xdd4   : > { %9677 = vmatprep.mubr.msk.f32.mxu1 %vm1254_vm5, %v11255_v38 }
 0xdd7   : > { %9678 = vmatmul.mubr.msk.f32.gmra.mrb[78].mxu1 %vm1254_vm5, %v11259_v55 }
 0xdd8   : > { %9680 = vmatprep.mubr.msk.f32.mxu1 %vm1254_vm5, %v11272_v19 }
 0xddb   : > { %9681 = vmatmul.mubr.msk.f32.gmra.mrb[80].mxu1 %vm1254_vm5, %v11277_v49 }
 0xddc   : > { %9683 = vmatprep.mubr.msk.f32.mxu1 %vm1254_vm5, %v11275_v48 }
 0xddf   : > { %9684 = vmatmul.mubr.msk.f32.gmra.mrb[82].mxu1 %vm1254_vm5, %v11279_v24 }
 0xde0   : > { %9686 = vmatprep.mubr.msk.f32.mxu1 %vm1254_vm5, %v11292_v42 }
 0xde3   : > { %9687 = vmatmul.mubr.msk.f32.gmra.mrb[84].mxu1 %vm1254_vm5, %v11297_v50 }
 0xde4   : > { %9689 = vmatprep.mubr.msk.f32.mxu1 %vm1254_vm5, %v11295_v43 }
 0xde7   : > { %9690 = vmatmul.mubr.msk.f32.gmra.mrb[86].mxu1 %vm1254_vm5, %v11299_v51  ;;  %v11433_v51 = vld [vmem:[%s12086_s4 + $0x30] ss:$0 sm:$0xff] }
 0xde8   : > { %9692 = vmatprep.mubr.msk.f32.mxu1 %vm1254_vm5, %v11304_v57 }
 0xdeb   : > { %9693 = vmatmul.mubr.msk.f32.gmra.mrb[88].mxu1 %vm1254_vm5, %v11309_v4 }
 0xdec   : > { %9695 = vmatprep.mubr.msk.f32.mxu1 %vm1254_vm5, %v11307_v61 }
 0xdef   : > { %9696 = vmatmul.mubr.msk.f32.gmra.mrb[90].mxu1 %vm1254_vm5, %v11311_v5 }
 0xdf0   : > { %9698 = vmatprep.mubr.msk.f32.mxu1 %vm1254_vm5, %v11316_v32 }
 0xdf3   : > { %9699 = vmatmul.mubr.msk.f32.gmra.mrb[92].mxu1 %vm1254_vm5, %v11321_v25 }
 0xdf4   : > { %9701 = vmatprep.mubr.msk.f32.mxu1 %vm1254_vm5, %v11319_v47 }
 0xdf7   : > { %9702 = vmatmul.mubr.msk.f32.gmra.mrb[94].mxu1 %vm1254_vm5, %v11323_v26 }
 0xdf8   : > { %9704 = vmatprep.mubr.msk.f32.mxu1 %vm1254_vm5, %v4640_v15  ;;  %v6067_v15 = vld [vmem:[%s12086_s4 + $0x50] sm:$0xff] }
 0xdfb   : > { %9705 = vmatmul.mubr.msk.f32.gmra.mrb[96].mxu1 %vm1254_vm5, %v4641_v7  ;;  %v9998_v7 = vpack.c.bf16 %v6067_v15, %v6066_v6 }
 0xdfc   : > { %9707 = vmatprep.mubr.msk.f32.mxu1 %vm1254_vm5, %v4672_v9 }
 0xdfd   : > { %9999 = vmatprep.subr.bf16.mxu0 %v9998_v7 }
 0xdfe   : > { %10001 = vmatpush3.bf16.msra.mxu0 %v9998_v7 }
 0xdff   : > { %9708 = vmatmul.mubr.msk.f32.gmra.mrb[98].mxu1 %vm1254_vm5, %v4673_v0 }
 0xe9e   : > { %v11426_v18 = vpop.f32.mrb[72].mxu1 }
 0xe9f   : > { %v11428_v20 = vpop.f32.mrb[73].mxu1 }
 0xea2   : > { %v9673_v21 = vpop.f32.mrb[74].mxu1 }
 0xea3   : > { %v5427_v33 = vpop.f32.mrb[75].mxu1 }
 0xea4   : > { %5616 = vxpose.xlu0.b32.start [1/2] (short) (narrow) %v5427_v33, 8  ;;  %v6068_v33 = vld [vmem:[%s12086_s4 + $0x58] sm:$0xff] }
 0xea6   : > { %v9676_v36 = vpop.f32.mrb[76].mxu1 }
 0xea7   : > { %v5437_v22 = vpop.f32.mrb[77].mxu1 }
 0xea8   : > { %5617 = vxpose.xlu0.b32.end [2/2] (short) (narrow) %v9673_v21, 8  ;;  %5648 = vxpose.xlu1.b32.start [1/2] (short) (narrow) %v5437_v22, 8 }
 0xeaa   : > { %v9679_v39 = vpop.f32.mrb[78].mxu1 }
 0xeab   : > { %v5447_v31 = vpop.f32.mrb[79].mxu1 }
 0xeac   : > { %5649 = vxpose.xlu1.b32.end [2/2] (short) (narrow) %v9676_v36, 8  ;;  %5680 = vxpose.xlu0.b32.start [1/2] (short) (narrow) %v5447_v31, 8  ;;  %v6069_v36 = vld [vmem:[%s12086_s4 + $0x60] sm:$0xff] }
 0xeae   : > { %v9682_v30 = vpop.f32.mrb[80].mxu1 }
 0xeaf   : > { %v5457_v37 = vpop.f32.mrb[81].mxu1 }
 0xeb0   : > { %5681 = vxpose.xlu0.b32.end [2/2] (short) (narrow) %v9679_v39, 8  ;;  %5712 = vxpose.xlu1.b32.start [1/2] (short) (narrow) %v5457_v37, 8  ;;  %v10002_v39 = vpack.c.bf16 %v6069_v36, %v6068_v33 }
 0xeb2   : > { %v9685_v38 = vpop.f32.mrb[82].mxu1  ;;  %10003 = vmatprep.subr.bf16.mxu0 %v10002_v39 }
 0xeb3   : > { %v5467_v40 = vpop.f32.mrb[83].mxu1  ;;  %10005 = vmatpush3.bf16.msra.mxu0 %v10002_v39  ;;  %v6370_v39 = vld [vmem:[%s12086_s4 + $0x78] sm:$0xff] }
 0xeb4   : > { %5713 = vxpose.xlu1.b32.end [2/2] (short) (narrow) %v9682_v30, 8  ;;  %5744 = vxpose.xlu0.b32.start [1/2] (short) (narrow) %v5467_v40, 8 }
 0xeb6   : > { %v9688_v55 = vpop.f32.mrb[84].mxu1 }
 0xeb7   : > { %v5477_v1 = vpop.f32.mrb[85].mxu1 }
 0xeb8   : > { %5745 = vxpose.xlu0.b32.end [2/2] (short) (narrow) %v9685_v38, 8  ;;  %5776 = vxpose.xlu1.b32.start [1/2] (short) (narrow) %v5477_v1, 8 }
 0xeba   : > { %v9691_v41 = vpop.f32.mrb[86].mxu1 }
 0xebb   : > { %v5487_v45 = vpop.f32.mrb[87].mxu1 }
 0xebc   : > { %5777 = vxpose.xlu1.b32.end [2/2] (short) (narrow) %v9688_v55, 8  ;;  %5808 = vxpose.xlu0.b32.start [1/2] (short) (narrow) %v5487_v45, 8 }
 0xebe   : > { %v9694_v46 = vpop.f32.mrb[88].mxu1 }
 0xebf   : > { %v5497_v19 = vpop.f32.mrb[89].mxu1 }
 0xec0   : > { %5809 = vxpose.xlu0.b32.end [2/2] (short) (narrow) %v9691_v41, 8  ;;  %5840 = vxpose.xlu1.b32.start [1/2] (short) (narrow) %v5497_v19, 8 }
 0xec2   : > { %v9697_v48 = vpop.f32.mrb[90].mxu1 }
 0xec3   : > { %v5507_v49 = vpop.f32.mrb[91].mxu1 }
 0xec4   : > { %5841 = vxpose.xlu1.b32.end [2/2] (short) (narrow) %v9694_v46, 8  ;;  %5872 = vxpose.xlu0.b32.start [1/2] (short) (narrow) %v5507_v49, 8 }
 0xec6   : > { %v9700_v24 = vpop.f32.mrb[92].mxu1 }
 0xec7   : > { %v5517_v53 = vpop.f32.mrb[93].mxu1 }
 0xec8   : > { %5873 = vxpose.xlu0.b32.end [2/2] (short) (narrow) %v9697_v48, 8  ;;  %5904 = vxpose.xlu1.b32.start [1/2] (short) (narrow) %v5517_v53, 8 }
 0xeca   : > { %v9703_v62 = vpop.f32.mrb[94].mxu1 }
 0xecb   : > { %v5527_v60 = vpop.f32.mrb[95].mxu1 }
 0xecc   : > { %5905 = vxpose.xlu1.b32.end [2/2] (short) (narrow) %v9700_v24, 8  ;;  %5936 = vxpose.xlu0.b32.start [1/2] (short) (narrow) %v5527_v60, 8 }
 0xece   : > { %v9706_v56 = vpop.f32.mrb[96].mxu1 }
 0xecf   : > { %v5537_v42 = vpop.f32.mrb[97].mxu1 }
 0xed0   : > { %5937 = vxpose.xlu0.b32.end [2/2] (short) (narrow) %v9703_v62, 8  ;;  %5968 = vxpose.xlu1.b32.start [1/2] (short) (narrow) %v5537_v42, 8 }
 0xed2   : > { %v9709_v43 = vpop.f32.mrb[98].mxu1 }
 0xed3   : > { %v5547_v50 = vpop.f32.mrb[99].mxu1 }
 0xed4   : > { %5969 = vxpose.xlu1.b32.end [2/2] (short) (narrow) %v9706_v56, 8  ;;  %6000 = vxpose.xlu0.b32.start [1/2] (short) (narrow) %v5547_v50, 8 }
 0xed8   : > { %6001 = vxpose.xlu0.b32.end [2/2] (short) (narrow) %v9709_v43, 8 }
 0xf24   : > { %v5632_v58 = vpop.trf.xlu0 }
 0xf25   : > { %v11436_v59 = vadd.f32 %v11433_v51, %v5632_v58 }
 0xf27   : > { %v6051_v2 = vmax.f32 %v11436_v59, 0.0 }
 0xf28   : > { %v5664_v3 = vpop.trf.xlu1 }
 0xf29   : > { %v6038_v13 = vadd.f32 %v11433_v51, %v5664_v3  ;;  %6083 = vrot.lane.b32.xlu1 %v6051_v2, %s10301_s17 }
 0xf2b   : > { %v11443_v54 = vmax.f32 %v6038_v13, 0.0 }
 0xf2c   : > { %v5696_v57 = vpop.trf.xlu0 }
 0xf2d   : > { %v6039_v61 = vadd.f32 %v11433_v51, %v5696_v57  ;;  %6085 = vrot.lane.b32.xlu0 %v11443_v54, %s10301_s17  ;;  %6120 = vrot.lane.b32.xlu1 %v11443_v54, %s10302_s18 }
 0xf2f   : > { %v11450_v4 = vmax.f32 %v6039_v61, 0.0 }
 0xf30   : > { %v5728_v5 = vpop.trf.xlu1 }
 0xf31   : > { %v6040_v8 = vadd.f32 %v11433_v51, %v5728_v5  ;;  %6122 = vrot.lane.b32.xlu1 %v11450_v4, %s10302_s18 }
 0xf33   : > { %v11455_v14 = vmax.f32 %v6040_v8, 0.0 }
 0xf34   : > { %v5760_v16 = vpop.trf.xlu0 }
 0xf35   : > { %v6041_v12 = vadd.f32 %v11433_v51, %v5760_v16  ;;  %6124 = vrot.lane.b32.xlu0 %v11455_v14, %s10302_s18  ;;  %6087 = vrot.lane.b32.xlu1 %v11450_v4, %s10301_s17 }
 0xf37   : > { %v11462_v63 = vmax.f32 %v6041_v12, 0.0 }
 0xf38   : > { %v5792_v17 = vpop.trf.xlu1 }
 0xf39   : > { %v6042_v28 = vadd.f32 %v11433_v51, %v5792_v17  ;;  %6089 = vrot.lane.b32.xlu1 %v11455_v14, %s10301_s17  ;;  %6091 = vrot.lane.b32.xlu0 %v11462_v63, %s10301_s17 }
 0xf3b   : > { %v11469_v29 = vmax.f32 %v6042_v28, 0.0 }
 0xf3c   : > { %v5824_v32 = vpop.trf.xlu0 }
 0xf3d   : > { %6128 = vrot.lane.b32.xlu0 %v11469_v29, %s10302_s18  ;;  %6126 = vrot.lane.b32.xlu1 %v11462_v63, %s10302_s18  ;;  %v6043_v47 = vadd.f32 %v11433_v51, %v5824_v32 }
 0xf3f   : > { %v11476_v25 = vmax.f32 %v6043_v47, 0.0 }
 0xf40   : > { %v5856_v26 = vpop.trf.xlu1 }
 0xf41   : > { %6093 = vrot.lane.b32.xlu1 %v11469_v29, %s10301_s17  ;;  %v6044_v23 = vadd.f32 %v11433_v51, %v5856_v26 }
 0xf43   : > { %v11489_v34 = vmax.f32 %v6044_v23, 0.0 }
 0xf44   : > { %v5888_v35 = vpop.trf.xlu0 }
 0xf45   : > { %6130 = vrot.lane.b32.xlu1 %v11476_v25, %s10302_s18  ;;  %v6045_v10 = vadd.f32 %v11433_v51, %v5888_v35 }
 0xf47   : > { %v11502_v9 = vmax.f32 %v6045_v10, 0.0 }
 0xf48   : > { %v5920_v0 = vpop.trf.xlu1 }
 0xf49   : > { %6095 = vrot.lane.b32.xlu1 %v11476_v25, %s10301_s17  ;;  %v6046_v21 = vadd.f32 %v11433_v51, %v5920_v0 }
 0xf4b   : > { %v11515_v22 = vmax.f32 %v6046_v21, 0.0 }
 0xf4c   : > { %v5952_v31 = vpop.trf.xlu0 }
 0xf4d   : > { %6097 = vrot.lane.b32.xlu1 %v11489_v34, %s10301_s17  ;;  %v6047_v30 = vadd.f32 %v11433_v51, %v5952_v31 }
 0xf4f   : > { %v11524_v38 = vmax.f32 %v6047_v30, 0.0  ;;  %v6372_v30 = vld [vmem:[%s12086_s4 + $0x88] sm:$0xff] }
 0xf50   : > { %v5984_v37 = vpop.trf.xlu1 }
 0xf51   : > { %6132 = vrot.lane.b32.xlu1 %v11489_v34, %s10302_s18  ;;  %v6048_v40 = vadd.f32 %v11433_v51, %v5984_v37 }
 0xf53   : > { %v6062_v55 = vmax.f32 %v6048_v40, 0.0  ;;  %v6374_v40 = vld [vmem:[%s12086_s4 + $0x98] sm:$0xff] }
 0xf55   : > { %6134 = vrot.lane.b32.xlu1 %v11502_v9, %s10302_s18 }
 0xf59   : > { %6099 = vrot.lane.b32.xlu1 %v11502_v9, %s10301_s17 }
 0xf5b   : > { %5584 = vxpose.xlu0.b32.start [1/2] (short) (narrow) %v11428_v20, 8  ;;  %v6016_v20 = vpop.trf.xlu0 }
 0xf5c   : > { %v6049_v1 = vadd.f32 %v11433_v51, %v6016_v20  ;;  %v6375_v20 = vld [vmem:[%s12086_s4 + $0xa0] sm:$0xff] }
 0xf5d   : > { %6101 = vrot.lane.b32.xlu1 %v11515_v22, %s10301_s17 }
 0xf5e   : > { %v6063_v41 = vmax.f32 %v6049_v1, 0.0  ;;  %v6376_v1 = vld [vmem:[%s12086_s4 + $0xa8] sm:$0xff] }
 0xf5f   : > { %5585 = vxpose.xlu0.b32.end [2/2] (short) (narrow) %v11426_v18, 8 }
 0xf61   : > { %6136 = vrot.lane.b32.xlu1 %v11515_v22, %s10302_s18 }
 0xf65   : > { %6138 = vrot.lane.b32.xlu1 %v11524_v38, %s10302_s18 }
 0xf69   : > { %6105 = vrot.lane.b32.xlu1 %v6062_v55, %s10301_s17 }
 0xf6d   : > { %6140 = vrot.lane.b32.xlu1 %v6062_v55, %s10302_s18 }
 0xf71   : > { %6142 = vrot.lane.b32.xlu1 %v6063_v41, %s10302_s18  ;;  %v10018_v41 = vpack.c.bf16 %v6376_v1, %v6375_v20 }
 0xf88   : > { %6103 = vrot.lane.b32.xlu0 %v11524_v38, %s10301_s17 }
 0xf9b   : > { %v6084_v18 = vpop.permute.xlu1 %6083 }
 0xf9f   : > { %v6121_v45 = vpop.permute.xlu1 %6120  ;;  %v6086_v56 = vpop.permute.xlu0 %6085 }
 0xfa0   : > { %v6157_v17 = vsel %vm2116_vm6, %v6051_v2, %v6086_v56  ;;  %v6380_v56 = vld [vmem:[%s12086_s4 + $0xc8] sm:$0xff] }
 0xfa3   : > { %v6123_v46 = vpop.permute.xlu1 %6122 }
 0xfa4   : > { %v6169_v32 = vsel %vm627_vm4, %v6157_v17, %v6123_v46  ;;  %v6378_v46 = vld [vmem:[%s12086_s4 + $0xb8] sm:$0xff] }
 0xfa7   : > { %v6088_v19 = vpop.permute.xlu1 %6087  ;;  %v6125_v43 = vpop.permute.xlu0 %6124 }
 0xfa8   : > { %v6158_v16 = vsel %vm2116_vm6, %v11443_v54, %v6088_v19 }
 0xfa9   : > { %v6170_v26 = vsel %vm627_vm4, %v6158_v16, %v6125_v43 }
 0xfab   : > { %v6090_v48 = vpop.permute.xlu1 %6089  ;;  %v6092_v58 = vpop.permute.xlu0 %6091 }
 0xfac   : > { %v6160_v59 = vsel %vm2116_vm6, %v11455_v14, %v6092_v58 }
 0xfaf   : > { %v6127_v49 = vpop.permute.xlu1 %6126  ;;  %v6129_v13 = vpop.permute.xlu0 %6128 }
 0xfb0   : > { %v6172_v54 = vsel %vm627_vm4, %v6160_v59, %v6129_v13 }
 0xfb3   : > { %v6094_v24 = vpop.permute.xlu1 %6093 }
 0xfb4   : > { %v6161_v52 = vsel %vm2116_vm6, %v11462_v63, %v6094_v24 }
 0xfb7   : > { %v6131_v53 = vpop.permute.xlu1 %6130 }
 0xfb8   : > { %v6173_v23 = vsel %vm627_vm4, %v6161_v52, %v6131_v53 }
 0xfbb   : > { %v6096_v62 = vpop.permute.xlu1 %6095 }
 0xfbf   : > { %v6098_v60 = vpop.permute.xlu1 %6097 }
 0xfc0   : > { %v6163_v14 = vsel %vm2116_vm6, %v11476_v25, %v6098_v60  ;;  %v6379_v60 = vld [vmem:[%s12086_s4 + $0xc0] sm:$0xff] }
 0xfc1   : > { %v10026_v43 = vpack.c.bf16 %v6380_v56, %v6379_v60 }
 0xfc3   : > { %v6133_v42 = vpop.permute.xlu1 %6132 }
 0xfc7   : > { %v6135_v50 = vpop.permute.xlu1 %6134 }
 0xfc8   : > { %v6175_v35 = vsel %vm627_vm4, %v6163_v14, %v6135_v50 }
 0xfcb   : > { %v6100_v3 = vpop.permute.xlu1 %6099 }
 0xfcc   : > { %v6164_v10 = vsel %vm2116_vm6, %v11489_v34, %v6100_v3 }
 0xfcf   : > { %v6102_v61 = vpop.permute.xlu1 %6101 }
 0xfd3   : > { %v6137_v47 = vpop.permute.xlu1 %6136 }
 0xfd4   : > { %v6176_v6 = vsel %vm627_vm4, %v6164_v10, %v6137_v47 }
 0xfd7   : > { %v6139_v44 = vpop.permute.xlu1 %6138 }
 0xfdb   : > { %v5600_v57 = vpop.trf.xlu0  ;;  %v6106_v63 = vpop.permute.xlu1 %6105 }
 0xfdc   : > { %v6036_v5 = vadd.f32 %v11433_v51, %v5600_v57  ;;  %v6159_v51 = vsel %vm2116_vm6, %v11450_v4, %v6090_v48  ;;  %v6162_v4 = vsel %vm2116_vm6, %v11469_v29, %v6096_v62  ;;  %v6165_v29 = vsel %vm2116_vm6, %v11502_v9, %v6102_v61  ;;  %v6369_v9 = vld [vmem:[%s12086_s4 + $0x70] sm:$0xff] }
 0xfdd   : > { %v6171_v2 = vsel %vm627_vm4, %v6159_v51, %v6127_v49  ;;  %v6174_v27 = vsel %vm627_vm4, %v6162_v4, %v6133_v42  ;;  %v6177_v15 = vsel %vm627_vm4, %v6165_v29, %v6139_v44  ;;  %v6167_v21 = vsel %vm2116_vm6, %v11524_v38, %v6106_v63  ;;  %v6373_v38 = vld [vmem:[%s12086_s4 + $0x90] sm:$0xff]  ;;  %v6642_v29 = vld [vmem:[%s12086_s4 + $0xd8] sm:$0xff] }
 0xfde   : > { %v6050_v8 = vmax.f32 %v6036_v5, 0.0  ;;  %v10006_v31 = vpack.c.bf16 %v6370_v39, %v6369_v9  ;;  %v10014_v55 = vpack.c.bf16 %v6374_v40, %v6373_v38  ;;  %v6644_v9 = vld [vmem:[%s12086_s4 + $0xe8] sm:$0xff]  ;;  %v6645_v39 = vld [vmem:[%s12086_s4 + $0xf0] sm:$0xff] }
 0xfdf   : > { %v6141_v25 = vpop.permute.xlu1 %6140  ;;  %v10034_v40 = vpack.c.bf16 %v6645_v39, %v6644_v9 }
 0xfe0   : > { %v6156_v12 = vsel %vm2116_vm6, %v6050_v8, %v6084_v18  ;;  %10007 = vmatprep.subr.bf16.mxu0 %v10006_v31  ;;  %v8777_v18 = vld [vmem:[%s12086_s4 + $0x68] ss:$0 sm:$0xff] }
 0xfe1   : > { %v6168_v28 = vsel %vm627_vm4, %v6156_v12, %v6121_v45  ;;  %v6377_v45 = vld [vmem:[%s12086_s4 + $0xb0] sm:$0xff] }
 0xfe2   : > { %9722 = vmatprep.mubr.msk.f32.mxu0 %vm2141_vm7, %v6168_v28  ;;  %v10022_v48 = vpack.c.bf16 %v6378_v46, %v6377_v45 }
 0xfe3   : > { %9723 = vmatmul.mubr.msk.f32.vlgmr.msra.gmra.mrb[72].mxu0 %vm2141_vm7, %v6169_v32  ;;  %v6143_v7 = vpop.permute.xlu1 %6142 }
 0xfe4   : > { %9725 = vmatprep.mubr.msk.f32.mxu0 %vm2141_vm7, %v6170_v26  ;;  %v6179_v36 = vsel %vm627_vm4, %v6167_v21, %v6143_v7  ;;  %10009 = vmatpush3.bf16.msra.mxu0 %v10006_v31 }
 0xfe7   : > { %9726 = vmatmul.mubr.msk.f32.gmra.mrb[74].mxu0 %vm2141_vm7, %v6171_v2 }
 0xfe8   : > { %9728 = vmatprep.mubr.msk.f32.mxu0 %vm2141_vm7, %v6172_v54 }
 0xfeb   : > { %9729 = vmatmul.mubr.msk.f32.gmra.mrb[76].mxu0 %vm2141_vm7, %v6173_v23 }
 0xfec   : > { %9731 = vmatprep.mubr.msk.f32.mxu0 %vm2141_vm7, %v6174_v27 }
 0xfef   : > { %9732 = vmatmul.mubr.msk.f32.gmra.mrb[78].mxu0 %vm2141_vm7, %v6175_v35 }
 0xff0   : > { %9734 = vmatprep.mubr.msk.f32.mxu0 %vm2141_vm7, %v6176_v6 }
 0xff3   : > { %9735 = vmatmul.mubr.msk.f32.gmra.mrb[80].mxu0 %vm2141_vm7, %v6177_v15  ;;  %v6643_v15 = vld [vmem:[%s12086_s4 + $0xe0] sm:$0xff] }
 0xffa   : > { %v6104_v0 = vpop.permute.xlu0 %6103 }
 0xffb   : > { %v6166_v34 = vsel %vm2116_vm6, %v11515_v22, %v6104_v0  ;;  %v6371_v22 = vld [vmem:[%s12086_s4 + $0x80] sm:$0xff] }
 0xffc   : > { %v6178_v33 = vsel %vm627_vm4, %v6166_v34, %v6141_v25  ;;  %v10010_v37 = vpack.c.bf16 %v6372_v30, %v6371_v22  ;;  %v10030_v25 = vpack.c.bf16 %v6643_v15, %v6642_v29 }
 0xffd   : > { %9737 = vmatprep.mubr.msk.f32.mxu0 %vm2141_vm7, %v6178_v33 }
 0xffe   : > { %9738 = vmatmul.mubr.msk.f32.gmra.mrb[82].mxu0 %vm2141_vm7, %v6179_v36  ;;  %10011 = vmatprep.subr.bf16.mxu0 %v10010_v37 }
 0xfff   : > { %10013 = vmatpush3.bf16.msra.mxu0 %v10010_v37 }
0x1000   : > { %10015 = vmatprep.subr.bf16.mxu0 %v10014_v55 }
0x1003   : > { %10017 = vmatpush3.bf16.msra.mxu0 %v10014_v55 }
0x1004   : > { %10019 = vmatprep.subr.bf16.mxu0 %v10018_v41 }
0x1007   : > { %10021 = vmatpush3.bf16.msra.mxu0 %v10018_v41 }
0x1008   : > { %10023 = vmatprep.subr.bf16.mxu0 %v10022_v48 }
0x100b   : > { %10025 = vmatpush3.bf16.msra.mxu0 %v10022_v48 }
0x100c   : > { %10027 = vmatprep.subr.bf16.mxu0 %v10026_v43 }
0x100f   : > { %10029 = vmatpush3.bf16.msra.mxu0 %v10026_v43 }
0x1010   : > { %10031 = vmatprep.subr.bf16.mxu0 %v10030_v25 }
0x10b6   : > { %v9724_v19 = vpop.f32.mrb[72].mxu0 }
0x10b7   : > { %v11619_v49 = vadd.f32 %v9724_v19, %v8777_v18  ;;  %v6282_v24 = vpop.f32.mrb[73].mxu0 }
0x10b8   : > { %v11621_v53 = vadd.f32 %v8777_v18, %v6282_v24 }
0x10b9   : > { %v6358_v62 = vmax.f32 %v11619_v49, 0.0 }
0x10ba   : > { %v9727_v42 = vpop.f32.mrb[74].mxu0  ;;  %v6357_v36 = vmax.f32 %v11621_v53, 0.0 }
0x10bb   : > { %v6348_v50 = vadd.f32 %v9727_v42, %v8777_v18  ;;  %6392 = vrot.lane.b32.xlu1 %v6358_v62, %s10302_s18  ;;  %v6292_v58 = vpop.f32.mrb[75].mxu0 }
0x10bc   : > { %v6347_v5 = vadd.f32 %v8777_v18, %v6292_v58 }
0x10bd   : > { %v11633_v3 = vmax.f32 %v6348_v50, 0.0 }
0x10be   : > { %v9730_v13 = vpop.f32.mrb[76].mxu0  ;;  %v6359_v28 = vmax.f32 %v6347_v5, 0.0 }
0x10bf   : > { %v6350_v57 = vadd.f32 %v9730_v13, %v8777_v18  ;;  %6425 = vrot.lane.b32.xlu1 %v11633_v3, %s10303_s16  ;;  %v6302_v61 = vpop.f32.mrb[77].mxu0 }
0x10c0   : > { %v6349_v59 = vadd.f32 %v8777_v18, %v6302_v61 }
0x10c1   : > { %v11637_v8 = vmax.f32 %v6350_v57, 0.0 }
0x10c2   : > { %v9733_v16 = vpop.f32.mrb[78].mxu0  ;;  %v6361_v44 = vmax.f32 %v6349_v59, 0.0 }
0x10c3   : > { %6396 = vrot.lane.b32.xlu1 %v11633_v3, %s10302_s18  ;;  %6429 = vrot.lane.b32.xlu0 %v11637_v8, %s10303_s16  ;;  %v6312_v12 = vpop.f32.mrb[79].mxu0  ;;  %v6352_v32 = vadd.f32 %v9733_v16, %v8777_v18 }
0x10c4   : > { %v6351_v17 = vadd.f32 %v8777_v18, %v6312_v12 }
0x10c5   : > { %v11648_v2 = vmax.f32 %v6352_v32, 0.0  ;;  %v8788_v32 = vld [vmem:[%s12086_s4 + $0xd0] ss:$0 sm:$0xff] }
0x10c6   : > { %v11643_v47 = vmax.f32 %v6351_v17, 0.0  ;;  %v9736_v26 = vpop.f32.mrb[80].mxu0 }
0x10c7   : > { %6394 = vrot.lane.b32.xlu1 %v6359_v28, %s10302_s18  ;;  %v6322_v51 = vpop.f32.mrb[81].mxu0  ;;  %v6354_v52 = vadd.f32 %v9736_v26, %v8777_v18 }
0x10c8   : > { %6402 = vrot.lane.b32.xlu0 %v11643_v47, %s10302_s18  ;;  %v6353_v54 = vadd.f32 %v8777_v18, %v6322_v51 }
0x10c9   : > { %v11658_v27 = vmax.f32 %v6354_v52, 0.0  ;;  %v10200_v52 = vld [vmem:[%s12084_s2 + $0x8] sm:$0xff] }
0x10ca   : > { %v11653_v23 = vmax.f32 %v6353_v54, 0.0 }
0x10cb   : > { %6423 = vrot.lane.b32.xlu1 %v6359_v28, %s10303_s16 }
0x10cc   : > { %6433 = vrot.lane.b32.xlu0 %v11648_v2, %s10303_s16 }
0x10cf   : > { %6398 = vrot.lane.b32.xlu1 %v6361_v44, %s10302_s18 }
0x10d0   : > { %6406 = vrot.lane.b32.xlu0 %v11653_v23, %s10302_s18 }
0x10d1   : > { %v9739_v4 = vpop.f32.mrb[82].mxu0 }
0x10d2   : > { %v6332_v14 = vpop.f32.mrb[83].mxu0  ;;  %v6356_v63 = vadd.f32 %v9739_v4, %v8777_v18 }
0x10d3   : > { %v6355_v35 = vadd.f32 %v8777_v18, %v6332_v14  ;;  %6427 = vrot.lane.b32.xlu1 %v6361_v44, %s10303_s16 }
0x10d4   : > { %6437 = vrot.lane.b32.xlu0 %v11658_v27, %s10303_s16  ;;  %v6368_v6 = vmax.f32 %v6356_v63, 0.0 }
0x10d5   : > { %v6367_v10 = vmax.f32 %v6355_v35, 0.0 }
0x10d7   : > { %6400 = vrot.lane.b32.xlu1 %v11637_v8, %s10302_s18 }
0x10d8   : > { %6410 = vrot.lane.b32.xlu0 %v6367_v10, %s10302_s18 }
0x10db   : > { %6431 = vrot.lane.b32.xlu1 %v11643_v47, %s10303_s16 }
0x10dc   : > { %6441 = vrot.lane.b32.xlu0 %v6368_v6, %s10303_s16 }
0x10df   : > { %6404 = vrot.lane.b32.xlu1 %v11648_v2, %s10302_s18 }
0x10e3   : > { %6435 = vrot.lane.b32.xlu1 %v11653_v23, %s10303_s16 }
0x10e7   : > { %6408 = vrot.lane.b32.xlu1 %v11658_v27, %s10302_s18 }
0x10eb   : > { %6439 = vrot.lane.b32.xlu1 %v6367_v10, %s10303_s16 }
0x112d   : > { %v6393_v7 = vpop.permute.xlu1 %6392 }
0x112e   : > { %v6453_v31 = vsel %vm627_vm4, %v6357_v36, %v6393_v7 }
0x1131   : > { %v6426_v0 = vpop.permute.xlu1 %6425 }
0x1135   : > { %v6397_v34 = vpop.permute.xlu1 %6396  ;;  %v6430_v21 = vpop.permute.xlu0 %6429 }
0x1136   : > { %v6455_v18 = vsel %vm627_vm4, %v6359_v28, %v6397_v34 }
0x1139   : > { %v6395_v33 = vpop.permute.xlu1 %6394 }
0x113a   : > { %v6454_v22 = vsel %vm627_vm4, %v6358_v62, %v6395_v33  ;;  %v6403_v37 = vpop.permute.xlu0 %6402 }
0x113b   : > { %v6464_v55 = vsel %vm2425_vm8, %v6454_v22, %v6426_v0  ;;  %v6458_v62 = vsel %vm627_vm4, %v11637_v8, %v6403_v37 }
0x113d   : > { %v6424_v30 = vpop.permute.xlu1 %6423 }
0x113e   : > { %v6463_v38 = vsel %vm2425_vm8, %v6453_v31, %v6424_v30  ;;  %v6434_v1 = vpop.permute.xlu0 %6433 }
0x113f   : > { %9764 = vmatprep.mubr.msk.f32.mxu0 %vm2436_vm9, %v6463_v38  ;;  %v6468_v56 = vsel %vm2425_vm8, %v6458_v62, %v6434_v1 }
0x1140   : > { %9765 = vmatmul.mubr.msk.f32.vlgmr.msra.gmra.mrb[84].mxu0 %vm2436_vm9, %v6464_v55 }
0x1141   : > { %v6399_v20 = vpop.permute.xlu1 %6398  ;;  %10033 = vmatpush3.bf16.msra.mxu0 %v10030_v25 }
0x1142   : > { %10035 = vmatprep.subr.bf16.mxu0 %v10034_v40  ;;  %v6456_v41 = vsel %vm627_vm4, %v11633_v3, %v6399_v20  ;;  %v6407_v49 = vpop.permute.xlu0 %6406 }
0x1143   : > { %v6466_v19 = vsel %vm2425_vm8, %v6456_v41, %v6430_v21  ;;  %v6460_v58 = vsel %vm627_vm4, %v11648_v2, %v6407_v49 }
0x1145   : > { %v6428_v45 = vpop.permute.xlu1 %6427  ;;  %10037 = vmatpush3.bf16.msra.mxu0 %v10034_v40 }
0x1146   : > { %v6465_v46 = vsel %vm2425_vm8, %v6455_v18, %v6428_v45  ;;  %9802 = vmatprep.subr.mxu0 %v11208_v11  ;;  %v6438_v11 = vpop.permute.xlu0 %6437 }
0x1147   : > { %9767 = vmatprep.mubr.msk.f32.mxu0 %vm2436_vm9, %v6465_v46  ;;  %v6470_v57 = vsel %vm2425_vm8, %v6460_v58, %v6438_v11 }
0x1148   : > { %9768 = vmatmul.mubr.msk.f32.gmra.mrb[86].mxu0 %vm2436_vm9, %v6466_v19 }
0x1149   : > { %v6401_v48 = vpop.permute.xlu1 %6400 }
0x114a   : > { %v6457_v24 = vsel %vm627_vm4, %v6361_v44, %v6401_v48  ;;  %v6411_v3 = vpop.permute.xlu0 %6410 }
0x114b   : > { %v6462_v12 = vsel %vm627_vm4, %v11658_v27, %v6411_v3  ;;  %v10201_v27 = vld [vmem:[%s12084_s2] sm:$0xff] }
0x114d   : > { %v6432_v53 = vpop.permute.xlu1 %6431 }
0x114e   : > { %v6467_v60 = vsel %vm2425_vm8, %v6457_v24, %v6432_v53  ;;  %v6442_v5 = vpop.permute.xlu0 %6441 }
0x114f   : > { %9770 = vmatprep.mubr.msk.f32.mxu0 %vm2436_vm9, %v6467_v60  ;;  %v6472_v28 = vsel %vm2425_vm8, %v6462_v12, %v6442_v5 }
0x1150   : > { %9771 = vmatmul.mubr.msk.f32.gmra.mrb[88].mxu0 %vm2436_vm9, %v6468_v56 }
0x1151   : > { %v6405_v42 = vpop.permute.xlu1 %6404 }
0x1152   : > { %v6459_v43 = vsel %vm627_vm4, %v11643_v47, %v6405_v42 }
0x1155   : > { %v6436_v50 = vpop.permute.xlu1 %6435 }
0x1156   : > { %v6469_v13 = vsel %vm2425_vm8, %v6459_v43, %v6436_v50  ;;  %v11763_v50 = vld [vmem:[%s12084_s2 + $0x10] sm:$0xff] }
0x1157   : > { %9773 = vmatprep.mubr.msk.f32.mxu0 %vm2436_vm9, %v6469_v13 }
0x1158   : > { %9774 = vmatmul.mubr.msk.f32.gmra.mrb[90].mxu0 %vm2436_vm9, %v6470_v57 }
0x1159   : > { %v6409_v61 = vpop.permute.xlu1 %6408 }
0x115a   : > { %v6461_v8 = vsel %vm627_vm4, %v11653_v23, %v6409_v61 }
0x115d   : > { %v6440_v16 = vpop.permute.xlu1 %6439 }
0x115e   : > { %v6471_v17 = vsel %vm2425_vm8, %v6461_v8, %v6440_v16 }
0x115f   : > { %9776 = vmatprep.mubr.msk.f32.mxu0 %vm2436_vm9, %v6471_v17 }
0x1160   : > { %9777 = vmatmul.mubr.msk.f32.gmra.mrb[92].mxu0 %vm2436_vm9, %v6472_v28 }
0x1213   : > { %v9766_v47 = vpop.f32.mrb[84].mxu0 }
0x1214   : > { %v6623_v26 = vadd.f32 %v9766_v47, %v8788_v32  ;;  %v6569_v51 = vpop.f32.mrb[85].mxu0 }
0x1215   : > { %v6622_v59 = vadd.f32 %v8788_v32, %v6569_v51 }
0x1216   : > { %v6633_v54 = vmax.f32 %v6623_v26, 0.0 }
0x1217   : > { %v6632_v2 = vmax.f32 %v6622_v59, 0.0 }
0x1219   : > { %9787 = vmatprep.mubr.msk.f32.mxu0 %vm627_vm4, %v6632_v2 }
0x121a   : > { %9788 = vmatmul.mubr.msk.f32.vlgmr.msra.gmra.mrb[94].mxu0 %vm627_vm4, %v6633_v54 }
0x121b   : > { %v9769_v44 = vpop.f32.mrb[86].mxu0  ;;  %9803 = vmatpush3.msra.mxu0 %v10200_v52 }
0x121c   : > { %v6625_v23 = vadd.f32 %v9769_v44, %v8788_v32  ;;  %v6579_v4 = vpop.f32.mrb[87].mxu0  ;;  %9834 = vmatprep.subr.mxu0 %v10201_v27 }
0x121d   : > { %v6624_v14 = vadd.f32 %v8788_v32, %v6579_v4 }
0x121e   : > { %v6635_v10 = vmax.f32 %v6625_v23, 0.0 }
0x121f   : > { %v6634_v35 = vmax.f32 %v6624_v14, 0.0 }
0x1221   : > { %9790 = vmatprep.mubr.msk.f32.mxu0 %vm627_vm4, %v6634_v35 }
0x1222   : > { %9791 = vmatmul.mubr.msk.f32.gmra.mrb[96].mxu0 %vm627_vm4, %v6635_v10 }
0x1223   : > { %v9772_v63 = vpop.f32.mrb[88].mxu0 }
0x1224   : > { %v6627_v6 = vadd.f32 %v9772_v63, %v8788_v32  ;;  %v6589_v29 = vpop.f32.mrb[89].mxu0 }
0x1225   : > { %v6626_v15 = vadd.f32 %v8788_v32, %v6589_v29 }
0x1226   : > { %v6637_v7 = vmax.f32 %v6627_v6, 0.0 }
0x1227   : > { %v6636_v25 = vmax.f32 %v6626_v15, 0.0 }
0x1229   : > { %9793 = vmatprep.mubr.msk.f32.mxu0 %vm627_vm4, %v6636_v25 }
0x122a   : > { %9794 = vmatmul.mubr.msk.f32.gmra.mrb[98].mxu0 %vm627_vm4, %v6637_v7 }
0x122b   : > { %v9775_v0 = vpop.f32.mrb[90].mxu0 }
0x122c   : > { %v6629_v34 = vadd.f32 %v9775_v0, %v8788_v32  ;;  %v6599_v21 = vpop.f32.mrb[91].mxu0 }
0x122d   : > { %v6628_v33 = vadd.f32 %v8788_v32, %v6599_v21 }
0x122e   : > { %v6639_v9 = vmax.f32 %v6629_v34, 0.0 }
0x122f   : > { %v6638_v36 = vmax.f32 %v6628_v33, 0.0 }
0x1231   : > { %9796 = vmatprep.mubr.msk.f32.mxu0 %vm627_vm4, %v6638_v36 }
0x1232   : > { %9797 = vmatmul.mubr.msk.f32.gmra.mrb[100].mxu0 %vm627_vm4, %v6639_v9 }
0x1233   : > { %v9778_v39 = vpop.f32.mrb[92].mxu0 }
0x1234   : > { %v6631_v22 = vadd.f32 %v9778_v39, %v8788_v32  ;;  %v6609_v31 = vpop.f32.mrb[93].mxu0 }
0x1235   : > { %v6630_v30 = vadd.f32 %v8788_v32, %v6609_v31 }
0x1236   : > { %v6641_v38 = vmax.f32 %v6631_v22, 0.0 }
0x1237   : > { %v6640_v37 = vmax.f32 %v6630_v30, 0.0 }
0x1239   : > { %9799 = vmatprep.mubr.msk.f32.mxu0 %vm627_vm4, %v6640_v37 }
0x123a   : > { %9800 = vmatmul.mubr.msk.f32.gmra.mrb[102].mxu0 %vm627_vm4, %v6641_v38 }
0x12ed   : > { %v9789_v40 = vpop.f32.mrb[94].mxu0 }
0x12ee   : > { %6824 = vxpose.xlu0.b32.start.end [1/1] (short) (narrow) %v9789_v40, 48  ;;  %v6743_v55 = vpop.f32.mrb[95].mxu0 }
0x12ef   : > { %6792 = vxpose.xlu1.b32.start.end [1/1] (short) (narrow) %v6743_v55, 48 }
0x12f5   : > { %v9792_v20 = vpop.f32.mrb[96].mxu0 }
0x12f6   : > { %v6753_v1 = vpop.f32.mrb[97].mxu0 }
0x12fd   : > { %v9795_v41 = vpop.f32.mrb[98].mxu0 }
0x12fe   : > { %v6763_v18 = vpop.f32.mrb[99].mxu0 }
0x1303   : > { %6856 = vxpose.xlu0.b32.start.end [1/1] (short) (narrow) %v6753_v1, 48 }
0x1304   : > { %6888 = vxpose.xlu1.b32.start.end [1/1] (short) (narrow) %v9792_v20, 48 }
0x1305   : > { %v9798_v45 = vpop.f32.mrb[100].mxu0 }
0x1306   : > { %v6773_v46 = vpop.f32.mrb[101].mxu0 }
0x130d   : > { %v9801_v19 = vpop.f32.mrb[102].mxu0 }
0x130e   : > { %v6783_v48 = vpop.f32.mrb[103].mxu0 }
0x1318   : > { %6920 = vxpose.xlu0.b32.start.end [1/1] (short) (narrow) %v6763_v18, 48 }
0x1319   : > { %6952 = vxpose.xlu1.b32.start.end [1/1] (short) (narrow) %v9795_v41, 48 }
0x132d   : > { %6984 = vxpose.xlu0.b32.start.end [1/1] (short) (narrow) %v6773_v46, 48 }
0x132e   : > { %7016 = vxpose.xlu1.b32.start.end [1/1] (short) (narrow) %v9798_v45, 48 }
0x1342   : > { %7048 = vxpose.xlu0.b32.start.end [1/1] (short) (narrow) %v6783_v48, 48 }
0x1343   : > { %7080 = vxpose.xlu1.b32.start.end [1/1] (short) (narrow) %v9801_v19, 48 }
0x136e   : > { %v11747_v49 = vpop.trf.xlu0 }
0x136f   : > { %v11749_v24 = vpop.trf.xlu1 }
0x1372   : > { %v11751_v53 = vpop.trf.xlu0 }
0x1373   : > { %v11753_v62 = vpop.trf.xlu1 }
0x1376   : > { %v6842_v60 = vpop.trf.xlu0 }
0x1377   : > { %v6810_v56 = vpop.trf.xlu1 }
0x1378   : > { %9804 = vmatprep.mubr.msk.f32.mxu0 %vm1254_vm5, %v6810_v56 }
0x137a   : > { %v6843_v11 = vpop.trf.xlu0 }
0x137b   : > { %v6811_v42 = vpop.trf.xlu1 }
0x137c   : > { %9805 = vmatmul.mubr.msk.f32.vlgmr.msra.gmra.mrb[104].mxu0 %vm1254_vm5, %v6811_v42 }
0x137d   : > { %9807 = vmatprep.mubr.msk.f32.mxu0 %vm1254_vm5, %v6842_v60  ;;  %9835 = vmatpush3.msra.mxu0 %v10201_v27 }
0x137e   : > { %v11758_v43 = vpop.trf.xlu0  ;;  %9866 = vmatprep.subr.mxu0 %v11763_v50 }
0x137f   : > { %v11766_v58 = vpop.trf.xlu1 }
0x1380   : > { %9808 = vmatmul.mubr.msk.f32.gmra.mrb[106].mxu0 %vm1254_vm5, %v6843_v11 }
0x1382   : > { %v11769_v3 = vpop.trf.xlu0 }
0x1383   : > { %v11771_v13 = vpop.trf.xlu1 }
0x1386   : > { %v11773_v57 = vpop.trf.xlu0 }
0x1387   : > { %v11775_v61 = vpop.trf.xlu1 }
0x138a   : > { %v11777_v5 = vpop.trf.xlu0 }
0x138b   : > { %v11779_v8 = vpop.trf.xlu1 }
0x138e   : > { %v6874_v16 = vpop.trf.xlu0 }
0x138f   : > { %9810 = vmatprep.mubr.msk.f32.mxu0 %vm1254_vm5, %v6874_v16  ;;  %v6906_v12 = vpop.trf.xlu1  ;;  %v11869_v16 = vld [vmem:[%s12086_s4 + $0xf8] ss:$0 sm:$0xff] }
0x1392   : > { %v6875_v17 = vpop.trf.xlu0 }
0x1393   : > { %9811 = vmatmul.mubr.msk.f32.gmra.mrb[108].mxu0 %vm1254_vm5, %v6875_v17  ;;  %v6907_v28 = vpop.trf.xlu1 }
0x1394   : > { %9813 = vmatprep.mubr.msk.f32.mxu0 %vm1254_vm5, %v6906_v12 }
0x1396   : > { %v11784_v32 = vpop.trf.xlu0 }
0x1397   : > { %9814 = vmatmul.mubr.msk.f32.gmra.mrb[110].mxu0 %vm1254_vm5, %v6907_v28  ;;  %v11787_v47 = vpop.trf.xlu1 }
0x139a   : > { %v11789_v26 = vpop.trf.xlu0 }
0x139b   : > { %v11791_v51 = vpop.trf.xlu1 }
0x139e   : > { %v6936_v59 = vpop.trf.xlu0 }
0x139f   : > { %v6968_v2 = vpop.trf.xlu1 }
0x13a2   : > { %v6937_v54 = vpop.trf.xlu0 }
0x13a3   : > { %v6969_v44 = vpop.trf.xlu1 }
0x13a6   : > { %v6938_v52 = vpop.trf.xlu0 }
0x13a7   : > { %9816 = vmatprep.mubr.msk.f32.mxu0 %vm1254_vm5, %v6938_v52  ;;  %v6970_v23 = vpop.trf.xlu1 }
0x13aa   : > { %v6939_v4 = vpop.trf.xlu0 }
0x13ab   : > { %9817 = vmatmul.mubr.msk.f32.gmra.mrb[112].mxu0 %vm1254_vm5, %v6939_v4  ;;  %v6971_v27 = vpop.trf.xlu1 }
0x13ac   : > { %9819 = vmatprep.mubr.msk.f32.mxu0 %vm1254_vm5, %v6970_v23 }
0x13ae   : > { %v6940_v14 = vpop.trf.xlu0 }
0x13af   : > { %9820 = vmatmul.mubr.msk.f32.gmra.mrb[114].mxu0 %vm1254_vm5, %v6971_v27  ;;  %v6972_v35 = vpop.trf.xlu1 }
0x13b2   : > { %v6941_v10 = vpop.trf.xlu0 }
0x13b3   : > { %v6973_v63 = vpop.trf.xlu1 }
0x13b6   : > { %v7000_v6 = vpop.trf.xlu0 }
0x13b7   : > { %v7032_v29 = vpop.trf.xlu1 }
0x13ba   : > { %v7001_v15 = vpop.trf.xlu0 }
0x13bb   : > { %v7033_v25 = vpop.trf.xlu1 }
0x13be   : > { %v7002_v7 = vpop.trf.xlu0 }
0x13bf   : > { %9822 = vmatprep.mubr.msk.f32.mxu0 %vm1254_vm5, %v7002_v7  ;;  %v7034_v0 = vpop.trf.xlu1 }
0x13c2   : > { %v7003_v34 = vpop.trf.xlu0 }
0x13c3   : > { %9823 = vmatmul.mubr.msk.f32.gmra.mrb[116].mxu0 %vm1254_vm5, %v7003_v34  ;;  %v7035_v21 = vpop.trf.xlu1 }
0x13c4   : > { %9825 = vmatprep.mubr.msk.f32.mxu0 %vm1254_vm5, %v7034_v0  ;;  %v8154_v0 = vld [vmem:[%s12086_s4 + $0x118] sm:$0xff] }
0x13c6   : > { %v7004_v33 = vpop.trf.xlu0 }
0x13c7   : > { %9826 = vmatmul.mubr.msk.f32.gmra.mrb[118].mxu0 %vm1254_vm5, %v7035_v21  ;;  %v7036_v36 = vpop.trf.xlu1 }
0x13ca   : > { %v7005_v9 = vpop.trf.xlu0 }
0x13cb   : > { %v7037_v39 = vpop.trf.xlu1 }
0x13ce   : > { %v7064_v22 = vpop.trf.xlu0 }
0x13cf   : > { %v7096_v31 = vpop.trf.xlu1 }
0x13d2   : > { %v7065_v30 = vpop.trf.xlu0 }
0x13d3   : > { %v7097_v37 = vpop.trf.xlu1 }
0x13d6   : > { %v7066_v38 = vpop.trf.xlu0 }
0x13d7   : > { %9828 = vmatprep.mubr.msk.f32.mxu0 %vm1254_vm5, %v7066_v38  ;;  %v7098_v40 = vpop.trf.xlu1 }
0x13da   : > { %v7067_v55 = vpop.trf.xlu0 }
0x13db   : > { %9829 = vmatmul.mubr.msk.f32.gmra.mrb[120].mxu0 %vm1254_vm5, %v7067_v55  ;;  %v7099_v20 = vpop.trf.xlu1 }
0x13dc   : > { %9831 = vmatprep.mubr.msk.f32.mxu0 %vm1254_vm5, %v7098_v40 }
0x13de   : > { %v7068_v1 = vpop.trf.xlu0 }
0x13df   : > { %9832 = vmatmul.mubr.msk.f32.gmra.mrb[122].mxu0 %vm1254_vm5, %v7099_v20  ;;  %v7100_v41 = vpop.trf.xlu1 }
0x13e0   : > { %9836 = vmatprep.mubr.msk.f32.mxu0 %vm1254_vm5, %v11749_v24 }
0x13e2   : > { %v7069_v18 = vpop.trf.xlu0 }
0x13e3   : > { %9837 = vmatmul.mubr.msk.f32.vlgmr.msra.gmra.mrb[104].mxu0 %vm1254_vm5, %v11753_v62  ;;  %v7101_v45 = vpop.trf.xlu1 }
0x13e4   : > { %9867 = vmatpush3.msra.mxu0 %v11763_v50  ;;  %9839 = vmatprep.mubr.msk.f32.mxu0 %vm1254_vm5, %v11747_v49 }
0x13e7   : > { %9840 = vmatmul.mubr.msk.f32.gmra.mrb[106].mxu0 %vm1254_vm5, %v11751_v53 }
0x13e8   : > { %9842 = vmatprep.mubr.msk.f32.mxu0 %vm1254_vm5, %v11773_v57 }
0x13eb   : > { %9843 = vmatmul.mubr.msk.f32.gmra.mrb[108].mxu0 %vm1254_vm5, %v11777_v5 }
0x13ec   : > { %9845 = vmatprep.mubr.msk.f32.mxu0 %vm1254_vm5, %v11775_v61 }
0x13ef   : > { %9846 = vmatmul.mubr.msk.f32.gmra.mrb[110].mxu0 %vm1254_vm5, %v11779_v8 }
0x13f0   : > { %9848 = vmatprep.mubr.msk.f32.mxu0 %vm1254_vm5, %v6936_v59 }
0x13f3   : > { %9849 = vmatmul.mubr.msk.f32.gmra.mrb[112].mxu0 %vm1254_vm5, %v6937_v54 }
0x13f4   : > { %9851 = vmatprep.mubr.msk.f32.mxu0 %vm1254_vm5, %v6968_v2 }
0x13f7   : > { %9852 = vmatmul.mubr.msk.f32.gmra.mrb[114].mxu0 %vm1254_vm5, %v6969_v44 }
0x13f8   : > { %9854 = vmatprep.mubr.msk.f32.mxu0 %vm1254_vm5, %v7000_v6  ;;  %v8151_v6 = vld [vmem:[%s12086_s4 + $0x100] sm:$0xff] }
0x13fb   : > { %9855 = vmatmul.mubr.msk.f32.gmra.mrb[116].mxu0 %vm1254_vm5, %v7001_v15  ;;  %v8153_v15 = vld [vmem:[%s12086_s4 + $0x110] sm:$0xff] }
0x13fc   : > { %9857 = vmatprep.mubr.msk.f32.mxu0 %vm1254_vm5, %v7032_v29  ;;  %v8152_v29 = vld [vmem:[%s12086_s4 + $0x108] sm:$0xff]  ;;  %v10042_v34 = vpack.c.bf16 %v8154_v0, %v8153_v15 }
0x13fd   : > { %v10038_v7 = vpack.c.bf16 %v8152_v29, %v8151_v6 }
0x13ff   : > { %9858 = vmatmul.mubr.msk.f32.gmra.mrb[118].mxu0 %vm1254_vm5, %v7033_v25  ;;  %10039 = vmatprep.subr.bf16.mxu1 %v10038_v7 }
0x1400   : > { %9860 = vmatprep.mubr.msk.f32.mxu0 %vm1254_vm5, %v7064_v22  ;;  %10041 = vmatpush3.bf16.msra.mxu1 %v10038_v7 }
0x1401   : > { %10043 = vmatprep.subr.bf16.mxu1 %v10042_v34 }
0x1403   : > { %9861 = vmatmul.mubr.msk.f32.gmra.mrb[120].mxu0 %vm1254_vm5, %v7065_v30 }
0x1404   : > { %9863 = vmatprep.mubr.msk.f32.mxu0 %vm1254_vm5, %v7096_v31  ;;  %10045 = vmatpush3.bf16.msra.mxu1 %v10042_v34 }
0x1407   : > { %9864 = vmatmul.mubr.msk.f32.gmra.mrb[122].mxu0 %vm1254_vm5, %v7097_v37 }
0x1408   : > { %9868 = vmatprep.mubr.msk.f32.mxu0 %vm1254_vm5, %v11766_v58 }
0x140b   : > { %9869 = vmatmul.mubr.msk.f32.vlgmr.msra.gmra.mrb[104].mxu0 %vm1254_vm5, %v11771_v13 }
0x140c   : > { %9871 = vmatprep.mubr.msk.f32.mxu0 %vm1254_vm5, %v11758_v43 }
0x140f   : > { %9872 = vmatmul.mubr.msk.f32.gmra.mrb[106].mxu0 %vm1254_vm5, %v11769_v3 }
0x1410   : > { %9874 = vmatprep.mubr.msk.f32.mxu0 %vm1254_vm5, %v11784_v32 }
0x1413   : > { %9875 = vmatmul.mubr.msk.f32.gmra.mrb[108].mxu0 %vm1254_vm5, %v11789_v26 }
0x1414   : > { %9877 = vmatprep.mubr.msk.f32.mxu0 %vm1254_vm5, %v11787_v47 }
0x1417   : > { %9878 = vmatmul.mubr.msk.f32.gmra.mrb[110].mxu0 %vm1254_vm5, %v11791_v51 }
0x1418   : > { %9880 = vmatprep.mubr.msk.f32.mxu0 %vm1254_vm5, %v6940_v14 }
0x141b   : > { %9881 = vmatmul.mubr.msk.f32.gmra.mrb[112].mxu0 %vm1254_vm5, %v6941_v10 }
0x141c   : > { %9883 = vmatprep.mubr.msk.f32.mxu0 %vm1254_vm5, %v6972_v35 }
0x141f   : > { %9884 = vmatmul.mubr.msk.f32.gmra.mrb[114].mxu0 %vm1254_vm5, %v6973_v63 }
0x1420   : > { %9886 = vmatprep.mubr.msk.f32.mxu0 %vm1254_vm5, %v7004_v33  ;;  %v8155_v33 = vld [vmem:[%s12086_s4 + $0x120] sm:$0xff] }
0x1423   : > { %9887 = vmatmul.mubr.msk.f32.gmra.mrb[116].mxu0 %vm1254_vm5, %v7005_v9 }
0x1424   : > { %9889 = vmatprep.mubr.msk.f32.mxu0 %vm1254_vm5, %v7036_v36  ;;  %v8156_v36 = vld [vmem:[%s12086_s4 + $0x128] sm:$0xff] }
0x1425   : > { %v10046_v22 = vpack.c.bf16 %v8156_v36, %v8155_v33 }
0x1427   : > { %9890 = vmatmul.mubr.msk.f32.gmra.mrb[118].mxu0 %vm1254_vm5, %v7037_v39  ;;  %10047 = vmatprep.subr.bf16.mxu1 %v10046_v22 }
0x1428   : > { %9892 = vmatprep.mubr.msk.f32.mxu0 %vm1254_vm5, %v7068_v1  ;;  %10049 = vmatpush3.bf16.msra.mxu1 %v10046_v22 }
0x142b   : > { %9893 = vmatmul.mubr.msk.f32.gmra.mrb[120].mxu0 %vm1254_vm5, %v7069_v18 }
0x142c   : > { %9895 = vmatprep.mubr.msk.f32.mxu0 %vm1254_vm5, %v7100_v41 }
0x142f   : > { %9896 = vmatmul.mubr.msk.f32.gmra.mrb[122].mxu0 %vm1254_vm5, %v7101_v45 }
0x14de   : > { %v11862_v46 = vpop.f32.mrb[104].mxu0 }
0x14df   : > { %v11864_v19 = vpop.f32.mrb[105].mxu0 }
0x14e2   : > { %v9873_v48 = vpop.f32.mrb[106].mxu0 }
0x14e3   : > { %v7698_v49 = vpop.f32.mrb[107].mxu0 }
0x14e4   : > { %7839 = vxpose.xlu0.b32.start [1/2] (short) (narrow) %v7698_v49, 8 }
0x14e6   : > { %v9876_v24 = vpop.f32.mrb[108].mxu0 }
0x14e7   : > { %v7708_v53 = vpop.f32.mrb[109].mxu0 }
0x14e8   : > { %7840 = vxpose.xlu0.b32.end [2/2] (short) (narrow) %v9873_v48, 8  ;;  %7871 = vxpose.xlu1.b32.start [1/2] (short) (narrow) %v7708_v53, 8 }
0x14ea   : > { %v9879_v62 = vpop.f32.mrb[110].mxu0 }
0x14eb   : > { %v7718_v60 = vpop.f32.mrb[111].mxu0 }
0x14ec   : > { %7872 = vxpose.xlu1.b32.end [2/2] (short) (narrow) %v9876_v24, 8  ;;  %7903 = vxpose.xlu0.b32.start [1/2] (short) (narrow) %v7718_v60, 8 }
0x14ee   : > { %v9882_v56 = vpop.f32.mrb[112].mxu0 }
0x14ef   : > { %v7728_v11 = vpop.f32.mrb[113].mxu0 }
0x14f0   : > { %7904 = vxpose.xlu0.b32.end [2/2] (short) (narrow) %v9879_v62, 8  ;;  %7935 = vxpose.xlu1.b32.start [1/2] (short) (narrow) %v7728_v11, 8 }
0x14f2   : > { %v9885_v42 = vpop.f32.mrb[114].mxu0 }
0x14f3   : > { %v7738_v43 = vpop.f32.mrb[115].mxu0 }
0x14f4   : > { %7936 = vxpose.xlu1.b32.end [2/2] (short) (narrow) %v9882_v56, 8  ;;  %7967 = vxpose.xlu0.b32.start [1/2] (short) (narrow) %v7738_v43, 8 }
0x14f6   : > { %v9888_v50 = vpop.f32.mrb[116].mxu0 }
0x14f7   : > { %v7748_v58 = vpop.f32.mrb[117].mxu0 }
0x14f8   : > { %7968 = vxpose.xlu0.b32.end [2/2] (short) (narrow) %v9885_v42, 8  ;;  %7999 = vxpose.xlu1.b32.start [1/2] (short) (narrow) %v7748_v58, 8 }
0x14fa   : > { %v9891_v3 = vpop.f32.mrb[118].mxu0 }
0x14fb   : > { %v7758_v13 = vpop.f32.mrb[119].mxu0 }
0x14fc   : > { %8000 = vxpose.xlu1.b32.end [2/2] (short) (narrow) %v9888_v50, 8  ;;  %8031 = vxpose.xlu0.b32.start [1/2] (short) (narrow) %v7758_v13, 8 }
0x14fe   : > { %v9894_v57 = vpop.f32.mrb[120].mxu0 }
0x14ff   : > { %v7768_v61 = vpop.f32.mrb[121].mxu0 }
0x1500   : > { %8032 = vxpose.xlu0.b32.end [2/2] (short) (narrow) %v9891_v3, 8  ;;  %8063 = vxpose.xlu1.b32.start [1/2] (short) (narrow) %v7768_v61, 8 }
0x1502   : > { %v9897_v5 = vpop.f32.mrb[122].mxu0 }
0x1503   : > { %v7778_v8 = vpop.f32.mrb[123].mxu0 }
0x1504   : > { %8064 = vxpose.xlu1.b32.end [2/2] (short) (narrow) %v9894_v57, 8  ;;  %8095 = vxpose.xlu0.b32.start [1/2] (short) (narrow) %v7778_v8, 8 }
0x1508   : > { %8096 = vxpose.xlu0.b32.end [2/2] (short) (narrow) %v9897_v5, 8 }
0x1564   : > { %v7855_v12 = vpop.trf.xlu0 }
0x1565   : > { %v11872_v17 = vadd.f32 %v11869_v16, %v7855_v12 }
0x1567   : > { %v8142_v28 = vmax.f32 %v11872_v17, 0.0 }
0x1568   : > { %v7887_v32 = vpop.trf.xlu1 }
0x1569   : > { %v8133_v47 = vadd.f32 %v11869_v16, %v7887_v32  ;;  %8166 = vrot.lane.b32.xlu1 %v8142_v28, %s10301_s17 }
0x156b   : > { %v11879_v26 = vmax.f32 %v8133_v47, 0.0 }
0x156c   : > { %v7919_v51 = vpop.trf.xlu0 }
0x156d   : > { %v8134_v59 = vadd.f32 %v11869_v16, %v7919_v51  ;;  %8168 = vrot.lane.b32.xlu0 %v11879_v26, %s10301_s17  ;;  %8191 = vrot.lane.b32.xlu1 %v11879_v26, %s10302_s18 }
0x156f   : > { %v11886_v2 = vmax.f32 %v8134_v59, 0.0 }
0x1570   : > { %v7951_v54 = vpop.trf.xlu1 }
0x1571   : > { %v8135_v44 = vadd.f32 %v11869_v16, %v7951_v54  ;;  %8193 = vrot.lane.b32.xlu1 %v11886_v2, %s10302_s18 }
0x1573   : > { %v11891_v52 = vmax.f32 %v8135_v44, 0.0 }
0x1574   : > { %v7983_v23 = vpop.trf.xlu0 }
0x1575   : > { %v8136_v4 = vadd.f32 %v11869_v16, %v7983_v23  ;;  %8172 = vrot.lane.b32.xlu0 %v11891_v52, %s10301_s17  ;;  %8170 = vrot.lane.b32.xlu1 %v11886_v2, %s10301_s17 }
0x1577   : > { %v11898_v27 = vmax.f32 %v8136_v4, 0.0 }
0x1578   : > { %v8015_v14 = vpop.trf.xlu1 }
0x1579   : > { %v8137_v35 = vadd.f32 %v11869_v16, %v8015_v14  ;;  %8195 = vrot.lane.b32.xlu1 %v11891_v52, %s10302_s18  ;;  %8197 = vrot.lane.b32.xlu0 %v11898_v27, %s10302_s18 }
0x157b   : > { %v11905_v10 = vmax.f32 %v8137_v35, 0.0 }
0x157c   : > { %v8047_v63 = vpop.trf.xlu0 }
0x157d   : > { %v8138_v25 = vadd.f32 %v11869_v16, %v8047_v63  ;;  %8174 = vrot.lane.b32.xlu1 %v11898_v27, %s10301_s17  ;;  %8176 = vrot.lane.b32.xlu0 %v11905_v10, %s10301_s17 }
0x157f   : > { %v11924_v21 = vmax.f32 %v8138_v25, 0.0 }
0x1580   : > { %v8079_v9 = vpop.trf.xlu1 }
0x1581   : > { %v8139_v39 = vadd.f32 %v11869_v16, %v8079_v9  ;;  %8199 = vrot.lane.b32.xlu1 %v11905_v10, %s10302_s18  ;;  %8201 = vrot.lane.b32.xlu0 %v11924_v21, %s10302_s18 }
0x1583   : > { %v8149_v31 = vmax.f32 %v8139_v39, 0.0 }
0x1584   : > { %v8111_v30 = vpop.trf.xlu0 }
0x1585   : > { %v8140_v37 = vadd.f32 %v11869_v16, %v8111_v30  ;;  %8178 = vrot.lane.b32.xlu1 %v11924_v21, %s10301_s17  ;;  %8180 = vrot.lane.b32.xlu0 %v8149_v31, %s10301_s17  ;;  %s8878_s17 = sshll.u32 %s10364_s25, 10 }
0x1586   : > { %s11985_s28 = scalar_lea.hbm %s12087_s5, %s8878_s17 }
0x1587   : > { %v8150_v38 = vmax.f32 %v8140_v37, 0.0 }
0x1589   : > { %8203 = vrot.lane.b32.xlu1 %v8149_v31, %s10302_s18  ;;  %8205 = vrot.lane.b32.xlu0 %v8150_v38, %s10302_s18  ;;  %s8407_s18 = sshll.u32 %s11170_s26, 4  ;;  %s10209_s26 = scalar_lea.vmem %s10208_s11, 2048  ;;  %s11987_s18 = int_to_ptr.vmem [resolvable:$true] %s8407_s18 }
0x158a   : > { %s10203_s9 = scalar_lea.vmem %s11987_s18, 1024  ;;  %p10210_p0 = scmp.lt.s32.totalorder %s11987_s18, %s10208_s11 }
0x158b   : > { %p10204_p11 = scmp.ne.s32.totalorder %s11987_s18, %s10203_s9  ;;  %p10211_p1 = scmp.lt.s32.totalorder %s10209_s26, %s10203_s9 }
0x158d   : > { %p10205_p12 = pnand %p10204_p11, %p10381_p5  ;;  %p10212_p2 = por %p10211_p1, %p10210_p0 }
0x158f   : > { %p10206_p13 = pneg %p10205_p12 }
0x1591   : > { %p10213_p3 = pnand %p10212_p2, %p10206_p13 }
0x15b2   : > { %7807 = vxpose.xlu1.b32.start [1/2] (short) (narrow) %v11864_v19, 8 }
0x15b6   : > { %7808 = vxpose.xlu1.b32.end [2/2] (short) (narrow) %v11862_v46, 8 }
0x15db   : > { %v8167_v40 = vpop.permute.xlu1 %8166 }
0x15df   : > { %v8192_v55 = vpop.permute.xlu1 %8191  ;;  %v8169_v45 = vpop.permute.xlu0 %8168 }
0x15e0   : > { %v8216_v43 = vsel %vm2116_vm6, %v8142_v28, %v8169_v45 }
0x15e3   : > { %v8194_v20 = vpop.permute.xlu1 %8193 }
0x15e4   : > { %v8224_v58 = vsel %vm627_vm4, %v8216_v43, %v8194_v20 }
0x15e7   : > { %v8171_v1 = vpop.permute.xlu1 %8170  ;;  %v8173_v49 = vpop.permute.xlu0 %8172 }
0x15e8   : > { %v8217_v3 = vsel %vm2116_vm6, %v11879_v26, %v8171_v1  ;;  %v8218_v57 = vsel %vm2116_vm6, %v11886_v2, %v8173_v49 }
0x15eb   : > { %v8196_v41 = vpop.permute.xlu1 %8195  ;;  %v8198_v53 = vpop.permute.xlu0 %8197 }
0x15ec   : > { %v8225_v13 = vsel %vm627_vm4, %v8217_v3, %v8196_v41  ;;  %v8226_v5 = vsel %vm627_vm4, %v8218_v57, %v8198_v53 }
0x15ef   : > { %v8175_v18 = vpop.permute.xlu1 %8174  ;;  %v8177_v60 = vpop.permute.xlu0 %8176 }
0x15f0   : > { %v8219_v8 = vsel %vm2116_vm6, %v11891_v52, %v8175_v18  ;;  %v8220_v12 = vsel %vm2116_vm6, %v11898_v27, %v8177_v60 }
0x15f3   : > { %v8200_v48 = vpop.permute.xlu1 %8199  ;;  %v8202_v19 = vpop.permute.xlu0 %8201 }
0x15f4   : > { %v8228_v17 = vsel %vm627_vm4, %v8220_v12, %v8202_v19 }
0x15f7   : > { %v8179_v24 = vpop.permute.xlu1 %8178  ;;  %v8181_v61 = vpop.permute.xlu0 %8180 }
0x15f8   : > { %v8221_v28 = vsel %vm2116_vm6, %v11905_v10, %v8179_v24  ;;  %v8222_v26 = vsel %vm2116_vm6, %v11924_v21, %v8181_v61 }
0x15fb   : > { %v8204_v62 = vpop.permute.xlu1 %8203  ;;  %v8206_v47 = vpop.permute.xlu0 %8205 }
0x15fc   : > { %v8229_v32 = vsel %vm627_vm4, %v8221_v28, %v8204_v62  ;;  %v8230_v51 = vsel %vm627_vm4, %v8222_v26, %v8206_v47 }
0x1632   : > { %v7823_v56 = vpop.trf.xlu1 }
0x1633   : > { %v8131_v11 = vadd.f32 %v11869_v16, %v7823_v56  ;;  %v8227_v16 = vsel %vm627_vm4, %v8219_v8, %v8200_v48 }
0x1635   : > { %v8141_v42 = vmax.f32 %v8131_v11, 0.0 }
0x1637   : > { %v8215_v46 = vsel %vm2116_vm6, %v8141_v42, %v8167_v40 }
0x1638   : > { %v8223_v50 = vsel %vm627_vm4, %v8215_v46, %v8192_v55 }
0x1639   : > { %9910 = vmatprep.mubr.msk.f32.mxu1 %vm2141_vm7, %v8223_v50 }
0x163a   : > { %9911 = vmatmul.mubr.msk.f32.vlgmr.msra.gmra.mrb[100].mxu1 %vm2141_vm7, %v8224_v58 }
0x163b   : > { %9913 = vmatprep.mubr.msk.f32.mxu1 %vm2141_vm7, %v8225_v13 }
0x163e   : > { %9914 = vmatmul.mubr.msk.f32.gmra.mrb[102].mxu1 %vm2141_vm7, %v8226_v5 }
0x163f   : > { %9916 = vmatprep.mubr.msk.f32.mxu1 %vm2141_vm7, %v8227_v16 }
0x1642   : > { %9917 = vmatmul.mubr.msk.f32.gmra.mrb[104].mxu1 %vm2141_vm7, %v8228_v17 }
0x1643   : > { %9919 = vmatprep.mubr.msk.f32.mxu1 %vm2141_vm7, %v8229_v32 }
0x1646   : > { %9920 = vmatmul.mubr.msk.f32.gmra.mrb[106].mxu1 %vm2141_vm7, %v8230_v51 }
0x1647   : > { %10216 = shalt.err (!%p10213_p3)
}
0x1648   : > { %s10217_s12 = scalar_lea.hbm %s11985_s28, 1024  ;;  %s10221_s15 = scalar_lea.hbm %s12087_s5, 2048 }
0x1649   : > { %p10218_p4 = scmp.ne.s32.totalorder %s11985_s28, %s10217_s12  ;;  %p10222_p9 = scmp.lt.u32.totalorder %s11985_s28, %s12087_s5 }
0x164a   : > { %p10223_p10 = scmp.lt.u32.totalorder %s10221_s15, %s10217_s12  ;;  %p10225_p12 = scmp.lt.u32.totalorder %s10217_s12, %s11985_s28 }
0x164b   : > { %p10219_p7 = pnand %p10218_p4, %p10381_p5 }
0x164c   : > { %p10224_p11 = por %p10223_p10, %p10222_p9 }
0x164d   : > { %p10220_p8 = pneg %p10219_p7 }
0x164e   : > { %p10226_p13 = por %p10225_p12, %p10224_p11 }
0x1650   : > { %p10227_p0 = pnand %p10226_p13, %p10220_p8 }
0x1652   : > { %10230 = shalt.err (!%p10227_p0)
}
0x1653   : > { %s10305_s9 = smov 128   ;;  %s10306_s10 = smov 8   ;;  %v8868_v59 = vld [vmem:[%s12086_s4 + $0x130] ss:$0 sm:$0xff] }
0x1654   : > { %10148 = dma.vmem_to_hbm [thread:$0]  (%p10381_p5), %s11987_s18, 1024, %s11985_s28, %s8389_s29, %s10305_s9, %s10305_s9, %s10306_s10  }
0x1655   : > { %s12092_s12 = sshll.u32 %s11162_s14, 6  ;;  %s12032_s20 = scalar_lea.hbm %s12088_s6, %s8878_s17 }
0x1656   : > { %s255_s13 = scalar_lea.vmem [#allocation4], %s12092_s12  ;;  %s8394_s15 = scalar_lea.sflag [#allocation5], %s11162_s14 }
0x1657   : > { %s8423_s18 = sshll.u32 %s255_s13, 4  ;;  %s10307_s25 = smov [#allocation4]   ;;  %s12034_s18 = int_to_ptr.vmem [resolvable:$true] %s8423_s18 }
0x1658   : > { %s10231_s16 = scalar_lea.vmem %s12034_s18, 1024  ;;  %s10235_s19 = sshll.u32 %s10307_s25, 4  ;;  %s10236_s19 = int_to_ptr.vmem [resolvable:$false] %s10235_s19 }
0x1659   : > { %p10232_p1 = scmp.ne.s32.totalorder %s12034_s18, %s10231_s16  ;;  %s10237_s17 = scalar_lea.vmem %s10236_s19, 2048 }
0x165a   : > { %p10238_p4 = scmp.lt.s32.totalorder %s12034_s18, %s10236_s19  ;;  %p10239_p7 = scmp.lt.s32.totalorder %s10237_s17, %s10231_s16 }
0x165b   : > { %p10233_p2 = pnand %p10232_p1, %p10381_p5 }
0x165c   : > { %p10240_p8 = por %p10239_p7, %p10238_p4 }
0x165d   : > { %p10234_p3 = pneg %p10233_p2 }
0x165f   : > { %p10241_p9 = pnand %p10240_p8, %p10234_p3 }
0x170d   : > { %v9912_v2 = vpop.f32.mrb[100].mxu1 }
0x170e   : > { %v8365_v54 = vadd.f32 %v9912_v2, %v8868_v59  ;;  %v8321_v44 = vpop.f32.mrb[101].mxu1 }
0x170f   : > { %v8364_v52 = vadd.f32 %v8868_v59, %v8321_v44 }
0x1710   : > { %v8373_v23 = vmax.f32 %v8365_v54, 0.0 }
0x1711   : > { %v8372_v4 = vmax.f32 %v8364_v52, 0.0  ;;  %v9915_v27 = vpop.f32.mrb[102].mxu1 }
0x1712   : > { %8381 = vst.msk [vmem:[%s255_s13 + $0x8] sm:$0xff] %vm627_vm4, %v8373_v23  ;;  %v8367_v14 = vadd.f32 %v9915_v27, %v8868_v59  ;;  %v8331_v35 = vpop.f32.mrb[103].mxu1 }
0x1713   : > { %8380 = vst.msk [vmem:[%s255_s13] sm:$0xff] %vm627_vm4, %v8372_v4  ;;  %v8366_v10 = vadd.f32 %v8868_v59, %v8331_v35 }
0x1714   : > { %v8375_v63 = vmax.f32 %v8367_v14, 0.0 }
0x1715   : > { %v8374_v6 = vmax.f32 %v8366_v10, 0.0  ;;  %v9918_v29 = vpop.f32.mrb[104].mxu1 }
0x1716   : > { %8383 = vst.msk [vmem:[%s255_s13 + $0x18] sm:$0xff] %vm627_vm4, %v8375_v63  ;;  %v8369_v15 = vadd.f32 %v9918_v29, %v8868_v59  ;;  %v8341_v25 = vpop.f32.mrb[105].mxu1 }
0x1717   : > { %8382 = vst.msk [vmem:[%s255_s13 + $0x10] sm:$0xff] %vm627_vm4, %v8374_v6  ;;  %v8368_v7 = vadd.f32 %v8868_v59, %v8341_v25 }
0x1718   : > { %v8377_v0 = vmax.f32 %v8369_v15, 0.0 }
0x1719   : > { %v8376_v34 = vmax.f32 %v8368_v7, 0.0  ;;  %v9921_v21 = vpop.f32.mrb[106].mxu1 }
0x171a   : > { %8385 = vst.msk [vmem:[%s255_s13 + $0x28] sm:$0xff] %vm627_vm4, %v8377_v0  ;;  %v8371_v33 = vadd.f32 %v9921_v21, %v8868_v59  ;;  %v8351_v36 = vpop.f32.mrb[107].mxu1 }
0x171b   : > { %8384 = vst.msk [vmem:[%s255_s13 + $0x20] sm:$0xff] %vm627_vm4, %v8376_v34  ;;  %v8370_v9 = vadd.f32 %v8868_v59, %v8351_v36 }
0x171c   : > { %v8379_v39 = vmax.f32 %v8371_v33, 0.0 }
0x171d   : > { %v8378_v22 = vmax.f32 %v8370_v9, 0.0 }
0x171e   : > { %8387 = vst.msk [vmem:[%s255_s13 + $0x38] sm:$0xff] %vm627_vm4, %v8379_v39 }
0x171f   : > { %8386 = vst.msk [vmem:[%s255_s13 + $0x30] sm:$0xff] %vm627_vm4, %v8378_v22 }
0x1720   : > { %10244 = shalt.err (!%p10241_p9)
}
0x1721   : > { %s10245_s11 = scalar_lea.hbm %s12032_s20, 1024  ;;  %s10249_s13 = scalar_lea.hbm %s12088_s6, 2048 }
0x1722   : > { %p10246_p10 = scmp.ne.s32.totalorder %s12032_s20, %s10245_s11  ;;  %p10250_p13 = scmp.lt.u32.totalorder %s12032_s20, %s12088_s6 }
0x1723   : > { %p10251_p0 = scmp.lt.u32.totalorder %s10249_s13, %s10245_s11  ;;  %p10253_p2 = scmp.lt.u32.totalorder %s10245_s11, %s12032_s20 }
0x1724   : > { %p10247_p11 = pnand %p10246_p10, %p10381_p5 }
0x1725   : > { %p10252_p1 = por %p10251_p0, %p10250_p13 }
0x1726   : > { %p10248_p12 = pneg %p10247_p11 }
0x1727   : > { %p10254_p3 = por %p10253_p2, %p10252_p1 }
0x1729   : > { %p10255_p4 = pnand %p10254_p3, %p10248_p12 }
0x172b   : > { %10258 = shalt.err (!%p10255_p4)
}
0x172c   : > { %10149 = dma.vmem_to_hbm [thread:$0]  (%p10381_p5), %s12034_s18, 1024, %s12032_s20, %s8394_s15, %s10305_s9, %s10305_s9, %s10306_s10  }
0x172d PF: > { %p10159_p7 = scmp.ge.s32.totalorder %s10297_s24, 2  ;;  %s8438_s16 = sand.u32 1, %s10285_s21  }
0x172e   : > { %s8439_s25 = scalar_lea.sflag [#allocation3], %s8438_s16 }
0x172f   : > { %p10153_p8 = pnand %p10159_p7, %p10385_p6 }
0x1731   : > { %10276 = dma.done.wait (!%p10153_p8), %s8439_s25, 1024  }
0x1732   : > { %10278 = vsyncadd (!%p10153_p8), %s8439_s25, 4294966272  ;;  %s8448_s7 = scalar_lea.sflag [#allocation5], %s8438_s16 }
0x1733   : > { %10280 = dma.done.wait (!%p10153_p8), %s8448_s7, 1024  }
0x1734   : > { %10282 = vsyncadd (!%p10153_p8), %s8448_s7, 4294966272  ;;  %p20_p5 = scmp.ge.s32.totalorder %s10368_s27, 4   ;;  %s12093_s21 = smov %s10289_s22 }
0x1735   : > { %s12094_s22 = smov %s10293_s23  ;;  %s12095_s23 = smov %s10379_s30 }
0x1736   : > { %s12096_s24 = smov %s10368_s27  ;;  %22 = sbr.rel (!%p20_p5) target bundleno = 5 (0x5), region = 94 }
0x173d   :  { %8453 = vsyncpa [#allocation3], 1 }
0x173e   :  { %8455 = vsyncpa [#allocation3 + $0x1], 1 }
0x173f   :  { %8456 = vsyncpa [#allocation5], 1 }
0x1740   :  { %8458 = vsyncpa [#allocation5 + $0x1], 1 }

</bundles_post_ra>
